<compile_context>
chip_gen: v7x
topology: tpu7x:2x2x1
jax: 0.10.0
libtpu: 0.0.40
codegen_flags: <defaults>
</compile_context>

<pallas_src>
import functools

import jax
import jax.numpy as jnp
from jax import lax
from jax.experimental import pallas as pl
from jax.experimental.pallas import tpu as pltpu


# ------------------------------ fused kernel ------------------------------

def _mpcat_kernel(fa_ref, fv_ref, fl_ref, bias_ref,
                  wq_ref, bq_ref, wkv_ref, bkv_ref, wo_ref, bo_ref,
                  w1_ref, b1_ref, w2_ref, b2_ref,
                  ln1g_ref, ln1b_ref, ln2g_ref, ln2b_ref,
                  oa_ref, ov_ref, ol_ref,
                  *, num_layers, num_heads, seq, d_model, eps):
    S, D, H = seq, d_model, num_heads
    dh = D // H
    scale = 1.0 / float(dh) ** 0.5
    f32 = jnp.float32
    bf16 = jnp.bfloat16

    # (1, 2S) additive key-padding bias for the concatenated KV axis; loaded
    # once and reused by every layer, modality and head (loop-invariant).
    bias = bias_ref[...]

    def layer_norm(x, g, b):
        mean = jnp.mean(x, axis=-1, keepdims=True)
        xc = x - mean
        var = jnp.mean(xc * xc, axis=-1, keepdims=True)
        return xc * lax.rsqrt(var + eps) * g + b

    def cross_attention(m, x, kv):
        """Queries x (S, D) attend over kv (2S, D) = VMEM concat of the two other
        modalities.  Full-width bf16 projections feed the MXU; per-head score /
        context matmuls use static lane slices of the projected activations;
        head-concat + output projection is fused into a per-head accumulate."""
        x_b = x.astype(bf16)
        kv_b = kv.astype(bf16)
        q = jnp.dot(x_b, wq_ref[m], preferred_element_type=f32) + bq_ref[m]        # (S, D)
        kvp = jnp.dot(kv_b, wkv_ref[m], preferred_element_type=f32) + bkv_ref[m]   # (2S, 2D)

        acc = jnp.zeros((S, D), f32)
        # H is small & static -> static Python loop keeps every lane slice static.
        # TODO(synk): for large H move heads onto a grid axis instead.
        for h in range(H):
            lo, hi = h * dh, (h + 1) * dh
            q_h = q[:, lo:hi].astype(bf16)                    # (S, dh)
            k_h = kvp[:, lo:hi].astype(bf16)                  # (2S, dh)
            v_h = kvp[:, D + lo:D + hi].astype(bf16)          # (2S, dh)
            # NT dot_general: contract on the last axis of both operands.
            s = lax.dot_general(q_h, k_h, (((1,), (1,)), ((), ())),
                                preferred_element_type=f32) * scale + bias   # (S, 2S)
            mx = jnp.max(s, axis=-1, keepdims=True)
            p = jnp.exp(s - mx)
            # approx=True uses the EUP reciprocal (free slot); set False for
            # bit-exact softmax normalization.
            inv = pl.reciprocal(jnp.sum(p, axis=-1, keepdims=True), approx=True)
            ctx = jnp.dot(p.astype(bf16), v_h, preferred_element_type=f32) * inv  # (S, dh)
            # Fused head-concat + output projection: ctx_h @ Wo[h*dh:(h+1)*dh, :]
            acc = acc + jnp.dot(ctx.astype(bf16), wo_ref[m, lo:hi, :],
                                preferred_element_type=f32)
        return acc + bo_ref[m]

    def encoder_sublayer(m, x, kv):
        attn = cross_attention(m, x, kv)
        x1 = layer_norm(x + attn, ln1g_ref[m], ln1b_ref[m])
        hid = jnp.maximum(
            jnp.dot(x1.astype(bf16), w1_ref[m], preferred_element_type=f32) + b1_ref[m],
            0.0)
        ffn = jnp.dot(hid.astype(bf16), w2_ref[m], preferred_element_type=f32) + b2_ref[m]
        return layer_norm(x1 + ffn, ln2g_ref[m], ln2b_ref[m])

    def layer_body(_, carry):
        fa, fv, fl = carry
        # VMEM sublane concat of the two KV modalities (hoisted out of the head
        # loop): one K|V projection and one softmax per modality.
        kv_a = jnp.concatenate([fv, fl], axis=0)
        kv_v = jnp.concatenate([fa, fl], axis=0)
        kv_l = jnp.concatenate([fa, fv], axis=0)
        na = encoder_sublayer(0, fa, kv_a)
        nv = encoder_sublayer(1, fv, kv_v)
        nl = encoder_sublayer(2, fl, kv_l)
        return (na, nv, nl)

    # Whole deep-copied layer stack inside the kernel; fori_loop bounds live
    # ranges and keeps code size independent of num_layers.
    init = (fa_ref[...], fv_ref[...], fl_ref[...])
    fa, fv, fl = lax.fori_loop(0, num_layers, layer_body, init)

    oa_ref[...] = fa
    ov_ref[...] = fv
    ol_ref[...] = fl


# ------------------------------ host wrapper ------------------------------

def _mpcat_forward(params, features_a, features_v, features_l, key_padding_mask,
                   *, num_layers, num_heads, eps=1e-5):
    B, S, D = features_a.shape
    assert D % num_heads == 0

    # Additive key-padding bias (True = padded), built once for the concatenated
    # (2-modality) KV axis and reused by every layer / modality / head.
    neg = jnp.where(key_padding_mask, -1e9, 0.0).astype(jnp.float32)   # (B, S)
    bias = jnp.concatenate([neg, neg], axis=-1)[:, None, :]            # (B, 1, 2S)

    bf16 = jnp.bfloat16
    # Matmul weights go through the MXU in bf16 (cast once here); biases and
    # LayerNorm params stay f32 (elementwise path stays f32 everywhere).
    kernel_inputs = (
        features_a, features_v, features_l, bias,
        params["wq"].astype(bf16), params["bq"],
        params["wkv"].astype(bf16), params["bkv"],
        params["wo"].astype(bf16), params["bo"],
        params["w1"].astype(bf16), params["b1"],
        params["w2"].astype(bf16), params["b2"],
        params["ln1_g"], params["ln1_b"], params["ln2_g"], params["ln2_b"])

    feat_spec = pl.BlockSpec((None, S, D), lambda b: (b, 0, 0))
    bias_spec = pl.BlockSpec((None, 1, 2 * S), lambda b: (b, 0, 0))

    def full_spec(a):
        # Grid-invariant (weight) block: full array, constant block index.
        return pl.BlockSpec(a.shape, lambda b, _n=a.ndim: (0,) * _n)

    in_specs = [feat_spec, feat_spec, feat_spec, bias_spec] + \
               [full_spec(a) for a in kernel_inputs[4:]]
    out_specs = [feat_spec, feat_spec, feat_spec]
    out_shape = tuple(jax.ShapeDtypeStruct((B, S, D), jnp.float32) for _ in range(3))

    # VMEM budget from the real footprint: resident weights + double-buffered
    # per-program feature/bias/output blocks, plus headroom.
    def nbytes(a):
        return int(a.size) * a.dtype.itemsize
    io_block_bytes = 6 * S * D * 4 + 2 * S * 4
    weight_bytes = sum(nbytes(a) for a in kernel_inputs[4:])
    vmem_limit = int(max(32 << 20,
                         min(100 << 20, 2 * (weight_bytes + io_block_bytes) + (4 << 20))))

    kernel = functools.partial(
        _mpcat_kernel, num_layers=num_layers, num_heads=num_heads,
        seq=S, d_model=D, eps=eps)

    oa, ov, ol = pl.pallas_call(
        kernel,
        out_shape=out_shape,
        grid=(B,),
        in_specs=in_specs,
        out_specs=out_specs,
        compiler_params=pltpu.CompilerParams(
            dimension_semantics=("parallel",),
            vmem_limit_bytes=vmem_limit),
    )(*kernel_inputs)
    return oa, ov, ol


class MPCATPallas:
    """Applies `num_layers` deep-copied (identical-parameter) cross-modal encoder
    layers sequentially — the whole stack runs as one fused Pallas kernel with a
    parallel batch grid."""

    def __init__(self, params, num_layers, num_heads):
        self.params = params
        self._fwd = jax.jit(functools.partial(
            _mpcat_forward, num_layers=num_layers, num_heads=num_heads))

    def __call__(self, features_a, features_v, features_l, key_padding_mask):
        return self._fwd(self.params, features_a, features_v, features_l,
                         key_padding_mask)


# ------------------------------ parameter init ------------------------------

def init_params(key, d_model, d_ff, num_heads):
    """Per-modality weights stacked over the 3 modalities.  Attention weights
    stay full-width ((D, D) for Q, fused (D, 2D) for K|V); head splitting happens
    in-kernel via static lane slices of the projected activations."""
    del num_heads

    def dense(k, fan_in, fan_out):
        return jax.random.normal(k, (fan_in, fan_out), jnp.float32) * 0.02

    names = ("wq", "bq", "wkv", "bkv", "wo", "bo", "w1", "b1", "w2", "b2",
             "ln1_g", "ln1_b", "ln2_g", "ln2_b")
    per_mod = {n: [] for n in names}
    for _ in range(3):
        key, *ks = jax.random.split(key, 6)
        per_mod["wq"].append(dense(ks[0], d_model, d_model))
        per_mod["wkv"].append(dense(ks[1], d_model, 2 * d_model))   # K | V fused
        per_mod["wo"].append(dense(ks[2], d_model, d_model))
        per_mod["w1"].append(dense(ks[3], d_model, d_ff))
        per_mod["w2"].append(dense(ks[4], d_ff, d_model))
        per_mod["bq"].append(jnp.zeros((1, d_model), jnp.float32))
        per_mod["bkv"].append(jnp.zeros((1, 2 * d_model), jnp.float32))
        per_mod["bo"].append(jnp.zeros((1, d_model), jnp.float32))
        per_mod["b1"].append(jnp.zeros((1, d_ff), jnp.float32))
        per_mod["b2"].append(jnp.zeros((1, d_model), jnp.float32))
        per_mod["ln1_g"].append(jnp.ones((1, d_model), jnp.float32))
        per_mod["ln1_b"].append(jnp.zeros((1, d_model), jnp.float32))
        per_mod["ln2_g"].append(jnp.ones((1, d_model), jnp.float32))
        per_mod["ln2_b"].append(jnp.zeros((1, d_model), jnp.float32))
    return {n: jnp.stack(v, axis=0) for n, v in per_mod.items()}


# ---------------------------------- main ----------------------------------

if __name__ == "__main__":
    B, S, D, H, FF = 2, 8, 32, 4, 64
    NUM_LAYERS = 2

    root = jax.random.PRNGKey(0)
    k_p, k_a, k_v, k_l = jax.random.split(root, 4)

    params = init_params(k_p, D, FF, H)
    features_a = jax.random.normal(k_a, (B, S, D), jnp.float32)
    features_v = jax.random.normal(k_v, (B, S, D), jnp.float32)
    features_l = jax.random.normal(k_l, (B, S, D), jnp.float32)

    # True = padded position (PyTorch key_padding_mask convention).
    lengths = jnp.array([8, 6], dtype=jnp.int32)
    key_padding_mask = jnp.arange(S)[None, :] >= lengths[:, None]      # (B, S) bool

    model = MPCATPallas(params, NUM_LAYERS, H)
    out_a, out_v, out_l = model(features_a, features_v, features_l, key_padding_mask)

    jax.block_until_ready((out_a, out_v, out_l))
    assert out_a.shape == (B, S, D) and out_v.shape == (B, S, D) and out_l.shape == (B, S, D)
    assert bool(jnp.isfinite(out_a).all()) and bool(jnp.isfinite(out_v).all()) \
        and bool(jnp.isfinite(out_l).all())
    print("KERNEL_OK")
</pallas_src>

<mosaic_0001>
module attributes {stable_mosaic.version = 11 : i64} {
  func.func @_mpcat_kernel(%arg0: i32, %arg1: memref<1x8x32xf32, #tpu.memory_space<vmem>>, %arg2: memref<1x8x32xf32, #tpu.memory_space<vmem>>, %arg3: memref<1x8x32xf32, #tpu.memory_space<vmem>>, %arg4: memref<1x1x16xf32, #tpu.memory_space<vmem>>, %arg5: memref<3x32x32xbf16, #tpu.memory_space<vmem>>, %arg6: memref<3x1x32xf32, #tpu.memory_space<vmem>>, %arg7: memref<3x32x64xbf16, #tpu.memory_space<vmem>>, %arg8: memref<3x1x64xf32, #tpu.memory_space<vmem>>, %arg9: memref<3x32x32xbf16, #tpu.memory_space<vmem>>, %arg10: memref<3x1x32xf32, #tpu.memory_space<vmem>>, %arg11: memref<3x32x64xbf16, #tpu.memory_space<vmem>>, %arg12: memref<3x1x64xf32, #tpu.memory_space<vmem>>, %arg13: memref<3x64x32xbf16, #tpu.memory_space<vmem>>, %arg14: memref<3x1x32xf32, #tpu.memory_space<vmem>>, %arg15: memref<3x1x32xf32, #tpu.memory_space<vmem>>, %arg16: memref<3x1x32xf32, #tpu.memory_space<vmem>>, %arg17: memref<3x1x32xf32, #tpu.memory_space<vmem>>, %arg18: memref<3x1x32xf32, #tpu.memory_space<vmem>>, %arg19: memref<1x8x32xf32, #tpu.memory_space<vmem>>, %arg20: memref<1x8x32xf32, #tpu.memory_space<vmem>>, %arg21: memref<1x8x32xf32, #tpu.memory_space<vmem>>) attributes {dimension_semantics = [#tpu.dimension_semantics<parallel>], iteration_bounds = array<i64: 2>, scalar_prefetch = 0 : i64, scratch_operands = 0 : i64, tpu.core_type = #tpu.core_type<tc>, window_params = [{transform_indices = @transform_0, window_bounds = array<i64: 1, 8, 32>}, {transform_indices = @transform_1, window_bounds = array<i64: 1, 8, 32>}, {transform_indices = @transform_2, window_bounds = array<i64: 1, 8, 32>}, {transform_indices = @transform_3, window_bounds = array<i64: 1, 1, 16>}, {pipeline_mode = #tpu.pipeline_mode<synchronous>, transform_indices = @transform_4, window_bounds = array<i64: 3, 32, 32>}, {pipeline_mode = #tpu.pipeline_mode<synchronous>, transform_indices = @transform_5, window_bounds = array<i64: 3, 1, 32>}, {pipeline_mode = #tpu.pipeline_mode<synchronous>, transform_indices = @transform_6, window_bounds = array<i64: 3, 32, 64>}, {pipeline_mode = #tpu.pipeline_mode<synchronous>, transform_indices = @transform_7, window_bounds = array<i64: 3, 1, 64>}, {pipeline_mode = #tpu.pipeline_mode<synchronous>, transform_indices = @transform_8, window_bounds = array<i64: 3, 32, 32>}, {pipeline_mode = #tpu.pipeline_mode<synchronous>, transform_indices = @transform_9, window_bounds = array<i64: 3, 1, 32>}, {pipeline_mode = #tpu.pipeline_mode<synchronous>, transform_indices = @transform_10, window_bounds = array<i64: 3, 32, 64>}, {pipeline_mode = #tpu.pipeline_mode<synchronous>, transform_indices = @transform_11, window_bounds = array<i64: 3, 1, 64>}, {pipeline_mode = #tpu.pipeline_mode<synchronous>, transform_indices = @transform_12, window_bounds = array<i64: 3, 64, 32>}, {pipeline_mode = #tpu.pipeline_mode<synchronous>, transform_indices = @transform_13, window_bounds = array<i64: 3, 1, 32>}, {pipeline_mode = #tpu.pipeline_mode<synchronous>, transform_indices = @transform_14, window_bounds = array<i64: 3, 1, 32>}, {pipeline_mode = #tpu.pipeline_mode<synchronous>, transform_indices = @transform_15, window_bounds = array<i64: 3, 1, 32>}, {pipeline_mode = #tpu.pipeline_mode<synchronous>, transform_indices = @transform_16, window_bounds = array<i64: 3, 1, 32>}, {pipeline_mode = #tpu.pipeline_mode<synchronous>, transform_indices = @transform_17, window_bounds = array<i64: 3, 1, 32>}, {transform_indices = @transform_18, window_bounds = array<i64: 1, 8, 32>}, {transform_indices = @transform_19, window_bounds = array<i64: 1, 8, 32>}, {transform_indices = @transform_20, window_bounds = array<i64: 1, 8, 32>}]} {
    %c0 = arith.constant 0 : index
    %c0_0 = arith.constant 0 : index
    %c0_1 = arith.constant 0 : index
    %0 = vector.load %arg4[%c0, %c0_0, %c0_1] : memref<1x1x16xf32, #tpu.memory_space<vmem>>, vector<1x1x16xf32>
    %1 = vector.shape_cast %0 : vector<1x1x16xf32> to vector<1x16xf32>
    %c0_2 = arith.constant 0 : index
    %c0_3 = arith.constant 0 : index
    %c0_4 = arith.constant 0 : index
    %2 = vector.load %arg1[%c0_2, %c0_3, %c0_4] : memref<1x8x32xf32, #tpu.memory_space<vmem>>, vector<1x8x32xf32>
    %3 = vector.shape_cast %2 : vector<1x8x32xf32> to vector<8x32xf32>
    %c0_5 = arith.constant 0 : index
    %c0_6 = arith.constant 0 : index
    %c0_7 = arith.constant 0 : index
    %4 = vector.load %arg2[%c0_5, %c0_6, %c0_7] : memref<1x8x32xf32, #tpu.memory_space<vmem>>, vector<1x8x32xf32>
    %5 = vector.shape_cast %4 : vector<1x8x32xf32> to vector<8x32xf32>
    %c0_8 = arith.constant 0 : index
    %c0_9 = arith.constant 0 : index
    %c0_10 = arith.constant 0 : index
    %6 = vector.load %arg3[%c0_8, %c0_9, %c0_10] : memref<1x8x32xf32, #tpu.memory_space<vmem>>, vector<1x8x32xf32>
    %7 = vector.shape_cast %6 : vector<1x8x32xf32> to vector<8x32xf32>
    %c0_i32 = arith.constant 0 : i32
    %c2_i32 = arith.constant 2 : i32
    %8 = arith.addi %c0_i32, %c2_i32 : i32
    %c1_i32 = arith.constant 1 : i32
    %9:3 = scf.for %arg22 = %c0_i32 to %8 step %c1_i32 iter_args(%arg23 = %3, %arg24 = %5, %arg25 = %7) -> (vector<8x32xf32>, vector<8x32xf32>, vector<8x32xf32>)  : i32 {
      %19 = tpu.concatenate %arg24, %arg25 in 0 : vector<8x32xf32>, vector<8x32xf32> -> vector<16x32xf32>
      %20 = tpu.concatenate %arg23, %arg25 in 0 : vector<8x32xf32>, vector<8x32xf32> -> vector<16x32xf32>
      %21 = tpu.concatenate %arg23, %arg24 in 0 : vector<8x32xf32>, vector<8x32xf32> -> vector<16x32xf32>
      %22 = arith.truncf %arg23 : vector<8x32xf32> to vector<8x32xbf16>
      %23 = arith.truncf %19 : vector<16x32xf32> to vector<16x32xbf16>
      %c0_20 = arith.constant 0 : index
      %c0_21 = arith.constant 0 : index
      %c0_22 = arith.constant 0 : index
      %24 = vector.load %arg5[%c0_20, %c0_21, %c0_22] : memref<3x32x32xbf16, #tpu.memory_space<vmem>>, vector<1x32x32xbf16>
      %25 = vector.shape_cast %24 : vector<1x32x32xbf16> to vector<32x32xbf16>
      %cst = arith.constant dense<0.000000e+00> : vector<8x32xf32>
      %26 = tpu.matmul %22, %25, %cst {dimension_numbers = #tpu.dot_dimension_numbers<[1], [0], [0], [1], [0, 0, 1, 1], [], []>} : vector<8x32xbf16>, vector<32x32xbf16>, vector<8x32xf32> -> vector<8x32xf32>
      %c0_23 = arith.constant 0 : index
      %c0_24 = arith.constant 0 : index
      %c0_25 = arith.constant 0 : index
      %27 = vector.load %arg6[%c0_23, %c0_24, %c0_25] : memref<3x1x32xf32, #tpu.memory_space<vmem>>, vector<1x1x32xf32>
      %28 = vector.shape_cast %27 : vector<1x1x32xf32> to vector<1x32xf32>
      %29 = vector.broadcast %28 : vector<1x32xf32> to vector<8x32xf32>
      %30 = arith.addf %26, %29 : vector<8x32xf32>
      %c0_26 = arith.constant 0 : index
      %c0_27 = arith.constant 0 : index
      %c0_28 = arith.constant 0 : index
      %31 = vector.load %arg7[%c0_26, %c0_27, %c0_28] : memref<3x32x64xbf16, #tpu.memory_space<vmem>>, vector<1x32x64xbf16>
      %32 = vector.shape_cast %31 : vector<1x32x64xbf16> to vector<32x64xbf16>
      %cst_29 = arith.constant dense<0.000000e+00> : vector<16x64xf32>
      %33 = tpu.matmul %23, %32, %cst_29 {dimension_numbers = #tpu.dot_dimension_numbers<[1], [0], [0], [1], [0, 0, 1, 1], [], []>} : vector<16x32xbf16>, vector<32x64xbf16>, vector<16x64xf32> -> vector<16x64xf32>
      %c0_30 = arith.constant 0 : index
      %c0_31 = arith.constant 0 : index
      %c0_32 = arith.constant 0 : index
      %34 = vector.load %arg8[%c0_30, %c0_31, %c0_32] : memref<3x1x64xf32, #tpu.memory_space<vmem>>, vector<1x1x64xf32>
      %35 = vector.shape_cast %34 : vector<1x1x64xf32> to vector<1x64xf32>
      %36 = vector.broadcast %35 : vector<1x64xf32> to vector<16x64xf32>
      %37 = arith.addf %33, %36 : vector<16x64xf32>
      %cst_33 = arith.constant 0.000000e+00 : f32
      %38 = vector.broadcast %cst_33 : f32 to vector<8x32xf32>
      %39 = vector.extract_strided_slice %30 {offsets = [0, 0], sizes = [8, 8], strides = [1, 1]} : vector<8x32xf32> to vector<8x8xf32>
      %40 = arith.truncf %39 : vector<8x8xf32> to vector<8x8xbf16>
      %41 = vector.extract_strided_slice %37 {offsets = [0, 0], sizes = [16, 8], strides = [1, 1]} : vector<16x64xf32> to vector<16x8xf32>
      %42 = arith.truncf %41 : vector<16x8xf32> to vector<16x8xbf16>
      %43 = vector.extract_strided_slice %37 {offsets = [0, 32], sizes = [16, 8], strides = [1, 1]} : vector<16x64xf32> to vector<16x8xf32>
      %44 = arith.truncf %43 : vector<16x8xf32> to vector<16x8xbf16>
      %cst_34 = arith.constant dense<0.000000e+00> : vector<8x16xf32>
      %45 = tpu.matmul %40, %42, %cst_34 {dimension_numbers = #tpu.dot_dimension_numbers<[1], [1], [0], [0], [0, 0, 1, 0], [], []>} : vector<8x8xbf16>, vector<16x8xbf16>, vector<8x16xf32> -> vector<8x16xf32>
      %cst_35 = arith.constant 0.353553385 : f32
      %46 = vector.broadcast %cst_35 : f32 to vector<8x16xf32>
      %47 = arith.mulf %45, %46 : vector<8x16xf32>
      %48 = vector.broadcast %1 : vector<1x16xf32> to vector<8x16xf32>
      %49 = arith.addf %47, %48 : vector<8x16xf32>
      %cst_36 = arith.constant dense<0xFF800000> : vector<8xf32>
      %50 = vector.multi_reduction <maximumf>, %49, %cst_36 [1] : vector<8x16xf32> to vector<8xf32>
      %51 = vector.shape_cast %50 : vector<8xf32> to vector<8x1xf32>
      %52 = vector.broadcast %51 : vector<8x1xf32> to vector<8x16xf32>
      %53 = arith.subf %49, %52 : vector<8x16xf32>
      %54 = math.exp %53 : vector<8x16xf32>
      %cst_37 = arith.constant dense<0.000000e+00> : vector<8xf32>
      %55 = vector.multi_reduction <add>, %54, %cst_37 [1] : vector<8x16xf32> to vector<8xf32>
      %56 = vector.shape_cast %55 : vector<8xf32> to vector<8x1xf32>
      %57 = tpu.reciprocal %56 {approx = true} : vector<8x1xf32> -> vector<8x1xf32>
      %58 = arith.truncf %54 : vector<8x16xf32> to vector<8x16xbf16>
      %cst_38 = arith.constant dense<0.000000e+00> : vector<8x8xf32>
      %59 = tpu.matmul %58, %44, %cst_38 {dimension_numbers = #tpu.dot_dimension_numbers<[1], [0], [0], [1], [0, 0, 1, 1], [], []>} : vector<8x16xbf16>, vector<16x8xbf16>, vector<8x8xf32> -> vector<8x8xf32>
      %60 = vector.broadcast %57 : vector<8x1xf32> to vector<8x8xf32>
      %61 = arith.mulf %59, %60 : vector<8x8xf32>
      %62 = arith.truncf %61 : vector<8x8xf32> to vector<8x8xbf16>
      %c0_39 = arith.constant 0 : index
      %c0_40 = arith.constant 0 : index
      %c0_41 = arith.constant 0 : index
      %63 = vector.load %arg9[%c0_39, %c0_40, %c0_41] : memref<3x32x32xbf16, #tpu.memory_space<vmem>>, vector<1x8x32xbf16>
      %64 = vector.shape_cast %63 : vector<1x8x32xbf16> to vector<8x32xbf16>
      %cst_42 = arith.constant dense<0.000000e+00> : vector<8x32xf32>
      %65 = tpu.matmul %62, %64, %cst_42 {dimension_numbers = #tpu.dot_dimension_numbers<[1], [0], [0], [1], [0, 0, 1, 1], [], []>} : vector<8x8xbf16>, vector<8x32xbf16>, vector<8x32xf32> -> vector<8x32xf32>
      %66 = arith.addf %38, %65 : vector<8x32xf32>
      %67 = vector.extract_strided_slice %30 {offsets = [0, 8], sizes = [8, 8], strides = [1, 1]} : vector<8x32xf32> to vector<8x8xf32>
      %68 = arith.truncf %67 : vector<8x8xf32> to vector<8x8xbf16>
      %69 = vector.extract_strided_slice %37 {offsets = [0, 8], sizes = [16, 8], strides = [1, 1]} : vector<16x64xf32> to vector<16x8xf32>
      %70 = arith.truncf %69 : vector<16x8xf32> to vector<16x8xbf16>
      %71 = vector.extract_strided_slice %37 {offsets = [0, 40], sizes = [16, 8], strides = [1, 1]} : vector<16x64xf32> to vector<16x8xf32>
      %72 = arith.truncf %71 : vector<16x8xf32> to vector<16x8xbf16>
      %cst_43 = arith.constant dense<0.000000e+00> : vector<8x16xf32>
      %73 = tpu.matmul %68, %70, %cst_43 {dimension_numbers = #tpu.dot_dimension_numbers<[1], [1], [0], [0], [0, 0, 1, 0], [], []>} : vector<8x8xbf16>, vector<16x8xbf16>, vector<8x16xf32> -> vector<8x16xf32>
      %cst_44 = arith.constant 0.353553385 : f32
      %74 = vector.broadcast %cst_44 : f32 to vector<8x16xf32>
      %75 = arith.mulf %73, %74 : vector<8x16xf32>
      %76 = vector.broadcast %1 : vector<1x16xf32> to vector<8x16xf32>
      %77 = arith.addf %75, %76 : vector<8x16xf32>
      %cst_45 = arith.constant dense<0xFF800000> : vector<8xf32>
      %78 = vector.multi_reduction <maximumf>, %77, %cst_45 [1] : vector<8x16xf32> to vector<8xf32>
      %79 = vector.shape_cast %78 : vector<8xf32> to vector<8x1xf32>
      %80 = vector.broadcast %79 : vector<8x1xf32> to vector<8x16xf32>
      %81 = arith.subf %77, %80 : vector<8x16xf32>
      %82 = math.exp %81 : vector<8x16xf32>
      %cst_46 = arith.constant dense<0.000000e+00> : vector<8xf32>
      %83 = vector.multi_reduction <add>, %82, %cst_46 [1] : vector<8x16xf32> to vector<8xf32>
      %84 = vector.shape_cast %83 : vector<8xf32> to vector<8x1xf32>
      %85 = tpu.reciprocal %84 {approx = true} : vector<8x1xf32> -> vector<8x1xf32>
      %86 = arith.truncf %82 : vector<8x16xf32> to vector<8x16xbf16>
      %cst_47 = arith.constant dense<0.000000e+00> : vector<8x8xf32>
      %87 = tpu.matmul %86, %72, %cst_47 {dimension_numbers = #tpu.dot_dimension_numbers<[1], [0], [0], [1], [0, 0, 1, 1], [], []>} : vector<8x16xbf16>, vector<16x8xbf16>, vector<8x8xf32> -> vector<8x8xf32>
      %88 = vector.broadcast %85 : vector<8x1xf32> to vector<8x8xf32>
      %89 = arith.mulf %87, %88 : vector<8x8xf32>
      %90 = arith.truncf %89 : vector<8x8xf32> to vector<8x8xbf16>
      %c0_48 = arith.constant 0 : index
      %c8 = arith.constant 8 : index
      %c0_49 = arith.constant 0 : index
      %91 = vector.load %arg9[%c0_48, %c8, %c0_49] : memref<3x32x32xbf16, #tpu.memory_space<vmem>>, vector<1x8x32xbf16>
      %92 = vector.shape_cast %91 : vector<1x8x32xbf16> to vector<8x32xbf16>
      %cst_50 = arith.constant dense<0.000000e+00> : vector<8x32xf32>
      %93 = tpu.matmul %90, %92, %cst_50 {dimension_numbers = #tpu.dot_dimension_numbers<[1], [0], [0], [1], [0, 0, 1, 1], [], []>} : vector<8x8xbf16>, vector<8x32xbf16>, vector<8x32xf32> -> vector<8x32xf32>
      %94 = arith.addf %66, %93 : vector<8x32xf32>
      %95 = vector.extract_strided_slice %30 {offsets = [0, 16], sizes = [8, 8], strides = [1, 1]} : vector<8x32xf32> to vector<8x8xf32>
      %96 = arith.truncf %95 : vector<8x8xf32> to vector<8x8xbf16>
      %97 = vector.extract_strided_slice %37 {offsets = [0, 16], sizes = [16, 8], strides = [1, 1]} : vector<16x64xf32> to vector<16x8xf32>
      %98 = arith.truncf %97 : vector<16x8xf32> to vector<16x8xbf16>
      %99 = vector.extract_strided_slice %37 {offsets = [0, 48], sizes = [16, 8], strides = [1, 1]} : vector<16x64xf32> to vector<16x8xf32>
      %100 = arith.truncf %99 : vector<16x8xf32> to vector<16x8xbf16>
      %cst_51 = arith.constant dense<0.000000e+00> : vector<8x16xf32>
      %101 = tpu.matmul %96, %98, %cst_51 {dimension_numbers = #tpu.dot_dimension_numbers<[1], [1], [0], [0], [0, 0, 1, 0], [], []>} : vector<8x8xbf16>, vector<16x8xbf16>, vector<8x16xf32> -> vector<8x16xf32>
      %cst_52 = arith.constant 0.353553385 : f32
      %102 = vector.broadcast %cst_52 : f32 to vector<8x16xf32>
      %103 = arith.mulf %101, %102 : vector<8x16xf32>
      %104 = vector.broadcast %1 : vector<1x16xf32> to vector<8x16xf32>
      %105 = arith.addf %103, %104 : vector<8x16xf32>
      %cst_53 = arith.constant dense<0xFF800000> : vector<8xf32>
      %106 = vector.multi_reduction <maximumf>, %105, %cst_53 [1] : vector<8x16xf32> to vector<8xf32>
      %107 = vector.shape_cast %106 : vector<8xf32> to vector<8x1xf32>
      %108 = vector.broadcast %107 : vector<8x1xf32> to vector<8x16xf32>
      %109 = arith.subf %105, %108 : vector<8x16xf32>
      %110 = math.exp %109 : vector<8x16xf32>
      %cst_54 = arith.constant dense<0.000000e+00> : vector<8xf32>
      %111 = vector.multi_reduction <add>, %110, %cst_54 [1] : vector<8x16xf32> to vector<8xf32>
      %112 = vector.shape_cast %111 : vector<8xf32> to vector<8x1xf32>
      %113 = tpu.reciprocal %112 {approx = true} : vector<8x1xf32> -> vector<8x1xf32>
      %114 = arith.truncf %110 : vector<8x16xf32> to vector<8x16xbf16>
      %cst_55 = arith.constant dense<0.000000e+00> : vector<8x8xf32>
      %115 = tpu.matmul %114, %100, %cst_55 {dimension_numbers = #tpu.dot_dimension_numbers<[1], [0], [0], [1], [0, 0, 1, 1], [], []>} : vector<8x16xbf16>, vector<16x8xbf16>, vector<8x8xf32> -> vector<8x8xf32>
      %116 = vector.broadcast %113 : vector<8x1xf32> to vector<8x8xf32>
      %117 = arith.mulf %115, %116 : vector<8x8xf32>
      %118 = arith.truncf %117 : vector<8x8xf32> to vector<8x8xbf16>
      %c0_56 = arith.constant 0 : index
      %c16 = arith.constant 16 : index
      %c0_57 = arith.constant 0 : index
      %119 = vector.load %arg9[%c0_56, %c16, %c0_57] : memref<3x32x32xbf16, #tpu.memory_space<vmem>>, vector<1x8x32xbf16>
      %120 = vector.shape_cast %119 : vector<1x8x32xbf16> to vector<8x32xbf16>
      %cst_58 = arith.constant dense<0.000000e+00> : vector<8x32xf32>
      %121 = tpu.matmul %118, %120, %cst_58 {dimension_numbers = #tpu.dot_dimension_numbers<[1], [0], [0], [1], [0, 0, 1, 1], [], []>} : vector<8x8xbf16>, vector<8x32xbf16>, vector<8x32xf32> -> vector<8x32xf32>
      %122 = arith.addf %94, %121 : vector<8x32xf32>
      %123 = vector.extract_strided_slice %30 {offsets = [0, 24], sizes = [8, 8], strides = [1, 1]} : vector<8x32xf32> to vector<8x8xf32>
      %124 = arith.truncf %123 : vector<8x8xf32> to vector<8x8xbf16>
      %125 = vector.extract_strided_slice %37 {offsets = [0, 24], sizes = [16, 8], strides = [1, 1]} : vector<16x64xf32> to vector<16x8xf32>
      %126 = arith.truncf %125 : vector<16x8xf32> to vector<16x8xbf16>
      %127 = vector.extract_strided_slice %37 {offsets = [0, 56], sizes = [16, 8], strides = [1, 1]} : vector<16x64xf32> to vector<16x8xf32>
      %128 = arith.truncf %127 : vector<16x8xf32> to vector<16x8xbf16>
      %cst_59 = arith.constant dense<0.000000e+00> : vector<8x16xf32>
      %129 = tpu.matmul %124, %126, %cst_59 {dimension_numbers = #tpu.dot_dimension_numbers<[1], [1], [0], [0], [0, 0, 1, 0], [], []>} : vector<8x8xbf16>, vector<16x8xbf16>, vector<8x16xf32> -> vector<8x16xf32>
      %cst_60 = arith.constant 0.353553385 : f32
      %130 = vector.broadcast %cst_60 : f32 to vector<8x16xf32>
      %131 = arith.mulf %129, %130 : vector<8x16xf32>
      %132 = vector.broadcast %1 : vector<1x16xf32> to vector<8x16xf32>
      %133 = arith.addf %131, %132 : vector<8x16xf32>
      %cst_61 = arith.constant dense<0xFF800000> : vector<8xf32>
      %134 = vector.multi_reduction <maximumf>, %133, %cst_61 [1] : vector<8x16xf32> to vector<8xf32>
      %135 = vector.shape_cast %134 : vector<8xf32> to vector<8x1xf32>
      %136 = vector.broadcast %135 : vector<8x1xf32> to vector<8x16xf32>
      %137 = arith.subf %133, %136 : vector<8x16xf32>
      %138 = math.exp %137 : vector<8x16xf32>
      %cst_62 = arith.constant dense<0.000000e+00> : vector<8xf32>
      %139 = vector.multi_reduction <add>, %138, %cst_62 [1] : vector<8x16xf32> to vector<8xf32>
      %140 = vector.shape_cast %139 : vector<8xf32> to vector<8x1xf32>
      %141 = tpu.reciprocal %140 {approx = true} : vector<8x1xf32> -> vector<8x1xf32>
      %142 = arith.truncf %138 : vector<8x16xf32> to vector<8x16xbf16>
      %cst_63 = arith.constant dense<0.000000e+00> : vector<8x8xf32>
      %143 = tpu.matmul %142, %128, %cst_63 {dimension_numbers = #tpu.dot_dimension_numbers<[1], [0], [0], [1], [0, 0, 1, 1], [], []>} : vector<8x16xbf16>, vector<16x8xbf16>, vector<8x8xf32> -> vector<8x8xf32>
      %144 = vector.broadcast %141 : vector<8x1xf32> to vector<8x8xf32>
      %145 = arith.mulf %143, %144 : vector<8x8xf32>
      %146 = arith.truncf %145 : vector<8x8xf32> to vector<8x8xbf16>
      %c0_64 = arith.constant 0 : index
      %c24 = arith.constant 24 : index
      %c0_65 = arith.constant 0 : index
      %147 = vector.load %arg9[%c0_64, %c24, %c0_65] : memref<3x32x32xbf16, #tpu.memory_space<vmem>>, vector<1x8x32xbf16>
      %148 = vector.shape_cast %147 : vector<1x8x32xbf16> to vector<8x32xbf16>
      %cst_66 = arith.constant dense<0.000000e+00> : vector<8x32xf32>
      %149 = tpu.matmul %146, %148, %cst_66 {dimension_numbers = #tpu.dot_dimension_numbers<[1], [0], [0], [1], [0, 0, 1, 1], [], []>} : vector<8x8xbf16>, vector<8x32xbf16>, vector<8x32xf32> -> vector<8x32xf32>
      %150 = arith.addf %122, %149 : vector<8x32xf32>
      %c0_67 = arith.constant 0 : index
      %c0_68 = arith.constant 0 : index
      %c0_69 = arith.constant 0 : index
      %151 = vector.load %arg10[%c0_67, %c0_68, %c0_69] : memref<3x1x32xf32, #tpu.memory_space<vmem>>, vector<1x1x32xf32>
      %152 = vector.shape_cast %151 : vector<1x1x32xf32> to vector<1x32xf32>
      %153 = vector.broadcast %152 : vector<1x32xf32> to vector<8x32xf32>
      %154 = arith.addf %150, %153 : vector<8x32xf32>
      %155 = arith.addf %arg23, %154 : vector<8x32xf32>
      %c0_70 = arith.constant 0 : index
      %c0_71 = arith.constant 0 : index
      %c0_72 = arith.constant 0 : index
      %156 = vector.load %arg15[%c0_70, %c0_71, %c0_72] : memref<3x1x32xf32, #tpu.memory_space<vmem>>, vector<1x1x32xf32>
      %157 = vector.shape_cast %156 : vector<1x1x32xf32> to vector<1x32xf32>
      %c0_73 = arith.constant 0 : index
      %c0_74 = arith.constant 0 : index
      %c0_75 = arith.constant 0 : index
      %158 = vector.load %arg16[%c0_73, %c0_74, %c0_75] : memref<3x1x32xf32, #tpu.memory_space<vmem>>, vector<1x1x32xf32>
      %159 = vector.shape_cast %158 : vector<1x1x32xf32> to vector<1x32xf32>
      %cst_76 = arith.constant dense<0.000000e+00> : vector<8xf32>
      %160 = vector.multi_reduction <add>, %155, %cst_76 [1] : vector<8x32xf32> to vector<8xf32>
      %161 = vector.shape_cast %160 : vector<8xf32> to vector<8x1xf32>
      %cst_77 = arith.constant 3.200000e+01 : f32
      %162 = vector.broadcast %cst_77 : f32 to vector<8x1xf32>
      %163 = arith.divf %161, %162 : vector<8x1xf32>
      %164 = vector.broadcast %163 : vector<8x1xf32> to vector<8x32xf32>
      %165 = arith.subf %155, %164 : vector<8x32xf32>
      %166 = arith.mulf %165, %165 : vector<8x32xf32>
      %cst_78 = arith.constant dense<0.000000e+00> : vector<8xf32>
      %167 = vector.multi_reduction <add>, %166, %cst_78 [1] : vector<8x32xf32> to vector<8xf32>
      %168 = vector.shape_cast %167 : vector<8xf32> to vector<8x1xf32>
      %cst_79 = arith.constant 3.200000e+01 : f32
      %169 = vector.broadcast %cst_79 : f32 to vector<8x1xf32>
      %170 = arith.divf %168, %169 : vector<8x1xf32>
      %cst_80 = arith.constant 9.99999974E-6 : f32
      %171 = vector.broadcast %cst_80 : f32 to vector<8x1xf32>
      %172 = arith.addf %170, %171 : vector<8x1xf32>
      %173 = math.rsqrt %172 : vector<8x1xf32>
      %174 = vector.broadcast %173 : vector<8x1xf32> to vector<8x32xf32>
      %175 = arith.mulf %165, %174 : vector<8x32xf32>
      %176 = vector.broadcast %157 : vector<1x32xf32> to vector<8x32xf32>
      %177 = arith.mulf %175, %176 : vector<8x32xf32>
      %178 = vector.broadcast %159 : vector<1x32xf32> to vector<8x32xf32>
      %179 = arith.addf %177, %178 : vector<8x32xf32>
      %180 = arith.truncf %179 : vector<8x32xf32> to vector<8x32xbf16>
      %c0_81 = arith.constant 0 : index
      %c0_82 = arith.constant 0 : index
      %c0_83 = arith.constant 0 : index
      %181 = vector.load %arg11[%c0_81, %c0_82, %c0_83] : memref<3x32x64xbf16, #tpu.memory_space<vmem>>, vector<1x32x64xbf16>
      %182 = vector.shape_cast %181 : vector<1x32x64xbf16> to vector<32x64xbf16>
      %cst_84 = arith.constant dense<0.000000e+00> : vector<8x64xf32>
      %183 = tpu.matmul %180, %182, %cst_84 {dimension_numbers = #tpu.dot_dimension_numbers<[1], [0], [0], [1], [0, 0, 1, 1], [], []>} : vector<8x32xbf16>, vector<32x64xbf16>, vector<8x64xf32> -> vector<8x64xf32>
      %c0_85 = arith.constant 0 : index
      %c0_86 = arith.constant 0 : index
      %c0_87 = arith.constant 0 : index
      %184 = vector.load %arg12[%c0_85, %c0_86, %c0_87] : memref<3x1x64xf32, #tpu.memory_space<vmem>>, vector<1x1x64xf32>
      %185 = vector.shape_cast %184 : vector<1x1x64xf32> to vector<1x64xf32>
      %186 = vector.broadcast %185 : vector<1x64xf32> to vector<8x64xf32>
      %187 = arith.addf %183, %186 : vector<8x64xf32>
      %cst_88 = arith.constant 0.000000e+00 : f32
      %188 = vector.broadcast %cst_88 : f32 to vector<8x64xf32>
      %189 = arith.maximumf %187, %188 : vector<8x64xf32>
      %190 = arith.truncf %189 : vector<8x64xf32> to vector<8x64xbf16>
      %c0_89 = arith.constant 0 : index
      %c0_90 = arith.constant 0 : index
      %c0_91 = arith.constant 0 : index
      %191 = vector.load %arg13[%c0_89, %c0_90, %c0_91] : memref<3x64x32xbf16, #tpu.memory_space<vmem>>, vector<1x64x32xbf16>
      %192 = vector.shape_cast %191 : vector<1x64x32xbf16> to vector<64x32xbf16>
      %cst_92 = arith.constant dense<0.000000e+00> : vector<8x32xf32>
      %193 = tpu.matmul %190, %192, %cst_92 {dimension_numbers = #tpu.dot_dimension_numbers<[1], [0], [0], [1], [0, 0, 1, 1], [], []>} : vector<8x64xbf16>, vector<64x32xbf16>, vector<8x32xf32> -> vector<8x32xf32>
      %c0_93 = arith.constant 0 : index
      %c0_94 = arith.constant 0 : index
      %c0_95 = arith.constant 0 : index
      %194 = vector.load %arg14[%c0_93, %c0_94, %c0_95] : memref<3x1x32xf32, #tpu.memory_space<vmem>>, vector<1x1x32xf32>
      %195 = vector.shape_cast %194 : vector<1x1x32xf32> to vector<1x32xf32>
      %196 = vector.broadcast %195 : vector<1x32xf32> to vector<8x32xf32>
      %197 = arith.addf %193, %196 : vector<8x32xf32>
      %198 = arith.addf %179, %197 : vector<8x32xf32>
      %c0_96 = arith.constant 0 : index
      %c0_97 = arith.constant 0 : index
      %c0_98 = arith.constant 0 : index
      %199 = vector.load %arg17[%c0_96, %c0_97, %c0_98] : memref<3x1x32xf32, #tpu.memory_space<vmem>>, vector<1x1x32xf32>
      %200 = vector.shape_cast %199 : vector<1x1x32xf32> to vector<1x32xf32>
      %c0_99 = arith.constant 0 : index
      %c0_100 = arith.constant 0 : index
      %c0_101 = arith.constant 0 : index
      %201 = vector.load %arg18[%c0_99, %c0_100, %c0_101] : memref<3x1x32xf32, #tpu.memory_space<vmem>>, vector<1x1x32xf32>
      %202 = vector.shape_cast %201 : vector<1x1x32xf32> to vector<1x32xf32>
      %cst_102 = arith.constant dense<0.000000e+00> : vector<8xf32>
      %203 = vector.multi_reduction <add>, %198, %cst_102 [1] : vector<8x32xf32> to vector<8xf32>
      %204 = vector.shape_cast %203 : vector<8xf32> to vector<8x1xf32>
      %cst_103 = arith.constant 3.200000e+01 : f32
      %205 = vector.broadcast %cst_103 : f32 to vector<8x1xf32>
      %206 = arith.divf %204, %205 : vector<8x1xf32>
      %207 = vector.broadcast %206 : vector<8x1xf32> to vector<8x32xf32>
      %208 = arith.subf %198, %207 : vector<8x32xf32>
      %209 = arith.mulf %208, %208 : vector<8x32xf32>
      %cst_104 = arith.constant dense<0.000000e+00> : vector<8xf32>
      %210 = vector.multi_reduction <add>, %209, %cst_104 [1] : vector<8x32xf32> to vector<8xf32>
      %211 = vector.shape_cast %210 : vector<8xf32> to vector<8x1xf32>
      %cst_105 = arith.constant 3.200000e+01 : f32
      %212 = vector.broadcast %cst_105 : f32 to vector<8x1xf32>
      %213 = arith.divf %211, %212 : vector<8x1xf32>
      %cst_106 = arith.constant 9.99999974E-6 : f32
      %214 = vector.broadcast %cst_106 : f32 to vector<8x1xf32>
      %215 = arith.addf %213, %214 : vector<8x1xf32>
      %216 = math.rsqrt %215 : vector<8x1xf32>
      %217 = vector.broadcast %216 : vector<8x1xf32> to vector<8x32xf32>
      %218 = arith.mulf %208, %217 : vector<8x32xf32>
      %219 = vector.broadcast %200 : vector<1x32xf32> to vector<8x32xf32>
      %220 = arith.mulf %218, %219 : vector<8x32xf32>
      %221 = vector.broadcast %202 : vector<1x32xf32> to vector<8x32xf32>
      %222 = arith.addf %220, %221 : vector<8x32xf32>
      %223 = arith.truncf %arg24 : vector<8x32xf32> to vector<8x32xbf16>
      %224 = arith.truncf %20 : vector<16x32xf32> to vector<16x32xbf16>
      %c1 = arith.constant 1 : index
      %c0_107 = arith.constant 0 : index
      %c0_108 = arith.constant 0 : index
      %225 = vector.load %arg5[%c1, %c0_107, %c0_108] : memref<3x32x32xbf16, #tpu.memory_space<vmem>>, vector<1x32x32xbf16>
      %226 = vector.shape_cast %225 : vector<1x32x32xbf16> to vector<32x32xbf16>
      %cst_109 = arith.constant dense<0.000000e+00> : vector<8x32xf32>
      %227 = tpu.matmul %223, %226, %cst_109 {dimension_numbers = #tpu.dot_dimension_numbers<[1], [0], [0], [1], [0, 0, 1, 1], [], []>} : vector<8x32xbf16>, vector<32x32xbf16>, vector<8x32xf32> -> vector<8x32xf32>
      %c1_110 = arith.constant 1 : index
      %c0_111 = arith.constant 0 : index
      %c0_112 = arith.constant 0 : index
      %228 = vector.load %arg6[%c1_110, %c0_111, %c0_112] : memref<3x1x32xf32, #tpu.memory_space<vmem>>, vector<1x1x32xf32>
      %229 = vector.shape_cast %228 : vector<1x1x32xf32> to vector<1x32xf32>
      %230 = vector.broadcast %229 : vector<1x32xf32> to vector<8x32xf32>
      %231 = arith.addf %227, %230 : vector<8x32xf32>
      %c1_113 = arith.constant 1 : index
      %c0_114 = arith.constant 0 : index
      %c0_115 = arith.constant 0 : index
      %232 = vector.load %arg7[%c1_113, %c0_114, %c0_115] : memref<3x32x64xbf16, #tpu.memory_space<vmem>>, vector<1x32x64xbf16>
      %233 = vector.shape_cast %232 : vector<1x32x64xbf16> to vector<32x64xbf16>
      %cst_116 = arith.constant dense<0.000000e+00> : vector<16x64xf32>
      %234 = tpu.matmul %224, %233, %cst_116 {dimension_numbers = #tpu.dot_dimension_numbers<[1], [0], [0], [1], [0, 0, 1, 1], [], []>} : vector<16x32xbf16>, vector<32x64xbf16>, vector<16x64xf32> -> vector<16x64xf32>
      %c1_117 = arith.constant 1 : index
      %c0_118 = arith.constant 0 : index
      %c0_119 = arith.constant 0 : index
      %235 = vector.load %arg8[%c1_117, %c0_118, %c0_119] : memref<3x1x64xf32, #tpu.memory_space<vmem>>, vector<1x1x64xf32>
      %236 = vector.shape_cast %235 : vector<1x1x64xf32> to vector<1x64xf32>
      %237 = vector.broadcast %236 : vector<1x64xf32> to vector<16x64xf32>
      %238 = arith.addf %234, %237 : vector<16x64xf32>
      %cst_120 = arith.constant 0.000000e+00 : f32
      %239 = vector.broadcast %cst_120 : f32 to vector<8x32xf32>
      %240 = vector.extract_strided_slice %231 {offsets = [0, 0], sizes = [8, 8], strides = [1, 1]} : vector<8x32xf32> to vector<8x8xf32>
      %241 = arith.truncf %240 : vector<8x8xf32> to vector<8x8xbf16>
      %242 = vector.extract_strided_slice %238 {offsets = [0, 0], sizes = [16, 8], strides = [1, 1]} : vector<16x64xf32> to vector<16x8xf32>
      %243 = arith.truncf %242 : vector<16x8xf32> to vector<16x8xbf16>
      %244 = vector.extract_strided_slice %238 {offsets = [0, 32], sizes = [16, 8], strides = [1, 1]} : vector<16x64xf32> to vector<16x8xf32>
      %245 = arith.truncf %244 : vector<16x8xf32> to vector<16x8xbf16>
      %cst_121 = arith.constant dense<0.000000e+00> : vector<8x16xf32>
      %246 = tpu.matmul %241, %243, %cst_121 {dimension_numbers = #tpu.dot_dimension_numbers<[1], [1], [0], [0], [0, 0, 1, 0], [], []>} : vector<8x8xbf16>, vector<16x8xbf16>, vector<8x16xf32> -> vector<8x16xf32>
      %cst_122 = arith.constant 0.353553385 : f32
      %247 = vector.broadcast %cst_122 : f32 to vector<8x16xf32>
      %248 = arith.mulf %246, %247 : vector<8x16xf32>
      %249 = vector.broadcast %1 : vector<1x16xf32> to vector<8x16xf32>
      %250 = arith.addf %248, %249 : vector<8x16xf32>
      %cst_123 = arith.constant dense<0xFF800000> : vector<8xf32>
      %251 = vector.multi_reduction <maximumf>, %250, %cst_123 [1] : vector<8x16xf32> to vector<8xf32>
      %252 = vector.shape_cast %251 : vector<8xf32> to vector<8x1xf32>
      %253 = vector.broadcast %252 : vector<8x1xf32> to vector<8x16xf32>
      %254 = arith.subf %250, %253 : vector<8x16xf32>
      %255 = math.exp %254 : vector<8x16xf32>
      %cst_124 = arith.constant dense<0.000000e+00> : vector<8xf32>
      %256 = vector.multi_reduction <add>, %255, %cst_124 [1] : vector<8x16xf32> to vector<8xf32>
      %257 = vector.shape_cast %256 : vector<8xf32> to vector<8x1xf32>
      %258 = tpu.reciprocal %257 {approx = true} : vector<8x1xf32> -> vector<8x1xf32>
      %259 = arith.truncf %255 : vector<8x16xf32> to vector<8x16xbf16>
      %cst_125 = arith.constant dense<0.000000e+00> : vector<8x8xf32>
      %260 = tpu.matmul %259, %245, %cst_125 {dimension_numbers = #tpu.dot_dimension_numbers<[1], [0], [0], [1], [0, 0, 1, 1], [], []>} : vector<8x16xbf16>, vector<16x8xbf16>, vector<8x8xf32> -> vector<8x8xf32>
      %261 = vector.broadcast %258 : vector<8x1xf32> to vector<8x8xf32>
      %262 = arith.mulf %260, %261 : vector<8x8xf32>
      %263 = arith.truncf %262 : vector<8x8xf32> to vector<8x8xbf16>
      %c1_126 = arith.constant 1 : index
      %c0_127 = arith.constant 0 : index
      %c0_128 = arith.constant 0 : index
      %264 = vector.load %arg9[%c1_126, %c0_127, %c0_128] : memref<3x32x32xbf16, #tpu.memory_space<vmem>>, vector<1x8x32xbf16>
      %265 = vector.shape_cast %264 : vector<1x8x32xbf16> to vector<8x32xbf16>
      %cst_129 = arith.constant dense<0.000000e+00> : vector<8x32xf32>
      %266 = tpu.matmul %263, %265, %cst_129 {dimension_numbers = #tpu.dot_dimension_numbers<[1], [0], [0], [1], [0, 0, 1, 1], [], []>} : vector<8x8xbf16>, vector<8x32xbf16>, vector<8x32xf32> -> vector<8x32xf32>
      %267 = arith.addf %239, %266 : vector<8x32xf32>
      %268 = vector.extract_strided_slice %231 {offsets = [0, 8], sizes = [8, 8], strides = [1, 1]} : vector<8x32xf32> to vector<8x8xf32>
      %269 = arith.truncf %268 : vector<8x8xf32> to vector<8x8xbf16>
      %270 = vector.extract_strided_slice %238 {offsets = [0, 8], sizes = [16, 8], strides = [1, 1]} : vector<16x64xf32> to vector<16x8xf32>
      %271 = arith.truncf %270 : vector<16x8xf32> to vector<16x8xbf16>
      %272 = vector.extract_strided_slice %238 {offsets = [0, 40], sizes = [16, 8], strides = [1, 1]} : vector<16x64xf32> to vector<16x8xf32>
      %273 = arith.truncf %272 : vector<16x8xf32> to vector<16x8xbf16>
      %cst_130 = arith.constant dense<0.000000e+00> : vector<8x16xf32>
      %274 = tpu.matmul %269, %271, %cst_130 {dimension_numbers = #tpu.dot_dimension_numbers<[1], [1], [0], [0], [0, 0, 1, 0], [], []>} : vector<8x8xbf16>, vector<16x8xbf16>, vector<8x16xf32> -> vector<8x16xf32>
      %cst_131 = arith.constant 0.353553385 : f32
      %275 = vector.broadcast %cst_131 : f32 to vector<8x16xf32>
      %276 = arith.mulf %274, %275 : vector<8x16xf32>
      %277 = vector.broadcast %1 : vector<1x16xf32> to vector<8x16xf32>
      %278 = arith.addf %276, %277 : vector<8x16xf32>
      %cst_132 = arith.constant dense<0xFF800000> : vector<8xf32>
      %279 = vector.multi_reduction <maximumf>, %278, %cst_132 [1] : vector<8x16xf32> to vector<8xf32>
      %280 = vector.shape_cast %279 : vector<8xf32> to vector<8x1xf32>
      %281 = vector.broadcast %280 : vector<8x1xf32> to vector<8x16xf32>
      %282 = arith.subf %278, %281 : vector<8x16xf32>
      %283 = math.exp %282 : vector<8x16xf32>
      %cst_133 = arith.constant dense<0.000000e+00> : vector<8xf32>
      %284 = vector.multi_reduction <add>, %283, %cst_133 [1] : vector<8x16xf32> to vector<8xf32>
      %285 = vector.shape_cast %284 : vector<8xf32> to vector<8x1xf32>
      %286 = tpu.reciprocal %285 {approx = true} : vector<8x1xf32> -> vector<8x1xf32>
      %287 = arith.truncf %283 : vector<8x16xf32> to vector<8x16xbf16>
      %cst_134 = arith.constant dense<0.000000e+00> : vector<8x8xf32>
      %288 = tpu.matmul %287, %273, %cst_134 {dimension_numbers = #tpu.dot_dimension_numbers<[1], [0], [0], [1], [0, 0, 1, 1], [], []>} : vector<8x16xbf16>, vector<16x8xbf16>, vector<8x8xf32> -> vector<8x8xf32>
      %289 = vector.broadcast %286 : vector<8x1xf32> to vector<8x8xf32>
      %290 = arith.mulf %288, %289 : vector<8x8xf32>
      %291 = arith.truncf %290 : vector<8x8xf32> to vector<8x8xbf16>
      %c1_135 = arith.constant 1 : index
      %c8_136 = arith.constant 8 : index
      %c0_137 = arith.constant 0 : index
      %292 = vector.load %arg9[%c1_135, %c8_136, %c0_137] : memref<3x32x32xbf16, #tpu.memory_space<vmem>>, vector<1x8x32xbf16>
      %293 = vector.shape_cast %292 : vector<1x8x32xbf16> to vector<8x32xbf16>
      %cst_138 = arith.constant dense<0.000000e+00> : vector<8x32xf32>
      %294 = tpu.matmul %291, %293, %cst_138 {dimension_numbers = #tpu.dot_dimension_numbers<[1], [0], [0], [1], [0, 0, 1, 1], [], []>} : vector<8x8xbf16>, vector<8x32xbf16>, vector<8x32xf32> -> vector<8x32xf32>
      %295 = arith.addf %267, %294 : vector<8x32xf32>
      %296 = vector.extract_strided_slice %231 {offsets = [0, 16], sizes = [8, 8], strides = [1, 1]} : vector<8x32xf32> to vector<8x8xf32>
      %297 = arith.truncf %296 : vector<8x8xf32> to vector<8x8xbf16>
      %298 = vector.extract_strided_slice %238 {offsets = [0, 16], sizes = [16, 8], strides = [1, 1]} : vector<16x64xf32> to vector<16x8xf32>
      %299 = arith.truncf %298 : vector<16x8xf32> to vector<16x8xbf16>
      %300 = vector.extract_strided_slice %238 {offsets = [0, 48], sizes = [16, 8], strides = [1, 1]} : vector<16x64xf32> to vector<16x8xf32>
      %301 = arith.truncf %300 : vector<16x8xf32> to vector<16x8xbf16>
      %cst_139 = arith.constant dense<0.000000e+00> : vector<8x16xf32>
      %302 = tpu.matmul %297, %299, %cst_139 {dimension_numbers = #tpu.dot_dimension_numbers<[1], [1], [0], [0], [0, 0, 1, 0], [], []>} : vector<8x8xbf16>, vector<16x8xbf16>, vector<8x16xf32> -> vector<8x16xf32>
      %cst_140 = arith.constant 0.353553385 : f32
      %303 = vector.broadcast %cst_140 : f32 to vector<8x16xf32>
      %304 = arith.mulf %302, %303 : vector<8x16xf32>
      %305 = vector.broadcast %1 : vector<1x16xf32> to vector<8x16xf32>
      %306 = arith.addf %304, %305 : vector<8x16xf32>
      %cst_141 = arith.constant dense<0xFF800000> : vector<8xf32>
      %307 = vector.multi_reduction <maximumf>, %306, %cst_141 [1] : vector<8x16xf32> to vector<8xf32>
      %308 = vector.shape_cast %307 : vector<8xf32> to vector<8x1xf32>
      %309 = vector.broadcast %308 : vector<8x1xf32> to vector<8x16xf32>
      %310 = arith.subf %306, %309 : vector<8x16xf32>
      %311 = math.exp %310 : vector<8x16xf32>
      %cst_142 = arith.constant dense<0.000000e+00> : vector<8xf32>
      %312 = vector.multi_reduction <add>, %311, %cst_142 [1] : vector<8x16xf32> to vector<8xf32>
      %313 = vector.shape_cast %312 : vector<8xf32> to vector<8x1xf32>
      %314 = tpu.reciprocal %313 {approx = true} : vector<8x1xf32> -> vector<8x1xf32>
      %315 = arith.truncf %311 : vector<8x16xf32> to vector<8x16xbf16>
      %cst_143 = arith.constant dense<0.000000e+00> : vector<8x8xf32>
      %316 = tpu.matmul %315, %301, %cst_143 {dimension_numbers = #tpu.dot_dimension_numbers<[1], [0], [0], [1], [0, 0, 1, 1], [], []>} : vector<8x16xbf16>, vector<16x8xbf16>, vector<8x8xf32> -> vector<8x8xf32>
      %317 = vector.broadcast %314 : vector<8x1xf32> to vector<8x8xf32>
      %318 = arith.mulf %316, %317 : vector<8x8xf32>
      %319 = arith.truncf %318 : vector<8x8xf32> to vector<8x8xbf16>
      %c1_144 = arith.constant 1 : index
      %c16_145 = arith.constant 16 : index
      %c0_146 = arith.constant 0 : index
      %320 = vector.load %arg9[%c1_144, %c16_145, %c0_146] : memref<3x32x32xbf16, #tpu.memory_space<vmem>>, vector<1x8x32xbf16>
      %321 = vector.shape_cast %320 : vector<1x8x32xbf16> to vector<8x32xbf16>
      %cst_147 = arith.constant dense<0.000000e+00> : vector<8x32xf32>
      %322 = tpu.matmul %319, %321, %cst_147 {dimension_numbers = #tpu.dot_dimension_numbers<[1], [0], [0], [1], [0, 0, 1, 1], [], []>} : vector<8x8xbf16>, vector<8x32xbf16>, vector<8x32xf32> -> vector<8x32xf32>
      %323 = arith.addf %295, %322 : vector<8x32xf32>
      %324 = vector.extract_strided_slice %231 {offsets = [0, 24], sizes = [8, 8], strides = [1, 1]} : vector<8x32xf32> to vector<8x8xf32>
      %325 = arith.truncf %324 : vector<8x8xf32> to vector<8x8xbf16>
      %326 = vector.extract_strided_slice %238 {offsets = [0, 24], sizes = [16, 8], strides = [1, 1]} : vector<16x64xf32> to vector<16x8xf32>
      %327 = arith.truncf %326 : vector<16x8xf32> to vector<16x8xbf16>
      %328 = vector.extract_strided_slice %238 {offsets = [0, 56], sizes = [16, 8], strides = [1, 1]} : vector<16x64xf32> to vector<16x8xf32>
      %329 = arith.truncf %328 : vector<16x8xf32> to vector<16x8xbf16>
      %cst_148 = arith.constant dense<0.000000e+00> : vector<8x16xf32>
      %330 = tpu.matmul %325, %327, %cst_148 {dimension_numbers = #tpu.dot_dimension_numbers<[1], [1], [0], [0], [0, 0, 1, 0], [], []>} : vector<8x8xbf16>, vector<16x8xbf16>, vector<8x16xf32> -> vector<8x16xf32>
      %cst_149 = arith.constant 0.353553385 : f32
      %331 = vector.broadcast %cst_149 : f32 to vector<8x16xf32>
      %332 = arith.mulf %330, %331 : vector<8x16xf32>
      %333 = vector.broadcast %1 : vector<1x16xf32> to vector<8x16xf32>
      %334 = arith.addf %332, %333 : vector<8x16xf32>
      %cst_150 = arith.constant dense<0xFF800000> : vector<8xf32>
      %335 = vector.multi_reduction <maximumf>, %334, %cst_150 [1] : vector<8x16xf32> to vector<8xf32>
      %336 = vector.shape_cast %335 : vector<8xf32> to vector<8x1xf32>
      %337 = vector.broadcast %336 : vector<8x1xf32> to vector<8x16xf32>
      %338 = arith.subf %334, %337 : vector<8x16xf32>
      %339 = math.exp %338 : vector<8x16xf32>
      %cst_151 = arith.constant dense<0.000000e+00> : vector<8xf32>
      %340 = vector.multi_reduction <add>, %339, %cst_151 [1] : vector<8x16xf32> to vector<8xf32>
      %341 = vector.shape_cast %340 : vector<8xf32> to vector<8x1xf32>
      %342 = tpu.reciprocal %341 {approx = true} : vector<8x1xf32> -> vector<8x1xf32>
      %343 = arith.truncf %339 : vector<8x16xf32> to vector<8x16xbf16>
      %cst_152 = arith.constant dense<0.000000e+00> : vector<8x8xf32>
      %344 = tpu.matmul %343, %329, %cst_152 {dimension_numbers = #tpu.dot_dimension_numbers<[1], [0], [0], [1], [0, 0, 1, 1], [], []>} : vector<8x16xbf16>, vector<16x8xbf16>, vector<8x8xf32> -> vector<8x8xf32>
      %345 = vector.broadcast %342 : vector<8x1xf32> to vector<8x8xf32>
      %346 = arith.mulf %344, %345 : vector<8x8xf32>
      %347 = arith.truncf %346 : vector<8x8xf32> to vector<8x8xbf16>
      %c1_153 = arith.constant 1 : index
      %c24_154 = arith.constant 24 : index
      %c0_155 = arith.constant 0 : index
      %348 = vector.load %arg9[%c1_153, %c24_154, %c0_155] : memref<3x32x32xbf16, #tpu.memory_space<vmem>>, vector<1x8x32xbf16>
      %349 = vector.shape_cast %348 : vector<1x8x32xbf16> to vector<8x32xbf16>
      %cst_156 = arith.constant dense<0.000000e+00> : vector<8x32xf32>
      %350 = tpu.matmul %347, %349, %cst_156 {dimension_numbers = #tpu.dot_dimension_numbers<[1], [0], [0], [1], [0, 0, 1, 1], [], []>} : vector<8x8xbf16>, vector<8x32xbf16>, vector<8x32xf32> -> vector<8x32xf32>
      %351 = arith.addf %323, %350 : vector<8x32xf32>
      %c1_157 = arith.constant 1 : index
      %c0_158 = arith.constant 0 : index
      %c0_159 = arith.constant 0 : index
      %352 = vector.load %arg10[%c1_157, %c0_158, %c0_159] : memref<3x1x32xf32, #tpu.memory_space<vmem>>, vector<1x1x32xf32>
      %353 = vector.shape_cast %352 : vector<1x1x32xf32> to vector<1x32xf32>
      %354 = vector.broadcast %353 : vector<1x32xf32> to vector<8x32xf32>
      %355 = arith.addf %351, %354 : vector<8x32xf32>
      %356 = arith.addf %arg24, %355 : vector<8x32xf32>
      %c1_160 = arith.constant 1 : index
      %c0_161 = arith.constant 0 : index
      %c0_162 = arith.constant 0 : index
      %357 = vector.load %arg15[%c1_160, %c0_161, %c0_162] : memref<3x1x32xf32, #tpu.memory_space<vmem>>, vector<1x1x32xf32>
      %358 = vector.shape_cast %357 : vector<1x1x32xf32> to vector<1x32xf32>
      %c1_163 = arith.constant 1 : index
      %c0_164 = arith.constant 0 : index
      %c0_165 = arith.constant 0 : index
      %359 = vector.load %arg16[%c1_163, %c0_164, %c0_165] : memref<3x1x32xf32, #tpu.memory_space<vmem>>, vector<1x1x32xf32>
      %360 = vector.shape_cast %359 : vector<1x1x32xf32> to vector<1x32xf32>
      %cst_166 = arith.constant dense<0.000000e+00> : vector<8xf32>
      %361 = vector.multi_reduction <add>, %356, %cst_166 [1] : vector<8x32xf32> to vector<8xf32>
      %362 = vector.shape_cast %361 : vector<8xf32> to vector<8x1xf32>
      %cst_167 = arith.constant 3.200000e+01 : f32
      %363 = vector.broadcast %cst_167 : f32 to vector<8x1xf32>
      %364 = arith.divf %362, %363 : vector<8x1xf32>
      %365 = vector.broadcast %364 : vector<8x1xf32> to vector<8x32xf32>
      %366 = arith.subf %356, %365 : vector<8x32xf32>
      %367 = arith.mulf %366, %366 : vector<8x32xf32>
      %cst_168 = arith.constant dense<0.000000e+00> : vector<8xf32>
      %368 = vector.multi_reduction <add>, %367, %cst_168 [1] : vector<8x32xf32> to vector<8xf32>
      %369 = vector.shape_cast %368 : vector<8xf32> to vector<8x1xf32>
      %cst_169 = arith.constant 3.200000e+01 : f32
      %370 = vector.broadcast %cst_169 : f32 to vector<8x1xf32>
      %371 = arith.divf %369, %370 : vector<8x1xf32>
      %cst_170 = arith.constant 9.99999974E-6 : f32
      %372 = vector.broadcast %cst_170 : f32 to vector<8x1xf32>
      %373 = arith.addf %371, %372 : vector<8x1xf32>
      %374 = math.rsqrt %373 : vector<8x1xf32>
      %375 = vector.broadcast %374 : vector<8x1xf32> to vector<8x32xf32>
      %376 = arith.mulf %366, %375 : vector<8x32xf32>
      %377 = vector.broadcast %358 : vector<1x32xf32> to vector<8x32xf32>
      %378 = arith.mulf %376, %377 : vector<8x32xf32>
      %379 = vector.broadcast %360 : vector<1x32xf32> to vector<8x32xf32>
      %380 = arith.addf %378, %379 : vector<8x32xf32>
      %381 = arith.truncf %380 : vector<8x32xf32> to vector<8x32xbf16>
      %c1_171 = arith.constant 1 : index
      %c0_172 = arith.constant 0 : index
      %c0_173 = arith.constant 0 : index
      %382 = vector.load %arg11[%c1_171, %c0_172, %c0_173] : memref<3x32x64xbf16, #tpu.memory_space<vmem>>, vector<1x32x64xbf16>
      %383 = vector.shape_cast %382 : vector<1x32x64xbf16> to vector<32x64xbf16>
      %cst_174 = arith.constant dense<0.000000e+00> : vector<8x64xf32>
      %384 = tpu.matmul %381, %383, %cst_174 {dimension_numbers = #tpu.dot_dimension_numbers<[1], [0], [0], [1], [0, 0, 1, 1], [], []>} : vector<8x32xbf16>, vector<32x64xbf16>, vector<8x64xf32> -> vector<8x64xf32>
      %c1_175 = arith.constant 1 : index
      %c0_176 = arith.constant 0 : index
      %c0_177 = arith.constant 0 : index
      %385 = vector.load %arg12[%c1_175, %c0_176, %c0_177] : memref<3x1x64xf32, #tpu.memory_space<vmem>>, vector<1x1x64xf32>
      %386 = vector.shape_cast %385 : vector<1x1x64xf32> to vector<1x64xf32>
      %387 = vector.broadcast %386 : vector<1x64xf32> to vector<8x64xf32>
      %388 = arith.addf %384, %387 : vector<8x64xf32>
      %cst_178 = arith.constant 0.000000e+00 : f32
      %389 = vector.broadcast %cst_178 : f32 to vector<8x64xf32>
      %390 = arith.maximumf %388, %389 : vector<8x64xf32>
      %391 = arith.truncf %390 : vector<8x64xf32> to vector<8x64xbf16>
      %c1_179 = arith.constant 1 : index
      %c0_180 = arith.constant 0 : index
      %c0_181 = arith.constant 0 : index
      %392 = vector.load %arg13[%c1_179, %c0_180, %c0_181] : memref<3x64x32xbf16, #tpu.memory_space<vmem>>, vector<1x64x32xbf16>
      %393 = vector.shape_cast %392 : vector<1x64x32xbf16> to vector<64x32xbf16>
      %cst_182 = arith.constant dense<0.000000e+00> : vector<8x32xf32>
      %394 = tpu.matmul %391, %393, %cst_182 {dimension_numbers = #tpu.dot_dimension_numbers<[1], [0], [0], [1], [0, 0, 1, 1], [], []>} : vector<8x64xbf16>, vector<64x32xbf16>, vector<8x32xf32> -> vector<8x32xf32>
      %c1_183 = arith.constant 1 : index
      %c0_184 = arith.constant 0 : index
      %c0_185 = arith.constant 0 : index
      %395 = vector.load %arg14[%c1_183, %c0_184, %c0_185] : memref<3x1x32xf32, #tpu.memory_space<vmem>>, vector<1x1x32xf32>
      %396 = vector.shape_cast %395 : vector<1x1x32xf32> to vector<1x32xf32>
      %397 = vector.broadcast %396 : vector<1x32xf32> to vector<8x32xf32>
      %398 = arith.addf %394, %397 : vector<8x32xf32>
      %399 = arith.addf %380, %398 : vector<8x32xf32>
      %c1_186 = arith.constant 1 : index
      %c0_187 = arith.constant 0 : index
      %c0_188 = arith.constant 0 : index
      %400 = vector.load %arg17[%c1_186, %c0_187, %c0_188] : memref<3x1x32xf32, #tpu.memory_space<vmem>>, vector<1x1x32xf32>
      %401 = vector.shape_cast %400 : vector<1x1x32xf32> to vector<1x32xf32>
      %c1_189 = arith.constant 1 : index
      %c0_190 = arith.constant 0 : index
      %c0_191 = arith.constant 0 : index
      %402 = vector.load %arg18[%c1_189, %c0_190, %c0_191] : memref<3x1x32xf32, #tpu.memory_space<vmem>>, vector<1x1x32xf32>
      %403 = vector.shape_cast %402 : vector<1x1x32xf32> to vector<1x32xf32>
      %cst_192 = arith.constant dense<0.000000e+00> : vector<8xf32>
      %404 = vector.multi_reduction <add>, %399, %cst_192 [1] : vector<8x32xf32> to vector<8xf32>
      %405 = vector.shape_cast %404 : vector<8xf32> to vector<8x1xf32>
      %cst_193 = arith.constant 3.200000e+01 : f32
      %406 = vector.broadcast %cst_193 : f32 to vector<8x1xf32>
      %407 = arith.divf %405, %406 : vector<8x1xf32>
      %408 = vector.broadcast %407 : vector<8x1xf32> to vector<8x32xf32>
      %409 = arith.subf %399, %408 : vector<8x32xf32>
      %410 = arith.mulf %409, %409 : vector<8x32xf32>
      %cst_194 = arith.constant dense<0.000000e+00> : vector<8xf32>
      %411 = vector.multi_reduction <add>, %410, %cst_194 [1] : vector<8x32xf32> to vector<8xf32>
      %412 = vector.shape_cast %411 : vector<8xf32> to vector<8x1xf32>
      %cst_195 = arith.constant 3.200000e+01 : f32
      %413 = vector.broadcast %cst_195 : f32 to vector<8x1xf32>
      %414 = arith.divf %412, %413 : vector<8x1xf32>
      %cst_196 = arith.constant 9.99999974E-6 : f32
      %415 = vector.broadcast %cst_196 : f32 to vector<8x1xf32>
      %416 = arith.addf %414, %415 : vector<8x1xf32>
      %417 = math.rsqrt %416 : vector<8x1xf32>
      %418 = vector.broadcast %417 : vector<8x1xf32> to vector<8x32xf32>
      %419 = arith.mulf %409, %418 : vector<8x32xf32>
      %420 = vector.broadcast %401 : vector<1x32xf32> to vector<8x32xf32>
      %421 = arith.mulf %419, %420 : vector<8x32xf32>
      %422 = vector.broadcast %403 : vector<1x32xf32> to vector<8x32xf32>
      %423 = arith.addf %421, %422 : vector<8x32xf32>
      %424 = arith.truncf %arg25 : vector<8x32xf32> to vector<8x32xbf16>
      %425 = arith.truncf %21 : vector<16x32xf32> to vector<16x32xbf16>
      %c2 = arith.constant 2 : index
      %c0_197 = arith.constant 0 : index
      %c0_198 = arith.constant 0 : index
      %426 = vector.load %arg5[%c2, %c0_197, %c0_198] : memref<3x32x32xbf16, #tpu.memory_space<vmem>>, vector<1x32x32xbf16>
      %427 = vector.shape_cast %426 : vector<1x32x32xbf16> to vector<32x32xbf16>
      %cst_199 = arith.constant dense<0.000000e+00> : vector<8x32xf32>
      %428 = tpu.matmul %424, %427, %cst_199 {dimension_numbers = #tpu.dot_dimension_numbers<[1], [0], [0], [1], [0, 0, 1, 1], [], []>} : vector<8x32xbf16>, vector<32x32xbf16>, vector<8x32xf32> -> vector<8x32xf32>
      %c2_200 = arith.constant 2 : index
      %c0_201 = arith.constant 0 : index
      %c0_202 = arith.constant 0 : index
      %429 = vector.load %arg6[%c2_200, %c0_201, %c0_202] : memref<3x1x32xf32, #tpu.memory_space<vmem>>, vector<1x1x32xf32>
      %430 = vector.shape_cast %429 : vector<1x1x32xf32> to vector<1x32xf32>
      %431 = vector.broadcast %430 : vector<1x32xf32> to vector<8x32xf32>
      %432 = arith.addf %428, %431 : vector<8x32xf32>
      %c2_203 = arith.constant 2 : index
      %c0_204 = arith.constant 0 : index
      %c0_205 = arith.constant 0 : index
      %433 = vector.load %arg7[%c2_203, %c0_204, %c0_205] : memref<3x32x64xbf16, #tpu.memory_space<vmem>>, vector<1x32x64xbf16>
      %434 = vector.shape_cast %433 : vector<1x32x64xbf16> to vector<32x64xbf16>
      %cst_206 = arith.constant dense<0.000000e+00> : vector<16x64xf32>
      %435 = tpu.matmul %425, %434, %cst_206 {dimension_numbers = #tpu.dot_dimension_numbers<[1], [0], [0], [1], [0, 0, 1, 1], [], []>} : vector<16x32xbf16>, vector<32x64xbf16>, vector<16x64xf32> -> vector<16x64xf32>
      %c2_207 = arith.constant 2 : index
      %c0_208 = arith.constant 0 : index
      %c0_209 = arith.constant 0 : index
      %436 = vector.load %arg8[%c2_207, %c0_208, %c0_209] : memref<3x1x64xf32, #tpu.memory_space<vmem>>, vector<1x1x64xf32>
      %437 = vector.shape_cast %436 : vector<1x1x64xf32> to vector<1x64xf32>
      %438 = vector.broadcast %437 : vector<1x64xf32> to vector<16x64xf32>
      %439 = arith.addf %435, %438 : vector<16x64xf32>
      %cst_210 = arith.constant 0.000000e+00 : f32
      %440 = vector.broadcast %cst_210 : f32 to vector<8x32xf32>
      %441 = vector.extract_strided_slice %432 {offsets = [0, 0], sizes = [8, 8], strides = [1, 1]} : vector<8x32xf32> to vector<8x8xf32>
      %442 = arith.truncf %441 : vector<8x8xf32> to vector<8x8xbf16>
      %443 = vector.extract_strided_slice %439 {offsets = [0, 0], sizes = [16, 8], strides = [1, 1]} : vector<16x64xf32> to vector<16x8xf32>
      %444 = arith.truncf %443 : vector<16x8xf32> to vector<16x8xbf16>
      %445 = vector.extract_strided_slice %439 {offsets = [0, 32], sizes = [16, 8], strides = [1, 1]} : vector<16x64xf32> to vector<16x8xf32>
      %446 = arith.truncf %445 : vector<16x8xf32> to vector<16x8xbf16>
      %cst_211 = arith.constant dense<0.000000e+00> : vector<8x16xf32>
      %447 = tpu.matmul %442, %444, %cst_211 {dimension_numbers = #tpu.dot_dimension_numbers<[1], [1], [0], [0], [0, 0, 1, 0], [], []>} : vector<8x8xbf16>, vector<16x8xbf16>, vector<8x16xf32> -> vector<8x16xf32>
      %cst_212 = arith.constant 0.353553385 : f32
      %448 = vector.broadcast %cst_212 : f32 to vector<8x16xf32>
      %449 = arith.mulf %447, %448 : vector<8x16xf32>
      %450 = vector.broadcast %1 : vector<1x16xf32> to vector<8x16xf32>
      %451 = arith.addf %449, %450 : vector<8x16xf32>
      %cst_213 = arith.constant dense<0xFF800000> : vector<8xf32>
      %452 = vector.multi_reduction <maximumf>, %451, %cst_213 [1] : vector<8x16xf32> to vector<8xf32>
      %453 = vector.shape_cast %452 : vector<8xf32> to vector<8x1xf32>
      %454 = vector.broadcast %453 : vector<8x1xf32> to vector<8x16xf32>
      %455 = arith.subf %451, %454 : vector<8x16xf32>
      %456 = math.exp %455 : vector<8x16xf32>
      %cst_214 = arith.constant dense<0.000000e+00> : vector<8xf32>
      %457 = vector.multi_reduction <add>, %456, %cst_214 [1] : vector<8x16xf32> to vector<8xf32>
      %458 = vector.shape_cast %457 : vector<8xf32> to vector<8x1xf32>
      %459 = tpu.reciprocal %458 {approx = true} : vector<8x1xf32> -> vector<8x1xf32>
      %460 = arith.truncf %456 : vector<8x16xf32> to vector<8x16xbf16>
      %cst_215 = arith.constant dense<0.000000e+00> : vector<8x8xf32>
      %461 = tpu.matmul %460, %446, %cst_215 {dimension_numbers = #tpu.dot_dimension_numbers<[1], [0], [0], [1], [0, 0, 1, 1], [], []>} : vector<8x16xbf16>, vector<16x8xbf16>, vector<8x8xf32> -> vector<8x8xf32>
      %462 = vector.broadcast %459 : vector<8x1xf32> to vector<8x8xf32>
      %463 = arith.mulf %461, %462 : vector<8x8xf32>
      %464 = arith.truncf %463 : vector<8x8xf32> to vector<8x8xbf16>
      %c2_216 = arith.constant 2 : index
      %c0_217 = arith.constant 0 : index
      %c0_218 = arith.constant 0 : index
      %465 = vector.load %arg9[%c2_216, %c0_217, %c0_218] : memref<3x32x32xbf16, #tpu.memory_space<vmem>>, vector<1x8x32xbf16>
      %466 = vector.shape_cast %465 : vector<1x8x32xbf16> to vector<8x32xbf16>
      %cst_219 = arith.constant dense<0.000000e+00> : vector<8x32xf32>
      %467 = tpu.matmul %464, %466, %cst_219 {dimension_numbers = #tpu.dot_dimension_numbers<[1], [0], [0], [1], [0, 0, 1, 1], [], []>} : vector<8x8xbf16>, vector<8x32xbf16>, vector<8x32xf32> -> vector<8x32xf32>
      %468 = arith.addf %440, %467 : vector<8x32xf32>
      %469 = vector.extract_strided_slice %432 {offsets = [0, 8], sizes = [8, 8], strides = [1, 1]} : vector<8x32xf32> to vector<8x8xf32>
      %470 = arith.truncf %469 : vector<8x8xf32> to vector<8x8xbf16>
      %471 = vector.extract_strided_slice %439 {offsets = [0, 8], sizes = [16, 8], strides = [1, 1]} : vector<16x64xf32> to vector<16x8xf32>
      %472 = arith.truncf %471 : vector<16x8xf32> to vector<16x8xbf16>
      %473 = vector.extract_strided_slice %439 {offsets = [0, 40], sizes = [16, 8], strides = [1, 1]} : vector<16x64xf32> to vector<16x8xf32>
      %474 = arith.truncf %473 : vector<16x8xf32> to vector<16x8xbf16>
      %cst_220 = arith.constant dense<0.000000e+00> : vector<8x16xf32>
      %475 = tpu.matmul %470, %472, %cst_220 {dimension_numbers = #tpu.dot_dimension_numbers<[1], [1], [0], [0], [0, 0, 1, 0], [], []>} : vector<8x8xbf16>, vector<16x8xbf16>, vector<8x16xf32> -> vector<8x16xf32>
      %cst_221 = arith.constant 0.353553385 : f32
      %476 = vector.broadcast %cst_221 : f32 to vector<8x16xf32>
      %477 = arith.mulf %475, %476 : vector<8x16xf32>
      %478 = vector.broadcast %1 : vector<1x16xf32> to vector<8x16xf32>
      %479 = arith.addf %477, %478 : vector<8x16xf32>
      %cst_222 = arith.constant dense<0xFF800000> : vector<8xf32>
      %480 = vector.multi_reduction <maximumf>, %479, %cst_222 [1] : vector<8x16xf32> to vector<8xf32>
      %481 = vector.shape_cast %480 : vector<8xf32> to vector<8x1xf32>
      %482 = vector.broadcast %481 : vector<8x1xf32> to vector<8x16xf32>
      %483 = arith.subf %479, %482 : vector<8x16xf32>
      %484 = math.exp %483 : vector<8x16xf32>
      %cst_223 = arith.constant dense<0.000000e+00> : vector<8xf32>
      %485 = vector.multi_reduction <add>, %484, %cst_223 [1] : vector<8x16xf32> to vector<8xf32>
      %486 = vector.shape_cast %485 : vector<8xf32> to vector<8x1xf32>
      %487 = tpu.reciprocal %486 {approx = true} : vector<8x1xf32> -> vector<8x1xf32>
      %488 = arith.truncf %484 : vector<8x16xf32> to vector<8x16xbf16>
      %cst_224 = arith.constant dense<0.000000e+00> : vector<8x8xf32>
      %489 = tpu.matmul %488, %474, %cst_224 {dimension_numbers = #tpu.dot_dimension_numbers<[1], [0], [0], [1], [0, 0, 1, 1], [], []>} : vector<8x16xbf16>, vector<16x8xbf16>, vector<8x8xf32> -> vector<8x8xf32>
      %490 = vector.broadcast %487 : vector<8x1xf32> to vector<8x8xf32>
      %491 = arith.mulf %489, %490 : vector<8x8xf32>
      %492 = arith.truncf %491 : vector<8x8xf32> to vector<8x8xbf16>
      %c2_225 = arith.constant 2 : index
      %c8_226 = arith.constant 8 : index
      %c0_227 = arith.constant 0 : index
      %493 = vector.load %arg9[%c2_225, %c8_226, %c0_227] : memref<3x32x32xbf16, #tpu.memory_space<vmem>>, vector<1x8x32xbf16>
      %494 = vector.shape_cast %493 : vector<1x8x32xbf16> to vector<8x32xbf16>
      %cst_228 = arith.constant dense<0.000000e+00> : vector<8x32xf32>
      %495 = tpu.matmul %492, %494, %cst_228 {dimension_numbers = #tpu.dot_dimension_numbers<[1], [0], [0], [1], [0, 0, 1, 1], [], []>} : vector<8x8xbf16>, vector<8x32xbf16>, vector<8x32xf32> -> vector<8x32xf32>
      %496 = arith.addf %468, %495 : vector<8x32xf32>
      %497 = vector.extract_strided_slice %432 {offsets = [0, 16], sizes = [8, 8], strides = [1, 1]} : vector<8x32xf32> to vector<8x8xf32>
      %498 = arith.truncf %497 : vector<8x8xf32> to vector<8x8xbf16>
      %499 = vector.extract_strided_slice %439 {offsets = [0, 16], sizes = [16, 8], strides = [1, 1]} : vector<16x64xf32> to vector<16x8xf32>
      %500 = arith.truncf %499 : vector<16x8xf32> to vector<16x8xbf16>
      %501 = vector.extract_strided_slice %439 {offsets = [0, 48], sizes = [16, 8], strides = [1, 1]} : vector<16x64xf32> to vector<16x8xf32>
      %502 = arith.truncf %501 : vector<16x8xf32> to vector<16x8xbf16>
      %cst_229 = arith.constant dense<0.000000e+00> : vector<8x16xf32>
      %503 = tpu.matmul %498, %500, %cst_229 {dimension_numbers = #tpu.dot_dimension_numbers<[1], [1], [0], [0], [0, 0, 1, 0], [], []>} : vector<8x8xbf16>, vector<16x8xbf16>, vector<8x16xf32> -> vector<8x16xf32>
      %cst_230 = arith.constant 0.353553385 : f32
      %504 = vector.broadcast %cst_230 : f32 to vector<8x16xf32>
      %505 = arith.mulf %503, %504 : vector<8x16xf32>
      %506 = vector.broadcast %1 : vector<1x16xf32> to vector<8x16xf32>
      %507 = arith.addf %505, %506 : vector<8x16xf32>
      %cst_231 = arith.constant dense<0xFF800000> : vector<8xf32>
      %508 = vector.multi_reduction <maximumf>, %507, %cst_231 [1] : vector<8x16xf32> to vector<8xf32>
      %509 = vector.shape_cast %508 : vector<8xf32> to vector<8x1xf32>
      %510 = vector.broadcast %509 : vector<8x1xf32> to vector<8x16xf32>
      %511 = arith.subf %507, %510 : vector<8x16xf32>
      %512 = math.exp %511 : vector<8x16xf32>
      %cst_232 = arith.constant dense<0.000000e+00> : vector<8xf32>
      %513 = vector.multi_reduction <add>, %512, %cst_232 [1] : vector<8x16xf32> to vector<8xf32>
      %514 = vector.shape_cast %513 : vector<8xf32> to vector<8x1xf32>
      %515 = tpu.reciprocal %514 {approx = true} : vector<8x1xf32> -> vector<8x1xf32>
      %516 = arith.truncf %512 : vector<8x16xf32> to vector<8x16xbf16>
      %cst_233 = arith.constant dense<0.000000e+00> : vector<8x8xf32>
      %517 = tpu.matmul %516, %502, %cst_233 {dimension_numbers = #tpu.dot_dimension_numbers<[1], [0], [0], [1], [0, 0, 1, 1], [], []>} : vector<8x16xbf16>, vector<16x8xbf16>, vector<8x8xf32> -> vector<8x8xf32>
      %518 = vector.broadcast %515 : vector<8x1xf32> to vector<8x8xf32>
      %519 = arith.mulf %517, %518 : vector<8x8xf32>
      %520 = arith.truncf %519 : vector<8x8xf32> to vector<8x8xbf16>
      %c2_234 = arith.constant 2 : index
      %c16_235 = arith.constant 16 : index
      %c0_236 = arith.constant 0 : index
      %521 = vector.load %arg9[%c2_234, %c16_235, %c0_236] : memref<3x32x32xbf16, #tpu.memory_space<vmem>>, vector<1x8x32xbf16>
      %522 = vector.shape_cast %521 : vector<1x8x32xbf16> to vector<8x32xbf16>
      %cst_237 = arith.constant dense<0.000000e+00> : vector<8x32xf32>
      %523 = tpu.matmul %520, %522, %cst_237 {dimension_numbers = #tpu.dot_dimension_numbers<[1], [0], [0], [1], [0, 0, 1, 1], [], []>} : vector<8x8xbf16>, vector<8x32xbf16>, vector<8x32xf32> -> vector<8x32xf32>
      %524 = arith.addf %496, %523 : vector<8x32xf32>
      %525 = vector.extract_strided_slice %432 {offsets = [0, 24], sizes = [8, 8], strides = [1, 1]} : vector<8x32xf32> to vector<8x8xf32>
      %526 = arith.truncf %525 : vector<8x8xf32> to vector<8x8xbf16>
      %527 = vector.extract_strided_slice %439 {offsets = [0, 24], sizes = [16, 8], strides = [1, 1]} : vector<16x64xf32> to vector<16x8xf32>
      %528 = arith.truncf %527 : vector<16x8xf32> to vector<16x8xbf16>
      %529 = vector.extract_strided_slice %439 {offsets = [0, 56], sizes = [16, 8], strides = [1, 1]} : vector<16x64xf32> to vector<16x8xf32>
      %530 = arith.truncf %529 : vector<16x8xf32> to vector<16x8xbf16>
      %cst_238 = arith.constant dense<0.000000e+00> : vector<8x16xf32>
      %531 = tpu.matmul %526, %528, %cst_238 {dimension_numbers = #tpu.dot_dimension_numbers<[1], [1], [0], [0], [0, 0, 1, 0], [], []>} : vector<8x8xbf16>, vector<16x8xbf16>, vector<8x16xf32> -> vector<8x16xf32>
      %cst_239 = arith.constant 0.353553385 : f32
      %532 = vector.broadcast %cst_239 : f32 to vector<8x16xf32>
      %533 = arith.mulf %531, %532 : vector<8x16xf32>
      %534 = vector.broadcast %1 : vector<1x16xf32> to vector<8x16xf32>
      %535 = arith.addf %533, %534 : vector<8x16xf32>
      %cst_240 = arith.constant dense<0xFF800000> : vector<8xf32>
      %536 = vector.multi_reduction <maximumf>, %535, %cst_240 [1] : vector<8x16xf32> to vector<8xf32>
      %537 = vector.shape_cast %536 : vector<8xf32> to vector<8x1xf32>
      %538 = vector.broadcast %537 : vector<8x1xf32> to vector<8x16xf32>
      %539 = arith.subf %535, %538 : vector<8x16xf32>
      %540 = math.exp %539 : vector<8x16xf32>
      %cst_241 = arith.constant dense<0.000000e+00> : vector<8xf32>
      %541 = vector.multi_reduction <add>, %540, %cst_241 [1] : vector<8x16xf32> to vector<8xf32>
      %542 = vector.shape_cast %541 : vector<8xf32> to vector<8x1xf32>
      %543 = tpu.reciprocal %542 {approx = true} : vector<8x1xf32> -> vector<8x1xf32>
      %544 = arith.truncf %540 : vector<8x16xf32> to vector<8x16xbf16>
      %cst_242 = arith.constant dense<0.000000e+00> : vector<8x8xf32>
      %545 = tpu.matmul %544, %530, %cst_242 {dimension_numbers = #tpu.dot_dimension_numbers<[1], [0], [0], [1], [0, 0, 1, 1], [], []>} : vector<8x16xbf16>, vector<16x8xbf16>, vector<8x8xf32> -> vector<8x8xf32>
      %546 = vector.broadcast %543 : vector<8x1xf32> to vector<8x8xf32>
      %547 = arith.mulf %545, %546 : vector<8x8xf32>
      %548 = arith.truncf %547 : vector<8x8xf32> to vector<8x8xbf16>
      %c2_243 = arith.constant 2 : index
      %c24_244 = arith.constant 24 : index
      %c0_245 = arith.constant 0 : index
      %549 = vector.load %arg9[%c2_243, %c24_244, %c0_245] : memref<3x32x32xbf16, #tpu.memory_space<vmem>>, vector<1x8x32xbf16>
      %550 = vector.shape_cast %549 : vector<1x8x32xbf16> to vector<8x32xbf16>
      %cst_246 = arith.constant dense<0.000000e+00> : vector<8x32xf32>
      %551 = tpu.matmul %548, %550, %cst_246 {dimension_numbers = #tpu.dot_dimension_numbers<[1], [0], [0], [1], [0, 0, 1, 1], [], []>} : vector<8x8xbf16>, vector<8x32xbf16>, vector<8x32xf32> -> vector<8x32xf32>
      %552 = arith.addf %524, %551 : vector<8x32xf32>
      %c2_247 = arith.constant 2 : index
      %c0_248 = arith.constant 0 : index
      %c0_249 = arith.constant 0 : index
      %553 = vector.load %arg10[%c2_247, %c0_248, %c0_249] : memref<3x1x32xf32, #tpu.memory_space<vmem>>, vector<1x1x32xf32>
      %554 = vector.shape_cast %553 : vector<1x1x32xf32> to vector<1x32xf32>
      %555 = vector.broadcast %554 : vector<1x32xf32> to vector<8x32xf32>
      %556 = arith.addf %552, %555 : vector<8x32xf32>
      %557 = arith.addf %arg25, %556 : vector<8x32xf32>
      %c2_250 = arith.constant 2 : index
      %c0_251 = arith.constant 0 : index
      %c0_252 = arith.constant 0 : index
      %558 = vector.load %arg15[%c2_250, %c0_251, %c0_252] : memref<3x1x32xf32, #tpu.memory_space<vmem>>, vector<1x1x32xf32>
      %559 = vector.shape_cast %558 : vector<1x1x32xf32> to vector<1x32xf32>
      %c2_253 = arith.constant 2 : index
      %c0_254 = arith.constant 0 : index
      %c0_255 = arith.constant 0 : index
      %560 = vector.load %arg16[%c2_253, %c0_254, %c0_255] : memref<3x1x32xf32, #tpu.memory_space<vmem>>, vector<1x1x32xf32>
      %561 = vector.shape_cast %560 : vector<1x1x32xf32> to vector<1x32xf32>
      %cst_256 = arith.constant dense<0.000000e+00> : vector<8xf32>
      %562 = vector.multi_reduction <add>, %557, %cst_256 [1] : vector<8x32xf32> to vector<8xf32>
      %563 = vector.shape_cast %562 : vector<8xf32> to vector<8x1xf32>
      %cst_257 = arith.constant 3.200000e+01 : f32
      %564 = vector.broadcast %cst_257 : f32 to vector<8x1xf32>
      %565 = arith.divf %563, %564 : vector<8x1xf32>
      %566 = vector.broadcast %565 : vector<8x1xf32> to vector<8x32xf32>
      %567 = arith.subf %557, %566 : vector<8x32xf32>
      %568 = arith.mulf %567, %567 : vector<8x32xf32>
      %cst_258 = arith.constant dense<0.000000e+00> : vector<8xf32>
      %569 = vector.multi_reduction <add>, %568, %cst_258 [1] : vector<8x32xf32> to vector<8xf32>
      %570 = vector.shape_cast %569 : vector<8xf32> to vector<8x1xf32>
      %cst_259 = arith.constant 3.200000e+01 : f32
      %571 = vector.broadcast %cst_259 : f32 to vector<8x1xf32>
      %572 = arith.divf %570, %571 : vector<8x1xf32>
      %cst_260 = arith.constant 9.99999974E-6 : f32
      %573 = vector.broadcast %cst_260 : f32 to vector<8x1xf32>
      %574 = arith.addf %572, %573 : vector<8x1xf32>
      %575 = math.rsqrt %574 : vector<8x1xf32>
      %576 = vector.broadcast %575 : vector<8x1xf32> to vector<8x32xf32>
      %577 = arith.mulf %567, %576 : vector<8x32xf32>
      %578 = vector.broadcast %559 : vector<1x32xf32> to vector<8x32xf32>
      %579 = arith.mulf %577, %578 : vector<8x32xf32>
      %580 = vector.broadcast %561 : vector<1x32xf32> to vector<8x32xf32>
      %581 = arith.addf %579, %580 : vector<8x32xf32>
      %582 = arith.truncf %581 : vector<8x32xf32> to vector<8x32xbf16>
      %c2_261 = arith.constant 2 : index
      %c0_262 = arith.constant 0 : index
      %c0_263 = arith.constant 0 : index
      %583 = vector.load %arg11[%c2_261, %c0_262, %c0_263] : memref<3x32x64xbf16, #tpu.memory_space<vmem>>, vector<1x32x64xbf16>
      %584 = vector.shape_cast %583 : vector<1x32x64xbf16> to vector<32x64xbf16>
      %cst_264 = arith.constant dense<0.000000e+00> : vector<8x64xf32>
      %585 = tpu.matmul %582, %584, %cst_264 {dimension_numbers = #tpu.dot_dimension_numbers<[1], [0], [0], [1], [0, 0, 1, 1], [], []>} : vector<8x32xbf16>, vector<32x64xbf16>, vector<8x64xf32> -> vector<8x64xf32>
      %c2_265 = arith.constant 2 : index
      %c0_266 = arith.constant 0 : index
      %c0_267 = arith.constant 0 : index
      %586 = vector.load %arg12[%c2_265, %c0_266, %c0_267] : memref<3x1x64xf32, #tpu.memory_space<vmem>>, vector<1x1x64xf32>
      %587 = vector.shape_cast %586 : vector<1x1x64xf32> to vector<1x64xf32>
      %588 = vector.broadcast %587 : vector<1x64xf32> to vector<8x64xf32>
      %589 = arith.addf %585, %588 : vector<8x64xf32>
      %cst_268 = arith.constant 0.000000e+00 : f32
      %590 = vector.broadcast %cst_268 : f32 to vector<8x64xf32>
      %591 = arith.maximumf %589, %590 : vector<8x64xf32>
      %592 = arith.truncf %591 : vector<8x64xf32> to vector<8x64xbf16>
      %c2_269 = arith.constant 2 : index
      %c0_270 = arith.constant 0 : index
      %c0_271 = arith.constant 0 : index
      %593 = vector.load %arg13[%c2_269, %c0_270, %c0_271] : memref<3x64x32xbf16, #tpu.memory_space<vmem>>, vector<1x64x32xbf16>
      %594 = vector.shape_cast %593 : vector<1x64x32xbf16> to vector<64x32xbf16>
      %cst_272 = arith.constant dense<0.000000e+00> : vector<8x32xf32>
      %595 = tpu.matmul %592, %594, %cst_272 {dimension_numbers = #tpu.dot_dimension_numbers<[1], [0], [0], [1], [0, 0, 1, 1], [], []>} : vector<8x64xbf16>, vector<64x32xbf16>, vector<8x32xf32> -> vector<8x32xf32>
      %c2_273 = arith.constant 2 : index
      %c0_274 = arith.constant 0 : index
      %c0_275 = arith.constant 0 : index
      %596 = vector.load %arg14[%c2_273, %c0_274, %c0_275] : memref<3x1x32xf32, #tpu.memory_space<vmem>>, vector<1x1x32xf32>
      %597 = vector.shape_cast %596 : vector<1x1x32xf32> to vector<1x32xf32>
      %598 = vector.broadcast %597 : vector<1x32xf32> to vector<8x32xf32>
      %599 = arith.addf %595, %598 : vector<8x32xf32>
      %600 = arith.addf %581, %599 : vector<8x32xf32>
      %c2_276 = arith.constant 2 : index
      %c0_277 = arith.constant 0 : index
      %c0_278 = arith.constant 0 : index
      %601 = vector.load %arg17[%c2_276, %c0_277, %c0_278] : memref<3x1x32xf32, #tpu.memory_space<vmem>>, vector<1x1x32xf32>
      %602 = vector.shape_cast %601 : vector<1x1x32xf32> to vector<1x32xf32>
      %c2_279 = arith.constant 2 : index
      %c0_280 = arith.constant 0 : index
      %c0_281 = arith.constant 0 : index
      %603 = vector.load %arg18[%c2_279, %c0_280, %c0_281] : memref<3x1x32xf32, #tpu.memory_space<vmem>>, vector<1x1x32xf32>
      %604 = vector.shape_cast %603 : vector<1x1x32xf32> to vector<1x32xf32>
      %cst_282 = arith.constant dense<0.000000e+00> : vector<8xf32>
      %605 = vector.multi_reduction <add>, %600, %cst_282 [1] : vector<8x32xf32> to vector<8xf32>
      %606 = vector.shape_cast %605 : vector<8xf32> to vector<8x1xf32>
      %cst_283 = arith.constant 3.200000e+01 : f32
      %607 = vector.broadcast %cst_283 : f32 to vector<8x1xf32>
      %608 = arith.divf %606, %607 : vector<8x1xf32>
      %609 = vector.broadcast %608 : vector<8x1xf32> to vector<8x32xf32>
      %610 = arith.subf %600, %609 : vector<8x32xf32>
      %611 = arith.mulf %610, %610 : vector<8x32xf32>
      %cst_284 = arith.constant dense<0.000000e+00> : vector<8xf32>
      %612 = vector.multi_reduction <add>, %611, %cst_284 [1] : vector<8x32xf32> to vector<8xf32>
      %613 = vector.shape_cast %612 : vector<8xf32> to vector<8x1xf32>
      %cst_285 = arith.constant 3.200000e+01 : f32
      %614 = vector.broadcast %cst_285 : f32 to vector<8x1xf32>
      %615 = arith.divf %613, %614 : vector<8x1xf32>
      %cst_286 = arith.constant 9.99999974E-6 : f32
      %616 = vector.broadcast %cst_286 : f32 to vector<8x1xf32>
      %617 = arith.addf %615, %616 : vector<8x1xf32>
      %618 = math.rsqrt %617 : vector<8x1xf32>
      %619 = vector.broadcast %618 : vector<8x1xf32> to vector<8x32xf32>
      %620 = arith.mulf %610, %619 : vector<8x32xf32>
      %621 = vector.broadcast %602 : vector<1x32xf32> to vector<8x32xf32>
      %622 = arith.mulf %620, %621 : vector<8x32xf32>
      %623 = vector.broadcast %604 : vector<1x32xf32> to vector<8x32xf32>
      %624 = arith.addf %622, %623 : vector<8x32xf32>
      scf.yield %222, %423, %624 : vector<8x32xf32>, vector<8x32xf32>, vector<8x32xf32>
    }
    %c0_11 = arith.constant 0 : index
    %c0_12 = arith.constant 0 : index
    %c0_13 = arith.constant 0 : index
    %10 = vector.load %arg19[%c0_11, %c0_12, %c0_13] : memref<1x8x32xf32, #tpu.memory_space<vmem>>, vector<1x8x32xf32>
    %11 = vector.shape_cast %10 : vector<1x8x32xf32> to vector<8x32xf32>
    %12 = vector.shape_cast %9#0 : vector<8x32xf32> to vector<1x8x32xf32>
    tpu.vector_store %arg19[%c0_11, %c0_12, %c0_13], %12 {strides = array<i32>} : memref<1x8x32xf32, #tpu.memory_space<vmem>>, vector<1x8x32xf32>,
    %c0_14 = arith.constant 0 : index
    %c0_15 = arith.constant 0 : index
    %c0_16 = arith.constant 0 : index
    %13 = vector.load %arg20[%c0_14, %c0_15, %c0_16] : memref<1x8x32xf32, #tpu.memory_space<vmem>>, vector<1x8x32xf32>
    %14 = vector.shape_cast %13 : vector<1x8x32xf32> to vector<8x32xf32>
    %15 = vector.shape_cast %9#1 : vector<8x32xf32> to vector<1x8x32xf32>
    tpu.vector_store %arg20[%c0_14, %c0_15, %c0_16], %15 {strides = array<i32>} : memref<1x8x32xf32, #tpu.memory_space<vmem>>, vector<1x8x32xf32>,
    %c0_17 = arith.constant 0 : index
    %c0_18 = arith.constant 0 : index
    %c0_19 = arith.constant 0 : index
    %16 = vector.load %arg21[%c0_17, %c0_18, %c0_19] : memref<1x8x32xf32, #tpu.memory_space<vmem>>, vector<1x8x32xf32>
    %17 = vector.shape_cast %16 : vector<1x8x32xf32> to vector<8x32xf32>
    %18 = vector.shape_cast %9#2 : vector<8x32xf32> to vector<1x8x32xf32>
    tpu.vector_store %arg21[%c0_17, %c0_18, %c0_19], %18 {strides = array<i32>} : memref<1x8x32xf32, #tpu.memory_space<vmem>>, vector<1x8x32xf32>,
    return
  }
  func.func @transform_0(%arg0: i32) -> (i32, i32, i32) {
    %c0_i32 = arith.constant 0 : i32
    %c0_i32_0 = arith.constant 0 : i32
    %c0_i32_1 = arith.constant 0 : i32
    return %arg0, %c0_i32, %c0_i32_0 : i32, i32, i32
  }
  func.func @transform_1(%arg0: i32) -> (i32, i32, i32) {
    %c0_i32 = arith.constant 0 : i32
    %c0_i32_0 = arith.constant 0 : i32
    %c0_i32_1 = arith.constant 0 : i32
    return %arg0, %c0_i32, %c0_i32_0 : i32, i32, i32
  }
  func.func @transform_2(%arg0: i32) -> (i32, i32, i32) {
    %c0_i32 = arith.constant 0 : i32
    %c0_i32_0 = arith.constant 0 : i32
    %c0_i32_1 = arith.constant 0 : i32
    return %arg0, %c0_i32, %c0_i32_0 : i32, i32, i32
  }
  func.func @transform_3(%arg0: i32) -> (i32, i32, i32) {
    %c0_i32 = arith.constant 0 : i32
    %c0_i32_0 = arith.constant 0 : i32
    %c0_i32_1 = arith.constant 0 : i32
    return %arg0, %c0_i32, %c0_i32_0 : i32, i32, i32
  }
  func.func @transform_4(%arg0: i32) -> (i32, i32, i32) {
    %c0_i32 = arith.constant 0 : i32
    %c0_i32_0 = arith.constant 0 : i32
    %c0_i32_1 = arith.constant 0 : i32
    %c0_i32_2 = arith.constant 0 : i32
    return %c0_i32, %c0_i32_0, %c0_i32_1 : i32, i32, i32
  }
  func.func @transform_5(%arg0: i32) -> (i32, i32, i32) {
    %c0_i32 = arith.constant 0 : i32
    %c0_i32_0 = arith.constant 0 : i32
    %c0_i32_1 = arith.constant 0 : i32
    %c0_i32_2 = arith.constant 0 : i32
    return %c0_i32, %c0_i32_0, %c0_i32_1 : i32, i32, i32
  }
  func.func @transform_6(%arg0: i32) -> (i32, i32, i32) {
    %c0_i32 = arith.constant 0 : i32
    %c0_i32_0 = arith.constant 0 : i32
    %c0_i32_1 = arith.constant 0 : i32
    %c0_i32_2 = arith.constant 0 : i32
    return %c0_i32, %c0_i32_0, %c0_i32_1 : i32, i32, i32
  }
  func.func @transform_7(%arg0: i32) -> (i32, i32, i32) {
    %c0_i32 = arith.constant 0 : i32
    %c0_i32_0 = arith.constant 0 : i32
    %c0_i32_1 = arith.constant 0 : i32
    %c0_i32_2 = arith.constant 0 : i32
    return %c0_i32, %c0_i32_0, %c0_i32_1 : i32, i32, i32
  }
  func.func @transform_8(%arg0: i32) -> (i32, i32, i32) {
    %c0_i32 = arith.constant 0 : i32
    %c0_i32_0 = arith.constant 0 : i32
    %c0_i32_1 = arith.constant 0 : i32
    %c0_i32_2 = arith.constant 0 : i32
    return %c0_i32, %c0_i32_0, %c0_i32_1 : i32, i32, i32
  }
  func.func @transform_9(%arg0: i32) -> (i32, i32, i32) {
    %c0_i32 = arith.constant 0 : i32
    %c0_i32_0 = arith.constant 0 : i32
    %c0_i32_1 = arith.constant 0 : i32
    %c0_i32_2 = arith.constant 0 : i32
    return %c0_i32, %c0_i32_0, %c0_i32_1 : i32, i32, i32
  }
  func.func @transform_10(%arg0: i32) -> (i32, i32, i32) {
    %c0_i32 = arith.constant 0 : i32
    %c0_i32_0 = arith.constant 0 : i32
    %c0_i32_1 = arith.constant 0 : i32
    %c0_i32_2 = arith.constant 0 : i32
    return %c0_i32, %c0_i32_0, %c0_i32_1 : i32, i32, i32
  }
  func.func @transform_11(%arg0: i32) -> (i32, i32, i32) {
    %c0_i32 = arith.constant 0 : i32
    %c0_i32_0 = arith.constant 0 : i32
    %c0_i32_1 = arith.constant 0 : i32
    %c0_i32_2 = arith.constant 0 : i32
    return %c0_i32, %c0_i32_0, %c0_i32_1 : i32, i32, i32
  }
  func.func @transform_12(%arg0: i32) -> (i32, i32, i32) {
    %c0_i32 = arith.constant 0 : i32
    %c0_i32_0 = arith.constant 0 : i32
    %c0_i32_1 = arith.constant 0 : i32
    %c0_i32_2 = arith.constant 0 : i32
    return %c0_i32, %c0_i32_0, %c0_i32_1 : i32, i32, i32
  }
  func.func @transform_13(%arg0: i32) -> (i32, i32, i32) {
    %c0_i32 = arith.constant 0 : i32
    %c0_i32_0 = arith.constant 0 : i32
    %c0_i32_1 = arith.constant 0 : i32
    %c0_i32_2 = arith.constant 0 : i32
    return %c0_i32, %c0_i32_0, %c0_i32_1 : i32, i32, i32
  }
  func.func @transform_14(%arg0: i32) -> (i32, i32, i32) {
    %c0_i32 = arith.constant 0 : i32
    %c0_i32_0 = arith.constant 0 : i32
    %c0_i32_1 = arith.constant 0 : i32
    %c0_i32_2 = arith.constant 0 : i32
    return %c0_i32, %c0_i32_0, %c0_i32_1 : i32, i32, i32
  }
  func.func @transform_15(%arg0: i32) -> (i32, i32, i32) {
    %c0_i32 = arith.constant 0 : i32
    %c0_i32_0 = arith.constant 0 : i32
    %c0_i32_1 = arith.constant 0 : i32
    %c0_i32_2 = arith.constant 0 : i32
    return %c0_i32, %c0_i32_0, %c0_i32_1 : i32, i32, i32
  }
  func.func @transform_16(%arg0: i32) -> (i32, i32, i32) {
    %c0_i32 = arith.constant 0 : i32
    %c0_i32_0 = arith.constant 0 : i32
    %c0_i32_1 = arith.constant 0 : i32
    %c0_i32_2 = arith.constant 0 : i32
    return %c0_i32, %c0_i32_0, %c0_i32_1 : i32, i32, i32
  }
  func.func @transform_17(%arg0: i32) -> (i32, i32, i32) {
    %c0_i32 = arith.constant 0 : i32
    %c0_i32_0 = arith.constant 0 : i32
    %c0_i32_1 = arith.constant 0 : i32
    %c0_i32_2 = arith.constant 0 : i32
    return %c0_i32, %c0_i32_0, %c0_i32_1 : i32, i32, i32
  }
  func.func @transform_18(%arg0: i32) -> (i32, i32, i32) {
    %c0_i32 = arith.constant 0 : i32
    %c0_i32_0 = arith.constant 0 : i32
    %c0_i32_1 = arith.constant 0 : i32
    return %arg0, %c0_i32, %c0_i32_0 : i32, i32, i32
  }
  func.func @transform_19(%arg0: i32) -> (i32, i32, i32) {
    %c0_i32 = arith.constant 0 : i32
    %c0_i32_0 = arith.constant 0 : i32
    %c0_i32_1 = arith.constant 0 : i32
    return %arg0, %c0_i32, %c0_i32_0 : i32, i32, i32
  }
  func.func @transform_20(%arg0: i32) -> (i32, i32, i32) {
    %c0_i32 = arith.constant 0 : i32
    %c0_i32_0 = arith.constant 0 : i32
    %c0_i32_1 = arith.constant 0 : i32
    return %arg0, %c0_i32, %c0_i32_0 : i32, i32, i32
  }
}

</mosaic_0001>

<bundles_post_ra>
// kernel: _mpcat_forward.1
= control target key start
LH: loop header
LB: loop body
LE: loop exit
PB: predicated region body
PF: predicated region fallthrough
CT: control target
= control target key end

     0   :  { %s5831_s0 = inlined_call_operand.vmem [shape: f32[2,8,32], index: 0, kind: input, shape index: {}]   ;;  %s5832_s1 = inlined_call_operand.vmem [shape: f32[2,8,32], index: 1, kind: input, shape index: {}]   ;;  %s5833_s2 = inlined_call_operand.vmem [shape: f32[2,8,32], index: 2, kind: input, shape index: {}]   ;;  %s5834_s3 = inlined_call_operand.vmem [shape: f32[2,1,16], index: 3, kind: input, shape index: {}]   ;;  %s5835_s4 = inlined_call_operand.vmem [shape: bf16[3,32,32], index: 4, kind: input, shape index: {}]   ;;  %s5836_s5 = inlined_call_operand.vmem [shape: f32[3,1,32], index: 5, kind: input, shape index: {}]   ;;  %s5837_s6 = inlined_call_operand.vmem [shape: bf16[3,32,64], index: 6, kind: input, shape index: {}]   ;;  %s5838_s7 = inlined_call_operand.vmem [shape: f32[3,1,64], index: 7, kind: input, shape index: {}]   ;;  %s5839_s8 = inlined_call_operand.vmem [shape: bf16[3,32,32], index: 8, kind: input, shape index: {}]   ;;  %s5840_s9 = inlined_call_operand.vmem [shape: f32[3,1,32], index: 9, kind: input, shape index: {}]   ;;  %s5841_s10 = inlined_call_operand.vmem [shape: bf16[3,32,64], index: 10, kind: input, shape index: {}]   ;;  %s5842_s11 = inlined_call_operand.vmem [shape: f32[3,1,64], index: 11, kind: input, shape index: {}]   ;;  %s5843_s12 = inlined_call_operand.vmem [shape: bf16[3,64,32], index: 12, kind: input, shape index: {}]   ;;  %s5844_s13 = inlined_call_operand.vmem [shape: f32[3,1,32], index: 13, kind: input, shape index: {}]   ;;  %s5845_s14 = inlined_call_operand.vmem [shape: f32[3,1,32], index: 14, kind: input, shape index: {}]   ;;  %s5846_s15 = inlined_call_operand.vmem [shape: f32[3,1,32], index: 15, kind: input, shape index: {}]   ;;  %s5847_s16 = inlined_call_operand.vmem [shape: f32[3,1,32], index: 16, kind: input, shape index: {}]   ;;  %s5848_s17 = inlined_call_operand.vmem [shape: f32[3,1,32], index: 17, kind: input, shape index: {}]   ;;  %s5849_s18 = inlined_call_operand.hbm [shape: f32[2,8,32], index: 18, kind: output, shape index: {0}]   ;;  %s5850_s19 = inlined_call_operand.hbm [shape: f32[2,8,32], index: 19, kind: output, shape index: {1}]   ;;  %s5851_s20 = inlined_call_operand.hbm [shape: f32[2,8,32], index: 20, kind: output, shape index: {2}]  }
   0x1   :  { %5874 = sst [smem:[#allocation18_spill]] %s5831_s0 }
   0x2   :  { %5875 = sst [smem:[#allocation19_spill]] %s5832_s1 }
   0x3   :  { %5876 = sst [smem:[#allocation20_spill]] %s5833_s2 }
   0x4   :  { %5877 = sst [smem:[#allocation21_spill]] %s5834_s3 }
   0x5   :  { %5878 = sst [smem:[#allocation22_spill]] %s5835_s4 }
   0x6   :  { %5879 = sst [smem:[#allocation23_spill]] %s5836_s5 }
   0x7   :  { %5880 = sst [smem:[#allocation24_spill]] %s5837_s6 }
   0x8   :  { %5881 = sst [smem:[#allocation25_spill]] %s5838_s7 }
   0x9   :  { %5882 = sst [smem:[#allocation26_spill]] %s5847_s16 }
   0xa   :  { %5883 = sst [smem:[#allocation27_spill]] %s5848_s17 }
   0xb   :  { %5884 = sst [smem:[#allocation28_spill]] %s5849_s18 }
   0xc   :  { %5885 = sst [smem:[#allocation29_spill]] %s5850_s19 }
   0xd   :  { %5886 = sst [smem:[#allocation30_spill]] %s5851_s20 }
   0xe   :  { %26 = vsyncpa [#allocation3], 0 }
   0xf   :  { %28 = vsyncpa [#allocation3 + $0x1], 0 }
  0x10   :  { %29 = vsyncpa [#allocation5], 0 }
  0x11   :  { %31 = vsyncpa [#allocation5 + $0x1], 0  ;;  %s5011_s1 = smov 0   ;;  %s5013_s22 = smov 0  }
  0x12   :  { %s5015_s23 = smov 0   ;;  %s5017_s24 = smov 0  }
  0x13 LB: > { %5887 = sst [smem:[#allocation9_spill]] %s4864_s1  ;;  %s5032_s2 = sadd.s32 4294967295, %s4876_s24   ;;  %s4876_s24 = sphi %s5017_s24, %s5927_s24   ;;  %s4872_s23 = sphi %s5015_s23, %s5930_s23   ;;  %s4868_s22 = sphi %s5013_s22, %s5929_s22   ;;  %s4864_s1 = sphi %s5011_s1, %s5928_s1  }
  0x14   : > { %5888 = sst [smem:[#allocation10_spill]] %s4868_s22  ;;  %s5853_s25 = sadd.s32 4294967294, %s4876_s24  }
  0x15   : > { %5889 = sst [smem:[#allocation11_spill]] %s4872_s23  ;;  %s5036_s3 = sadd.s32 1, %s4876_s24  }
  0x16   : > { %5890 = sst [smem:[#allocation12_spill]] %s4876_s24  ;;  %s442_s26 = sadd.s32 1, %s4872_s23 }
  0x17   : > { %5891 = sst [smem:[#allocation13_spill]] %s5032_s2  ;;  %s439_s27 = ssub.s32 %s4876_s24, %s5036_s3 }
  0x18   : > { %5892 = sst [smem:[#allocation14_spill]] %s5036_s3  ;;  %p452_p0 = scmp.ne.s32.totalorder %s4872_s23, %s4868_s22 }
  0x19   : > { %p440_p1 = scmp.eq.s32.totalorder %s439_s27, 0  ;;  %p453_p2 = scmp.eq.s32.totalorder %s5032_s2, 1 }
  0x1a   : > { %p458_p3 = scmp.ne.s32.totalorder %s4868_s22, %s4864_s1  ;;  %p459_p4 = scmp.eq.s32.totalorder %s5853_s25, 1 }
  0x1b   : > { %s5049_s28 = scalar_select %p440_p1, %s4872_s23, %s442_s26  }
  0x1c   : > { %p5051_p5 = por %p453_p2, %p452_p0  ;;  %p5055_p6 = por %p459_p4, %p458_p3 }
  0x1d   : > { %5893 = sst [smem:[#allocation15_spill]] %s5049_s28  ;;  %p3933_p7 = scmp.ge.s32.totalorder %s4876_s24, 1 }
  0x1e   : > { %s5894_s4 = scalar_select %p5051_p5, 1, 0 }
  0x1f   : > { %s5896_s29 = scalar_select %p5055_p6, 1, 0 }
  0x20   : > { %5895 = sst [smem:[#allocation16_spill]] %s5894_s4  ;;  %p598_p8 = scmp.lt.s32.totalorder %s4876_s24, 3 }
  0x21   : > { %5897 = sst [smem:[#allocation17_spill]] %s5896_s29 }
  0x22   : > { %p599_p9 = pnand %p3933_p7, %p598_p8 }
  0x23   : > { %s5866_s30 = sand.u32 (!%p599_p9), 1, %s4868_s22   ;;  %p676_p10 = scmp.lt.s32.totalorder (!%p599_p9), %s5032_s2, 1 }
  0x24   : > { %602 = sbr.rel (%p599_p9) target bundleno = 8265 (0x2049), region = 92  ;;  %s5065_s0 = sshll.u32 (!%p599_p9), %s5866_s30, 3 }
  0x25   : > { %s5898_s28 = sld [smem:[#allocation21_spill]] (!%p599_p9)  ;;  %s5899_s1 = sld [smem:[#allocation18_spill]] (!%p599_p9) }
  0x26   : > { %s5900_s19 = sld [smem:[#allocation19_spill]] (!%p599_p9)  ;;  %s5901_s17 = sld [smem:[#allocation20_spill]] (!%p599_p9) }
  0x27   : > { %s668_s25 = scalar_lea.vmem (!%p599_p9), [#allocation4], %s5065_s0  ;;  %s5091_s18 = smov (!%p599_p9), 0  }
  0x2b   : > { %s677_s21 = scalar_select %p676_p10, %s5032_s2, 1 }
  0x2c   : > { %s5872_s2 = scalar_lea.vmem [#allocation2], %s5065_s0 }
  0x2d   : > { %s3937_s26 = sshll.u32 %s677_s21, 3  ;;  %s690_s23 = scalar_lea.vmem %s5898_s28, %s677_s21 }
  0x2e   : > { %s679_s24 = scalar_lea.vmem %s5899_s1, %s3937_s26  ;;  %s683_s4 = scalar_lea.vmem %s5900_s19, %s3937_s26  ;;  %v5077_v0 = vld [vmem:[%s690_s23] ss:$0 sm:$0xff] }
  0x2f   : > { %s687_s16 = scalar_lea.vmem %s5901_s17, %s3937_s26  ;;  %v693_v1 = vld [vmem:[%s679_s24] sm:$0xff]  }
  0x30   : > { %v694_v2 = vld [vmem:[%s683_s4] sm:$0xff]  }
  0x31   : > { %v695_v3 = vld [vmem:[%s687_s16] sm:$0xff]  }
  0x32 LB: >> { %s5902_s6 = sld [smem:[#allocation24_spill]]  ;;  %v4894_v5 = vmov 0.0   ;;  %s5903_s23 = sld [smem:[#allocation22_spill]]  ;;  %vm4895_vm0 = vmmov 0   ;;  %vm730_vm1 = vcmask 261120   ;;  %v706_v9 = vpack.c.bf16 %v4880_v3, %v4884_v2  ;;  %s4892_s18 = sphi %s5091_s18, %s701_s18   ;;  %v4888_v1 = vphi %v693_v1, %v5912_v1   ;;  %v4884_v2 = vphi %v694_v2, %v5911_v2   ;;  %v4880_v3 = vphi %v695_v3, %v5910_v3  }
  0x33   : >> { %4242 = vmatprep.subr.bf16.mxu1 %v4894_v5  ;;  %4234 = vmatprep.subr.bf16.mxu0 %v4894_v5  ;;  %v705_v10 = vpack.c.bf16 %v4888_v1, %v4888_v1  ;;  %s5905_s7 = sld [smem:[#allocation25_spill]]  ;;  %s5906_s5 = sld [smem:[#allocation23_spill]]  ;;  %vm843_vm2 = vcmask 64512   ;;  %vm898_vm3 = vcmask 130048   ;;  %v959_v55 = vld [vmem:[%s5839_s8] sm:$0xf] }
  0x34   : >> { %4246 = vmatprep.mubr.msk.bf16.mxu1 %vm4895_vm0, %v4894_v5  ;;  %4238 = vmatprep.mubr.msk.bf16.mxu0 %vm4895_vm0, %v4894_v5  ;;  %s4896_s27 = smov 120   ;;  %s4897_s16 = smov 96   ;;  %vm1076_vm4 = vcmask 1043456   ;;  %v1072_v60 = vld [vmem:[%s5839_s8 + $0x4] sm:$0xf]  ;;  %vm1631_vm5 = vcmask 523264  }
  0x35   : >> { %s4898_s17 = smov 88   ;;  %s4899_s19 = smov 112   ;;  %v1124_v59 = vsel %vm1076_vm4, %v959_v55, 0  ;;  %v1078_v61 = vsel %vm1076_vm4, %v1072_v60, 0 }
  0x36   : >> { %s4900_s20 = smov 104   ;;  %s4901_s4 = smov 80  }
  0x37   : >> { %s4902_s29 = smov 72   ;;  %s5908_s24 = sld [smem:[#allocation27_spill]] }
  0x38   : >> { %v4648_v4 = vld [vmem:[%s5902_s6] sm:$0xff]   ;;  %v4649_v6 = vld [vmem:[%s5902_s6 + $0x8] sm:$0xff]   ;;  %s5904_s3 = smov %s5903_s23  ;;  %s701_s18 = sadd.s32 1, %s4892_s18  }
  0x39   : >> { %4243 = vmatpush3.bf16.msra.mxu1 %v4648_v4  ;;  %v4650_v7 = vld [vmem:[%s5903_s23] sm:$0xff]   ;;  %v4651_v8 = vld [vmem:[%s5904_s3 + $0x8] sm:$0xff]   ;;  %p698_p11 = scmp.ge.s32.totalorder %s701_s18, 2  }
  0x3a   : >> { %4244 = vmatprep.subr.bf16.mxu1 %v4894_v5  ;;  %4235 = vmatpush3.bf16.msra.mxu0 %v4650_v7  ;;  %v3944_v11 = vld [vmem:[%s5905_s7] ss:$0 sm:$0xff]  ;;  %s5915_s22 = scalar_lea.vmem (%p698_p11), [#allocation6], %s5065_s0  ;;  %s5916_s26 = sld [smem:[#allocation29_spill]] (%p698_p11) }
  0x3b   : >> { %4236 = vmatprep.subr.bf16.mxu0 %v4894_v5  ;;  %v3940_v13 = vld [vmem:[%s5906_s5] ss:$0 sm:$0xff]  ;;  %s3750_s1 = sshll.u32 (%p698_p11), %s668_s25, 4  ;;  %s4903_s18 = smov (%p698_p11), [#allocation4]   ;;  %s5724_s1 = int_to_ptr.vmem [resolvable:$true] %s3750_s1 }
  0x3c   : > { %s4742_s21 = sshll.u32 (%p698_p11), %s4903_s18, 4  ;;  %s4743_s21 = int_to_ptr.vmem [resolvable:$false] %s4742_s21 }
  0x3d   : >> { %4245 = vmatpush3.bf16.msra.mxu1 %v4649_v6  ;;  %s5909_s30 = smov %s5908_s24  ;;  %p4745_p1 = scmp.lt.s32.totalorder (%p698_p11), %s5724_s1, %s4743_s21 }
  0x3e   : >> { %4256 = vmatprep.subr.bf16.mxu1 %v4894_v5  ;;  %4237 = vmatpush3.bf16.msra.mxu0 %v4651_v8 }
  0x3f   : >> { %4250 = vmatprep.subr.bf16.mxu0 %v4894_v5 }
  0x40   : >> { %4247 = vmatmul.mubr.msk.bf16.vlgmr.msra.gmra.mrb[0].mxu1 %vm730_vm1, %v706_v9 }
  0x41   : >> { %4258 = vmatprep.mubr.msk.bf16.mxu1 %vm4895_vm0, %v4894_v5  ;;  %4239 = vmatmul.mubr.msk.bf16.vlgmr.msra.gmra.mrb[0].mxu0 %vm730_vm1, %v705_v10 }
  0x42   : >> { %4252 = vmatprep.mubr.msk.bf16.mxu0 %vm4895_vm0, %v4894_v5 }
 0x113   : >> { %v834_v12 = vpop.f32.mrb[0].mxu1 }
 0x114   : >> { %v4248_v14 = vpop.f32.mrb[1].mxu1  ;;  %v768_v16 = vpop.f32.mrb[0].mxu0  ;;  %v835_v17 = vadd.f32 %v3944_v11, %v834_v12 }
 0x115   : >> { %v837_v15 = vpop.f32.mrb[2].mxu1  ;;  %v769_v20 = vadd.f32 %v3940_v13, %v768_v16  ;;  %v4240_v21 = vpop.f32.mrb[1].mxu0 }
 0x116   : >> { %v838_v18 = vadd.f32 %v3944_v11, %v837_v15  ;;  %v4249_v19 = vpop.f32.mrb[3].mxu1  ;;  %v771_v22 = vpop.f32.mrb[2].mxu0 }
 0x117   : >> { %v4241_v24 = vpop.f32.mrb[3].mxu0  ;;  %v841_v25 = vpack.c.bf16 %v769_v20, %v769_v20 }
 0x118   : >> { %v5143_v23 = vpack.c.bf16 %v838_v18, %v835_v17 }
 0x11a   : >> { %963 = vrot.lane.b32.xlu0 %v5143_v23, %s4896_s27  ;;  %v848_v26 = vsel %vm843_vm2, %v5143_v23, 0 }
 0x11b   : >> { %4251 = vmatpush3.bf16.xpose.msra.mxu0 %v848_v26 }
 0x11c   : >> { %4262 = vmatprep.subr.bf16.mxu0 %v4894_v5 }
 0x11e   : >> { %961 = vrot.lane.b32.xlu0 %v841_v25, %s4896_s27 }
 0x122   : >> { %911 = vrot.lane.b32.xlu0 %v5143_v23, %s4897_s16  ;;  %4253 = vmatmul.mubr.msk.bf16.vlgmr.msra.gmra.mrb[4].mxu0 %vm843_vm2, %v841_v25 }
 0x123   : >> { %4264 = vmatprep.mubr.msk.bf16.mxu0 %vm4895_vm0, %v4894_v5 }
 0x18c   : >> { %v964_v27 = vpop.permute.xlu0 %963 }
 0x18d   : >> { %v969_v28 = vsel %vm843_vm2, %v964_v27, 0 }
 0x18e   : >> { %4263 = vmatpush3.bf16.xpose.msra.mxu0 %v969_v28 }
 0x18f   : >> { %4274 = vmatprep.subr.bf16.mxu0 %v4894_v5 }
 0x190   : >> { %v962_v29 = vpop.permute.xlu0 %961 }
 0x194   : >> { %v912_v30 = vpop.permute.xlu0 %911 }
 0x195   : >> { %4257 = vmatpush3.bf16.msra.mxu1 %v912_v30  ;;  %4265 = vmatmul.mubr.msk.bf16.vlgmr.msra.gmra.mrb[8].mxu0 %vm843_vm2, %v962_v29 }
 0x196   : >> { %4268 = vmatprep.subr.bf16.mxu1 %v4894_v5  ;;  %4276 = vmatprep.mubr.msk.bf16.mxu0 %vm4895_vm0, %v4894_v5 }
 0x197   : >> { %4275 = vmatpush3.bf16.msra.mxu0 %v1078_v61 }
 0x198   : >> { %4286 = vmatprep.subr.bf16.mxu0 %v4894_v5 }
 0x1f5   : >> { %v884_v31 = vpop.f32.mrb[4].mxu0 }
 0x1f6   : >> { %v890_v32 = vmul.f32 0.35355338, %v884_v31  ;;  %v4254_v33 = vpop.f32.mrb[5].mxu0 }
 0x1f7   : >> { %v887_v34 = vpop.f32.mrb[6].mxu0 }
 0x1f8   : >> { %v897_v35 = vadd.f32 %v5077_v0, %v890_v32  ;;  %v4255_v36 = vpop.f32.mrb[7].mxu0 }
 0x1fa   : >> { %v899_v37 = vsel %vm898_vm3, %v897_v35, -inf }
 0x1fb   : >> { %900 = vmax.xlane.f32.xlu1 %v899_v37 }
 0x268   : >> { %v1005_v38 = vpop.f32.mrb[8].mxu0 }
 0x269   : >> { %v1011_v39 = vmul.f32 0.35355338, %v1005_v38  ;;  %v4266_v40 = vpop.f32.mrb[9].mxu0 }
 0x26a   : >> { %v1008_v41 = vpop.f32.mrb[10].mxu0 }
 0x26b   : >> { %v1012_v42 = vadd.f32 %v5077_v0, %v1011_v39  ;;  %v4267_v43 = vpop.f32.mrb[11].mxu0 }
 0x26d   : >> { %v1013_v44 = vsel %vm898_vm3, %v1012_v42, -inf }
 0x26e   : >> { %1014 = vmax.xlane.f32.xlu1 %v1013_v44 }
 0x27f   : >> { %1024 = vrot.lane.b32.xlu1 %v5143_v23, %s4898_s17 }
 0x283   : >> { %1168 = vrot.lane.b32.xlu1 %v5143_v23, %s4899_s19 }
 0x287   : >> { %1166 = vrot.lane.b32.xlu1 %v841_v25, %s4899_s19 }
 0x288   : >> { %v901_v45 = vpop.xlane.xlu1 %900 }
 0x289   : >> { %v902_v46 = vsub.f32 %v897_v35, %v901_v45 }
 0x28b   : >> { %v903_v47 = vmul.f32 1.442695, %v902_v46 }
 0x28d   : >> { %4678 = vpow2.f32 %v903_v47 }
 0x297   : >> { %v4679_v48 = vpop.eup %4678 }
 0x298   : >> { %v909_v49 = vpack.c.bf16 %v4679_v48, %v4679_v48  ;;  %v905_v50 = vsel %vm898_vm3, %v4679_v48, 0.0 }
 0x29a   : >> { %4259 = vmatmul.mubr.msk.bf16.vlgmr.msra.gmra.mrb[4].mxu1 %vm898_vm3, %v909_v49  ;;  %v1277_v49 = vld [vmem:[%s5839_s8 + $0x8] sm:$0xf] }
 0x29b   : >> { %4270 = vmatprep.mubr.msk.bf16.mxu1 %vm4895_vm0, %v4894_v5 }
 0x2ab   : >> { %906 = vadd.xlane.f32.xlu1 %v905_v50  ;;  %v1282_v50 = vsel %vm1076_vm4, %v1277_v49, 0 }
 0x2bc   : >> { %1325 = vrot.lane.b32.xlu1 %v841_v25, %s4900_s20 }
 0x2fb   : >> { %v1015_v51 = vpop.xlane.xlu1 %1014 }
 0x2fc   : >> { %v1016_v52 = vsub.f32 %v1012_v42, %v1015_v51 }
 0x2fe   : >> { %v1017_v53 = vmul.f32 1.442695, %v1016_v52 }
 0x2ff   : >> { %v1025_v54 = vpop.permute.xlu1 %1024 }
 0x300   : >> { %4680 = vpow2.f32 %v1017_v53  ;;  %4269 = vmatpush3.bf16.msra.mxu1 %v1025_v54 }
 0x301   : >> { %4280 = vmatprep.subr.bf16.mxu1 %v4894_v5 }
 0x303   : >> { %v1169_v62 = vpop.permute.xlu1 %1168 }
 0x304   : >> { %v1174_v22 = vsel %vm843_vm2, %v1169_v62, 0 }
 0x307   : >> { %v1167_v63 = vpop.permute.xlu1 %1166 }
 0x30a   : >> { %v4681_v56 = vpop.eup %4680 }
 0x30b   : >> { %v1019_v57 = vsel %vm898_vm3, %v4681_v56, 0.0  ;;  %v1023_v58 = vpack.c.bf16 %v4681_v56, %v4681_v56 }
 0x30c   : >> { %1020 = vadd.xlane.f32.xlu0 %v1019_v57 }
 0x30d   : >> { %4271 = vmatmul.mubr.msk.bf16.vlgmr.msra.gmra.mrb[8].mxu1 %vm898_vm3, %v1023_v58 }
 0x30e   : >> { %4281 = vmatpush3.bf16.msra.mxu1 %v1124_v59  ;;  %4282 = vmatprep.mubr.msk.bf16.mxu1 %vm4895_vm0, %v4894_v5 }
 0x30f   : >> { %4292 = vmatprep.subr.bf16.mxu1 %v4894_v5 }
 0x322   : >> { %1229 = vrot.lane.b32.xlu0 %v5143_v23, %s4901_s4 }
 0x338   : >> { %v907_v4 = vpop.xlane.xlu1 %906 }
 0x339   : >> { %4682 = vrcp.f32 %v907_v4 }
 0x33c   : >> { %v1326_v48 = vpop.permute.xlu1 %1325 }
 0x343   : >> { %v4683_v6 = vpop.eup %4682 }
 0x36d   : >> { %v951_v7 = vpop.f32.mrb[4].mxu1 }
 0x36e   : >> { %v957_v8 = vmul.f32 %v4683_v6, %v951_v7  ;;  %v4260_v9 = vpop.f32.mrb[5].mxu1 }
 0x36f   : >> { %v954_v10 = vpop.f32.mrb[6].mxu1 }
 0x370   : >> { %v958_v11 = vpack.c.bf16 %v957_v8, %v957_v8  ;;  %v4261_v12 = vpop.f32.mrb[7].mxu1 }
 0x372   : >> { %4283 = vmatmul.mubr.msk.bf16.vlgmr.msra.gmra.mrb[12].mxu1 %vm843_vm2, %v958_v11 }
 0x373   : >> { %4294 = vmatprep.mubr.msk.bf16.mxu1 %vm4895_vm0, %v4894_v5 }
 0x399   : >> { %v1021_v13 = vpop.xlane.xlu0 %1020 }
 0x39a   : >> { %4684 = vrcp.f32 %v1021_v13  ;;  %v1436_v13 = vld [vmem:[%s5839_s8 + $0xc] sm:$0xf] }
 0x39d   : >> { %v1230_v14 = vpop.permute.xlu0 %1229 }
 0x39e   : >> { %4293 = vmatpush3.bf16.msra.mxu1 %v1230_v14  ;;  %v1441_v14 = vsel %vm1076_vm4, %v1436_v13, 0 }
 0x39f   : >> { %4304 = vmatprep.subr.bf16.mxu1 %v4894_v5 }
 0x3a4   : >> { %v4685_v15 = vpop.eup %4684 }
 0x3e0   : >> { %v1064_v16 = vpop.f32.mrb[8].mxu1 }
 0x3e1   : >> { %v1070_v17 = vmul.f32 %v4685_v15, %v1064_v16  ;;  %v4272_v18 = vpop.f32.mrb[9].mxu1 }
 0x3e2   : >> { %v1067_v19 = vpop.f32.mrb[10].mxu1 }
 0x3e3   : >> { %v1071_v20 = vpack.c.bf16 %v1070_v17, %v1070_v17  ;;  %v4273_v21 = vpop.f32.mrb[11].mxu1 }
 0x3e5   : >> { %4277 = vmatmul.mubr.msk.bf16.vlgmr.msra.gmra.mrb[12].mxu0 %vm843_vm2, %v1071_v20 }
 0x3e6   : >> { %4287 = vmatpush3.bf16.xpose.msra.mxu0 %v1174_v22  ;;  %4288 = vmatprep.mubr.msk.bf16.mxu0 %vm4895_vm0, %v4894_v5 }
 0x3e7   : >> { %4298 = vmatprep.subr.bf16.mxu0 %v4894_v5 }
 0x3ed   : >> { %4289 = vmatmul.mubr.msk.bf16.vlgmr.msra.gmra.mrb[16].mxu0 %vm843_vm2, %v1167_v63 }
 0x3ee   : >> { %4300 = vmatprep.mubr.msk.bf16.mxu0 %vm4895_vm0, %v4894_v5  ;;  %4299 = vmatpush3.bf16.msra.mxu0 %v1282_v50 }
 0x3ef   : >> { %4310 = vmatprep.subr.bf16.mxu0 %v4894_v5 }
 0x445   : >> { %v1160_v24 = vpop.f32.mrb[12].mxu1 }
 0x446   : >> { %v4284_v25 = vpop.f32.mrb[13].mxu1 }
 0x447   : >> { %v1163_v26 = vpop.f32.mrb[14].mxu1 }
 0x448   : >> { %v4285_v27 = vpop.f32.mrb[15].mxu1 }
 0x4b8   : >> { %v1114_v28 = vpop.f32.mrb[12].mxu0 }
 0x4b9   : >> { %v5205_v29 = vadd.f32 %v1160_v24, %v1114_v28  ;;  %v4278_v30 = vpop.f32.mrb[13].mxu0 }
 0x4ba   : >> { %v1117_v31 = vpop.f32.mrb[14].mxu0 }
 0x4bb   : >> { %v4279_v32 = vpop.f32.mrb[15].mxu0 }
 0x4c0   : >> { %v1210_v33 = vpop.f32.mrb[16].mxu0 }
 0x4c1   : >> { %v1216_v34 = vmul.f32 0.35355338, %v1210_v33  ;;  %v4290_v35 = vpop.f32.mrb[17].mxu0 }
 0x4c2   : >> { %v1213_v36 = vpop.f32.mrb[18].mxu0 }
 0x4c3   : >> { %v1217_v37 = vadd.f32 %v5077_v0, %v1216_v34  ;;  %v4291_v38 = vpop.f32.mrb[19].mxu0 }
 0x4c5   : >> { %v1218_v39 = vsel %vm898_vm3, %v1217_v37, -inf }
 0x4c6   : >> { %1219 = vmax.xlane.f32.xlu0 %v1218_v39 }
 0x4dc   : >> { %1327 = vrot.lane.b32.xlu0 %v5143_v23, %s4900_s20 }
 0x553   : >> { %v1220_v40 = vpop.xlane.xlu0 %1219 }
 0x554   : >> { %v1221_v41 = vsub.f32 %v1217_v37, %v1220_v40 }
 0x556   : >> { %v1222_v42 = vmul.f32 1.442695, %v1221_v41 }
 0x557   : >> { %v1328_v44 = vpop.permute.xlu0 %1327 }
 0x558   : >> { %4686 = vpow2.f32 %v1222_v42  ;;  %v1333_v47 = vsel %vm843_vm2, %v1328_v44, 0  ;;  %v4653_v44 = vld [vmem:[%s5841_s10 + $0x8] sm:$0xff]  }
 0x562   : >> { %v4687_v43 = vpop.eup %4686 }
 0x563   : >> { %v1224_v45 = vsel %vm898_vm3, %v4687_v43, 0.0  ;;  %v1228_v46 = vpack.c.bf16 %v4687_v43, %v4687_v43  ;;  %v4652_v43 = vld [vmem:[%s5841_s10] sm:$0xff]  }
 0x564   : >> { %1225 = vadd.xlane.f32.xlu0 %v1224_v45  ;;  %v4658_v45 = vld [vmem:[%s5843_s12] sm:$0xff]  }
 0x565   : >> { %4295 = vmatmul.mubr.msk.bf16.vlgmr.msra.gmra.mrb[16].mxu1 %vm898_vm3, %v1228_v46  ;;  %v4659_v46 = vld [vmem:[%s5843_s12 + $0x8] sm:$0xff]  }
 0x566   : >> { %4305 = vmatpush3.bf16.xpose.msra.mxu1 %v1333_v47  ;;  %4306 = vmatprep.mubr.msk.bf16.mxu1 %vm4895_vm0, %v4894_v5 }
 0x567   : >> { %4316 = vmatprep.subr.bf16.mxu1 %v4894_v5 }
 0x56d   : >> { %4307 = vmatmul.mubr.msk.bf16.vlgmr.msra.gmra.mrb[20].mxu1 %vm843_vm2, %v1326_v48 }
 0x56e   : >> { %4318 = vmatprep.mubr.msk.bf16.mxu1 %vm4895_vm0, %v4894_v5  ;;  %4317 = vmatpush3.bf16.msra.mxu1 %v1441_v14 }
 0x56f   : >> { %4330 = vmatprep.subr.bf16.mxu1 %v4894_v5 }
 0x57a   : >> { %1388 = vrot.lane.b32.xlu0 %v5143_v23, %s4902_s29 }
 0x5f1   : >> { %v1226_v51 = vpop.xlane.xlu0 %1225 }
 0x5f2   : >> { %4688 = vrcp.f32 %v1226_v51  ;;  %v3962_v51 = vld [vmem:[%s5845_s14] ss:$0 sm:$0xff] }
 0x5f5   : >> { %v1389_v59 = vpop.permute.xlu0 %1388 }
 0x5fc   : >> { %v4689_v52 = vpop.eup %4688 }
 0x638   : >> { %v1269_v53 = vpop.f32.mrb[16].mxu1 }
 0x639   : >> { %v1275_v54 = vmul.f32 %v4689_v52, %v1269_v53  ;;  %v4296_v55 = vpop.f32.mrb[17].mxu1  ;;  %v3963_v53 = vld [vmem:[%s5846_s15] ss:$0 sm:$0xff] }
 0x63a   : >> { %v1272_v56 = vpop.f32.mrb[18].mxu1 }
 0x63b   : >> { %v1276_v57 = vpack.c.bf16 %v1275_v54, %v1275_v54  ;;  %v4297_v58 = vpop.f32.mrb[19].mxu1  ;;  %v4654_v56 = vld [vmem:[%s5904_s3 + $0x10] sm:$0xff]  }
 0x63c   : >> { %v4655_v58 = vld [vmem:[%s5904_s3 + $0x18] sm:$0xff]  }
 0x63d   : >> { %4301 = vmatmul.mubr.msk.bf16.vlgmr.msra.gmra.mrb[20].mxu0 %vm843_vm2, %v1276_v57 }
 0x63e   : >> { %4311 = vmatpush3.bf16.msra.mxu0 %v1389_v59  ;;  %4312 = vmatprep.mubr.msk.bf16.mxu0 %vm4895_vm0, %v4894_v5  ;;  %v1705_v59 = vpack.c.bf16 %v4884_v2, %v4884_v2 }
 0x63f   : >> { %4322 = vmatprep.subr.bf16.mxu0 %v4894_v5 }
 0x640   : >> { %v1369_v23 = vpop.f32.mrb[20].mxu1 }
 0x641   : >> { %v1375_v60 = vmul.f32 0.35355338, %v1369_v23  ;;  %v4308_v61 = vpop.f32.mrb[21].mxu1  ;;  %v4656_v23 = vld [vmem:[%s5902_s6 + $0x10] sm:$0xff]  }
 0x642   : >> { %v1372_v62 = vpop.f32.mrb[22].mxu1  ;;  %v1706_v61 = vpack.c.bf16 %v4880_v3, %v4888_v1 }
 0x643   : >> { %v1376_v63 = vadd.f32 %v5077_v0, %v1375_v60  ;;  %v4309_v4 = vpop.f32.mrb[23].mxu1  ;;  %v4657_v60 = vld [vmem:[%s5902_s6 + $0x18] sm:$0xff]   ;;  %v4660_v62 = vld [vmem:[%s5843_s12 + $0x10] sm:$0xff]  }
 0x644   : >> { %v3964_v4 = vld [vmem:[%s5842_s11] ss:$0 sm:$0xff] }
 0x645   : >> { %v1377_v6 = vsel %vm898_vm3, %v1376_v63, -inf }
 0x646   : >> { %1378 = vmax.xlane.f32.xlu1 %v1377_v6 }
 0x6d3   : >> { %v1379_v7 = vpop.xlane.xlu1 %1378 }
 0x6d4   : >> { %v1380_v8 = vsub.f32 %v1376_v63, %v1379_v7  ;;  %v4661_v63 = vld [vmem:[%s5843_s12 + $0x18] sm:$0xff]  }
 0x6d6   : >> { %v1381_v9 = vmul.f32 1.442695, %v1380_v8 }
 0x6d8   : >> { %4690 = vpow2.f32 %v1381_v9 }
 0x6e2   : >> { %v4691_v10 = vpop.eup %4690 }
 0x6e3   : >> { %v1383_v11 = vsel %vm898_vm3, %v4691_v10, 0.0  ;;  %v1387_v12 = vpack.c.bf16 %v4691_v10, %v4691_v10 }
 0x6e4   : >> { %1384 = vadd.xlane.f32.xlu1 %v1383_v11 }
 0x6e5   : >> { %4313 = vmatmul.mubr.msk.bf16.vlgmr.msra.gmra.mrb[24].mxu0 %vm898_vm3, %v1387_v12 }
 0x6e6   : >> { %4326 = vmatprep.mubr.msk.bf16.mxu0 %vm4895_vm0, %v4894_v5  ;;  %4323 = vmatpush3.bf16.msra.mxu0 %v4652_v43 }
 0x6e7   : >> { %4324 = vmatprep.subr.bf16.mxu0 %v4894_v5 }
 0x6ea   : >> { %4325 = vmatpush3.bf16.msra.mxu0 %v4653_v44 }
 0x6eb   : >> { %4342 = vmatprep.subr.bf16.mxu0 %v4894_v5 }
 0x710   : >> { %v1318_v15 = vpop.f32.mrb[20].mxu0 }
 0x711   : >> { %v1324_v16 = vadd.f32 %v1318_v15, %v5205_v29  ;;  %v4302_v17 = vpop.f32.mrb[21].mxu0  ;;  %v3961_v29 = vld [vmem:[%s5840_s9] ss:$0 sm:$0xff] }
 0x712   : >> { %v1321_v18 = vpop.f32.mrb[22].mxu0  ;;  %v3990_v17 = vld [vmem:[%s5905_s7 + $0x1] ss:$0 sm:$0xff] }
 0x713   : >> { %v4303_v19 = vpop.f32.mrb[23].mxu0 }
 0x771   : >> { %v1385_v20 = vpop.xlane.xlu1 %1384 }
 0x772   : >> { %4692 = vrcp.f32 %v1385_v20  ;;  %v3981_v20 = vld [vmem:[%s5906_s5 + $0x1] ss:$0 sm:$0xff] }
 0x77c   : >> { %v4693_v21 = vpop.eup %4692 }
 0x7b8   : >> { %v1428_v22 = vpop.f32.mrb[24].mxu0 }
 0x7b9   : >> { %v1434_v24 = vmul.f32 %v4693_v21, %v1428_v22  ;;  %v4314_v25 = vpop.f32.mrb[25].mxu0 }
 0x7ba   : >> { %v1431_v26 = vpop.f32.mrb[26].mxu0 }
 0x7bb   : >> { %v1435_v27 = vpack.c.bf16 %v1434_v24, %v1434_v24  ;;  %v4315_v28 = vpop.f32.mrb[27].mxu0 }
 0x7bd   : >> { %4319 = vmatmul.mubr.msk.bf16.vlgmr.msra.gmra.mrb[24].mxu1 %vm843_vm2, %v1435_v27 }
 0x7be   : >> { %4338 = vmatprep.mubr.msk.bf16.mxu1 %vm4895_vm0, %v4894_v5  ;;  %4331 = vmatpush3.bf16.msra.mxu1 %v4658_v45 }
 0x7bf   : >> { %4332 = vmatprep.subr.bf16.mxu1 %v4894_v5 }
 0x7c2   : >> { %4333 = vmatpush3.bf16.msra.mxu1 %v4659_v46 }
 0x7c3   : >> { %4334 = vmatprep.subr.bf16.mxu1 %v4894_v5 }
 0x7c6   : >> { %4335 = vmatpush3.bf16.msra.mxu1 %v4660_v62  ;;  %v3996_v62 = vld [vmem:[%s5839_s8 + $0x10] sm:$0xf] }
 0x7c7   : >> { %4336 = vmatprep.subr.bf16.mxu1 %v4894_v5 }
 0x7ca   : >> { %4337 = vmatpush3.bf16.msra.mxu1 %v4661_v63 }
 0x7cb   : >> { %4358 = vmatprep.subr.bf16.mxu1 %v4894_v5 }
 0x890   : >> { %v1477_v30 = vpop.f32.mrb[24].mxu1 }
 0x891   : >> { %v1483_v31 = vadd.f32 %v1477_v30, %v1324_v16  ;;  %v4320_v32 = vpop.f32.mrb[25].mxu1 }
 0x892   : >> { %v1480_v33 = vpop.f32.mrb[26].mxu1 }
 0x893   : >> { %v1491_v34 = vadd.f32 %v3961_v29, %v1483_v31  ;;  %v4321_v35 = vpop.f32.mrb[27].mxu1 }
 0x895   : >> { %v1492_v36 = vadd.f32 %v4888_v1, %v1491_v34 }
 0x897   : >> { %v1495_v37 = vsel %vm730_vm1, %v1492_v36, 0.0 }
 0x898   : >> { %1496 = vadd.xlane.f32.xlu0 %v1495_v37 }
 0x925   : >> { %v1497_v38 = vpop.xlane.xlu0 %1496 }
 0x926   : >> { %v1499_v39 = vmul.f32 0.03125, %v1497_v38 }
 0x928   : >> { %v1500_v40 = vsub.f32 %v1492_v36, %v1499_v39 }
 0x92a   : >> { %v1501_v41 = vmul.f32 %v1500_v40, %v1500_v40 }
 0x92c   : >> { %v1502_v42 = vsel %vm730_vm1, %v1501_v41, 0.0 }
 0x92d   : >> { %1503 = vadd.xlane.f32.xlu1 %v1502_v42 }
 0x9ba   : >> { %v1504_v47 = vpop.xlane.xlu1 %1503 }
 0x9bb   : >> { %v1505_v48 = vmul.f32 0.03125, %v1504_v47 }
 0x9bd   : >> { %v1506_v49 = vadd.f32 1e-05, %v1505_v48 }
 0x9bf   : >> { %4694 = vrsqrt.f32 %v1506_v49 }
 0x9c9   : >> { %v4695_v50 = vpop.eup %4694 }
 0x9ca   : >> { %v1508_v52 = vmul.f32 %v4695_v50, %v1500_v40 }
 0x9cc   : >> { %v1515_v54 = vmul.f32 %v3962_v51, %v1508_v52 }
 0x9ce   : >> { %v5274_v55 = vadd.f32 %v3963_v53, %v1515_v54 }
 0x9d0   : >> { %v1523_v57 = vpack.c.bf16 %v5274_v55, %v5274_v55 }
 0x9d2   : >> { %4327 = vmatmul.mubr.msk.bf16.vlgmr.msra.gmra.mrb[28].mxu0 %vm730_vm1, %v1523_v57 }
 0x9d3   : >> { %4343 = vmatpush3.bf16.msra.mxu0 %v4654_v56  ;;  %4346 = vmatprep.mubr.msk.bf16.mxu0 %vm4895_vm0, %v4894_v5 }
 0x9d4   : >> { %4344 = vmatprep.subr.bf16.mxu0 %v4894_v5 }
 0x9d7   : >> { %4345 = vmatpush3.bf16.msra.mxu0 %v4655_v58 }
 0x9d8   : >> { %4350 = vmatprep.subr.bf16.mxu0 %v4894_v5 }
 0x9da   : >> { %4347 = vmatmul.mubr.msk.bf16.vlgmr.msra.gmra.mrb[32].mxu0 %vm730_vm1, %v1705_v59 }
 0x9db   : >> { %4351 = vmatpush3.bf16.msra.mxu0 %v4656_v23  ;;  %4354 = vmatprep.mubr.msk.bf16.mxu0 %vm4895_vm0, %v4894_v5 }
 0x9dc   : >> { %4352 = vmatprep.subr.bf16.mxu0 %v4894_v5 }
 0x9df   : >> { %4353 = vmatpush3.bf16.msra.mxu0 %v4657_v60 }
 0x9e0   : >> { %4364 = vmatprep.subr.bf16.mxu0 %v4894_v5 }
 0x9e2   : >> { %4355 = vmatmul.mubr.msk.bf16.vlgmr.msra.gmra.mrb[36].mxu0 %vm730_vm1, %v1706_v61 }
 0x9e3   : >> { %4366 = vmatprep.mubr.msk.bf16.mxu0 %vm4895_vm0, %v4894_v5 }
 0xaa5   : >> { %v1584_v6 = vpop.f32.mrb[28].mxu0 }
 0xaa6   : >> { %v1585_v7 = vadd.f32 %v3964_v4, %v1584_v6  ;;  %v4328_v8 = vpop.f32.mrb[29].mxu0 }
 0xaa7   : >> { %v1587_v9 = vpop.f32.mrb[30].mxu0  ;;  %v3999_v8 = vld [vmem:[%s5839_s8 + $0x14] sm:$0xf] }
 0xaa8   : >> { %v1590_v10 = vmax.f32 %v1585_v7, 0.0  ;;  %v4329_v11 = vpop.f32.mrb[31].mxu0  ;;  %v2119_v7 = vsel %vm1076_vm4, %v3996_v62, 0  ;;  %v2073_v9 = vsel %vm1076_vm4, %v3999_v8, 0 }
 0xaaa   : >> { %v1591_v12 = vpack.c.bf16 %v1590_v10, %v1590_v10 }
 0xaac   : >> { %4339 = vmatmul.mubr.msk.bf16.vlgmr.msra.gmra.mrb[28].mxu1 %vm1631_vm5, %v1591_v12 }
 0xaad   : >> { %v1769_v13 = vpop.f32.mrb[32].mxu0  ;;  %4360 = vmatprep.mubr.msk.bf16.mxu1 %vm4895_vm0, %v4894_v5 }
 0xaae   : >> { %v4348_v14 = vpop.f32.mrb[33].mxu0  ;;  %v1770_v26 = vadd.f32 %v3981_v20, %v1769_v13 }
 0xaaf   : >> { %v1772_v15 = vpop.f32.mrb[34].mxu0 }
 0xab0   : >> { %v4349_v16 = vpop.f32.mrb[35].mxu0  ;;  %v1844_v30 = vpack.c.bf16 %v1770_v26, %v1770_v26 }
 0xab5   : >> { %v1837_v18 = vpop.f32.mrb[36].mxu0 }
 0xab6   : >> { %v4356_v19 = vpop.f32.mrb[37].mxu0  ;;  %v1838_v22 = vadd.f32 %v3990_v17, %v1837_v18 }
 0xab7   : >> { %v1840_v21 = vpop.f32.mrb[38].mxu0 }
 0xab8   : >> { %v1841_v24 = vadd.f32 %v3990_v17, %v1840_v21  ;;  %v4357_v25 = vpop.f32.mrb[39].mxu0 }
 0xaba   : >> { %v5327_v27 = vpack.c.bf16 %v1841_v24, %v1838_v22 }
 0xabc   : >> { %1906 = vrot.lane.b32.xlu0 %v5327_v27, %s4897_s16  ;;  %1959 = vrot.lane.b32.xlu1 %v5327_v27, %s4896_s27  ;;  %v1850_v28 = vsel %vm843_vm2, %v5327_v27, 0 }
 0xabd   : >> { %4359 = vmatpush3.bf16.xpose.msra.mxu1 %v1850_v28 }
 0xabe   : >> { %4370 = vmatprep.subr.bf16.mxu1 %v4894_v5 }
 0xac0   : >> { %1957 = vrot.lane.b32.xlu1 %v1844_v30, %s4896_s27 }
 0xac4   : >> { %4361 = vmatmul.mubr.msk.bf16.vlgmr.msra.gmra.mrb[32].mxu1 %vm843_vm2, %v1844_v30 }
 0xac5   : >> { %4372 = vmatprep.mubr.msk.bf16.mxu1 %vm4895_vm0, %v4894_v5 }
 0xb2e   : >> { %v1907_v29 = vpop.permute.xlu0 %1906  ;;  %v1960_v31 = vpop.permute.xlu1 %1959 }
 0xb2f   : >> { %v1965_v32 = vsel %vm843_vm2, %v1960_v31, 0  ;;  %4365 = vmatpush3.bf16.msra.mxu0 %v1907_v29 }
 0xb30   : >> { %4371 = vmatpush3.bf16.xpose.msra.mxu1 %v1965_v32  ;;  %4376 = vmatprep.subr.bf16.mxu0 %v4894_v5 }
 0xb31   : >> { %4382 = vmatprep.subr.bf16.mxu1 %v4894_v5 }
 0xb32   : >> { %v1958_v33 = vpop.permute.xlu1 %1957 }
 0xb37   : >> { %4373 = vmatmul.mubr.msk.bf16.vlgmr.msra.gmra.mrb[36].mxu1 %vm843_vm2, %v1958_v33 }
 0xb38   : >> { %4384 = vmatprep.mubr.msk.bf16.mxu1 %vm4895_vm0, %v4894_v5  ;;  %4383 = vmatpush3.bf16.msra.mxu1 %v2073_v9 }
 0xb39   : >> { %4394 = vmatprep.subr.bf16.mxu1 %v4894_v5 }
 0xb7f   : >> { %v5346_v34 = vpop.f32.mrb[28].mxu1 }
 0xb80   : >> { %v4340_v35 = vpop.f32.mrb[29].mxu1 }
 0xb81   : >> { %v1672_v36 = vpop.f32.mrb[30].mxu1 }
 0xb82   : >> { %v4341_v37 = vpop.f32.mrb[31].mxu1 }
 0xb97   : >> { %v1886_v38 = vpop.f32.mrb[32].mxu1 }
 0xb98   : >> { %v1892_v39 = vmul.f32 0.35355338, %v1886_v38  ;;  %v4362_v40 = vpop.f32.mrb[33].mxu1 }
 0xb99   : >> { %v1889_v41 = vpop.f32.mrb[34].mxu1 }
 0xb9a   : >> { %v1893_v42 = vadd.f32 %v5077_v0, %v1892_v39  ;;  %v4363_v43 = vpop.f32.mrb[35].mxu1 }
 0xb9c   : >> { %v1894_v44 = vsel %vm898_vm3, %v1893_v42, -inf }
 0xb9d   : >> { %1895 = vmax.xlane.f32.xlu1 %v1894_v44 }
 0xbae   : >> { %2163 = vrot.lane.b32.xlu1 %v5327_v27, %s4899_s19 }
 0xbb2   : >> { %2161 = vrot.lane.b32.xlu1 %v1844_v30, %s4899_s19 }
 0xc0a   : >> { %v2001_v45 = vpop.f32.mrb[36].mxu1 }
 0xc0b   : >> { %v2007_v46 = vmul.f32 0.35355338, %v2001_v45  ;;  %v4374_v47 = vpop.f32.mrb[37].mxu1 }
 0xc0c   : >> { %v2004_v48 = vpop.f32.mrb[38].mxu1 }
 0xc0d   : >> { %v2008_v49 = vadd.f32 %v5077_v0, %v2007_v46  ;;  %v4375_v50 = vpop.f32.mrb[39].mxu1 }
 0xc0f   : >> { %v2009_v51 = vsel %vm898_vm3, %v2008_v49, -inf }
 0xc10   : >> { %2010 = vmax.xlane.f32.xlu0 %v2009_v51 }
 0xc26   : >> { %2020 = vrot.lane.b32.xlu0 %v5327_v27, %s4898_s17 }
 0xc2a   : >> { %v1896_v52 = vpop.xlane.xlu1 %1895 }
 0xc2b   : >> { %v1897_v53 = vsub.f32 %v1893_v42, %v1896_v52 }
 0xc2d   : >> { %v1898_v54 = vmul.f32 1.442695, %v1897_v53 }
 0xc2e   : >> { %v2164_v10 = vpop.permute.xlu1 %2163 }
 0xc2f   : >> { %4696 = vpow2.f32 %v1898_v54  ;;  %v2169_v31 = vsel %vm843_vm2, %v2164_v10, 0 }
 0xc32   : >> { %v2162_v11 = vpop.permute.xlu1 %2161 }
 0xc39   : >> { %v4697_v56 = vpop.eup %4696 }
 0xc3a   : >> { %v1900_v57 = vsel %vm898_vm3, %v4697_v56, 0.0  ;;  %v1904_v58 = vpack.c.bf16 %v4697_v56, %v4697_v56 }
 0xc3b   : >> { %1901 = vadd.xlane.f32.xlu1 %v1900_v57 }
 0xc3c   : >> { %4367 = vmatmul.mubr.msk.bf16.vlgmr.msra.gmra.mrb[40].mxu0 %vm898_vm3, %v1904_v58 }
 0xc3d   : >> { %4378 = vmatprep.mubr.msk.bf16.mxu0 %vm4895_vm0, %v4894_v5 }
 0xc4c   : >> { %2320 = vrot.lane.b32.xlu1 %v1844_v30, %s4900_s20 }
 0xc9d   : >> { %v2011_v59 = vpop.xlane.xlu0 %2010 }
 0xc9e   : >> { %v2012_v23 = vsub.f32 %v2008_v49, %v2011_v59  ;;  %v4004_v59 = vld [vmem:[%s5839_s8 + $0x18] sm:$0xf] }
 0xca0   : >> { %v2013_v60 = vmul.f32 1.442695, %v2012_v23  ;;  %v2277_v23 = vsel %vm1076_vm4, %v4004_v59, 0 }
 0xca1   : >> { %v2021_v61 = vpop.permute.xlu0 %2020 }
 0xca2   : >> { %4698 = vpow2.f32 %v2013_v60  ;;  %4377 = vmatpush3.bf16.msra.mxu0 %v2021_v61 }
 0xca3   : >> { %4388 = vmatprep.subr.bf16.mxu0 %v4894_v5 }
 0xcac   : >> { %v4699_v63 = vpop.eup %4698 }
 0xcad   : >> { %v2015_v4 = vsel %vm898_vm3, %v4699_v63, 0.0  ;;  %v2019_v6 = vpack.c.bf16 %v4699_v63, %v4699_v63 }
 0xcae   : >> { %2016 = vadd.xlane.f32.xlu0 %v2015_v4 }
 0xcaf   : >> { %4379 = vmatmul.mubr.msk.bf16.vlgmr.msra.gmra.mrb[44].mxu0 %vm898_vm3, %v2019_v6 }
 0xcb0   : >> { %4389 = vmatpush3.bf16.msra.mxu0 %v2119_v7  ;;  %4390 = vmatprep.mubr.msk.bf16.mxu0 %vm4895_vm0, %v4894_v5 }
 0xcb1   : >> { %4400 = vmatprep.subr.bf16.mxu0 %v4894_v5 }
 0xcc4   : >> { %2224 = vrot.lane.b32.xlu0 %v5327_v27, %s4901_s4 }
 0xcc8   : >> { %v1902_v12 = vpop.xlane.xlu1 %1901 }
 0xcc9   : >> { %4700 = vrcp.f32 %v1902_v12 }
 0xccc   : >> { %v2321_v58 = vpop.permute.xlu1 %2320 }
 0xcd3   : >> { %v4701_v13 = vpop.eup %4700 }
 0xd0f   : >> { %v1946_v14 = vpop.f32.mrb[40].mxu0 }
 0xd10   : >> { %v1952_v15 = vmul.f32 %v4701_v13, %v1946_v14  ;;  %v4368_v16 = vpop.f32.mrb[41].mxu0 }
 0xd11   : >> { %v1949_v17 = vpop.f32.mrb[42].mxu0 }
 0xd12   : >> { %v1953_v18 = vpack.c.bf16 %v1952_v15, %v1952_v15  ;;  %v4369_v19 = vpop.f32.mrb[43].mxu0 }
 0xd14   : >> { %4391 = vmatmul.mubr.msk.bf16.vlgmr.msra.gmra.mrb[48].mxu0 %vm843_vm2, %v1953_v18 }
 0xd15   : >> { %4402 = vmatprep.mubr.msk.bf16.mxu0 %vm4895_vm0, %v4894_v5 }
 0xd3b   : >> { %v2017_v20 = vpop.xlane.xlu0 %2016 }
 0xd3c   : >> { %4702 = vrcp.f32 %v2017_v20 }
 0xd3f   : >> { %v2225_v21 = vpop.permute.xlu0 %2224 }
 0xd40   : >> { %4401 = vmatpush3.bf16.msra.mxu0 %v2225_v21 }
 0xd41   : >> { %4412 = vmatprep.subr.bf16.mxu0 %v4894_v5 }
 0xd46   : >> { %v4703_v22 = vpop.eup %4702 }
 0xd82   : >> { %v2060_v24 = vpop.f32.mrb[44].mxu0 }
 0xd83   : >> { %v2066_v25 = vmul.f32 %v4703_v22, %v2060_v24  ;;  %v4380_v26 = vpop.f32.mrb[45].mxu0  ;;  %v4008_v22 = vld [vmem:[%s5839_s8 + $0x1c] sm:$0xf] }
 0xd84   : >> { %v2063_v28 = vpop.f32.mrb[46].mxu0  ;;  %v2436_v24 = vsel %vm1076_vm4, %v4008_v22, 0 }
 0xd85   : >> { %v2067_v30 = vpack.c.bf16 %v2066_v25, %v2066_v25  ;;  %v4381_v29 = vpop.f32.mrb[47].mxu0 }
 0xd87   : >> { %4385 = vmatmul.mubr.msk.bf16.vlgmr.msra.gmra.mrb[40].mxu1 %vm843_vm2, %v2067_v30 }
 0xd88   : >> { %4395 = vmatpush3.bf16.xpose.msra.mxu1 %v2169_v31  ;;  %4396 = vmatprep.mubr.msk.bf16.mxu1 %vm4895_vm0, %v4894_v5 }
 0xd89   : >> { %4406 = vmatprep.subr.bf16.mxu1 %v4894_v5 }
 0xd8f   : >> { %4397 = vmatmul.mubr.msk.bf16.vlgmr.msra.gmra.mrb[44].mxu1 %vm843_vm2, %v2162_v11 }
 0xd90   : >> { %4408 = vmatprep.mubr.msk.bf16.mxu1 %vm4895_vm0, %v4894_v5  ;;  %4407 = vmatpush3.bf16.msra.mxu1 %v2277_v23 }
 0xd91   : >> { %4418 = vmatprep.subr.bf16.mxu1 %v4894_v5 }
 0xde7   : >> { %v2155_v32 = vpop.f32.mrb[48].mxu0 }
 0xde8   : >> { %v4392_v33 = vpop.f32.mrb[49].mxu0 }
 0xde9   : >> { %v2158_v35 = vpop.f32.mrb[50].mxu0 }
 0xdea   : >> { %v4393_v36 = vpop.f32.mrb[51].mxu0 }
 0xe5a   : >> { %v2109_v37 = vpop.f32.mrb[40].mxu1 }
 0xe5b   : >> { %v5391_v38 = vadd.f32 %v2155_v32, %v2109_v37  ;;  %v4386_v39 = vpop.f32.mrb[41].mxu1 }
 0xe5c   : >> { %v2112_v40 = vpop.f32.mrb[42].mxu1 }
 0xe5d   : >> { %v4387_v41 = vpop.f32.mrb[43].mxu1 }
 0xe62   : >> { %v2205_v42 = vpop.f32.mrb[44].mxu1 }
 0xe63   : >> { %v2211_v43 = vmul.f32 0.35355338, %v2205_v42  ;;  %v4398_v44 = vpop.f32.mrb[45].mxu1 }
 0xe64   : >> { %v2208_v45 = vpop.f32.mrb[46].mxu1 }
 0xe65   : >> { %v2212_v46 = vadd.f32 %v5077_v0, %v2211_v43  ;;  %v4399_v47 = vpop.f32.mrb[47].mxu1 }
 0xe67   : >> { %v2213_v48 = vsel %vm898_vm3, %v2212_v46, -inf }
 0xe68   : >> { %2214 = vmax.xlane.f32.xlu0 %v2213_v48 }
 0xe7e   : >> { %2322 = vrot.lane.b32.xlu0 %v5327_v27, %s4900_s20 }
 0xef5   : >> { %v2215_v49 = vpop.xlane.xlu0 %2214 }
 0xef6   : >> { %v2216_v50 = vsub.f32 %v2212_v46, %v2215_v49 }
 0xef8   : >> { %v2217_v51 = vmul.f32 1.442695, %v2216_v50 }
 0xef9   : >> { %v2323_v53 = vpop.permute.xlu0 %2322 }
 0xefa   : >> { %4704 = vpow2.f32 %v2217_v51  ;;  %v2328_v57 = vsel %vm843_vm2, %v2323_v53, 0 }
 0xf04   : >> { %v4705_v52 = vpop.eup %4704 }
 0xf05   : >> { %v2219_v54 = vsel %vm898_vm3, %v4705_v52, 0.0  ;;  %v2223_v56 = vpack.c.bf16 %v4705_v52, %v4705_v52 }
 0xf06   : >> { %2220 = vadd.xlane.f32.xlu0 %v2219_v54  ;;  %v4662_v54 = vld [vmem:[%s5841_s10 + $0x10] sm:$0xff]  }
 0xf07   : >> { %4403 = vmatmul.mubr.msk.bf16.vlgmr.msra.gmra.mrb[52].mxu0 %vm898_vm3, %v2223_v56  ;;  %v4663_v56 = vld [vmem:[%s5841_s10 + $0x18] sm:$0xff]  }
 0xf08   : >> { %4413 = vmatpush3.bf16.xpose.msra.mxu0 %v2328_v57  ;;  %4414 = vmatprep.mubr.msk.bf16.mxu0 %vm4895_vm0, %v4894_v5  ;;  %v4668_v57 = vld [vmem:[%s5843_s12 + $0x20] sm:$0xff]  }
 0xf09   : >> { %4424 = vmatprep.subr.bf16.mxu0 %v4894_v5 }
 0xf0f   : >> { %4415 = vmatmul.mubr.msk.bf16.vlgmr.msra.gmra.mrb[56].mxu0 %vm843_vm2, %v2321_v58  ;;  %v4669_v58 = vld [vmem:[%s5843_s12 + $0x28] sm:$0xff]  }
 0xf10   : >> { %4426 = vmatprep.mubr.msk.bf16.mxu0 %vm4895_vm0, %v4894_v5  ;;  %4425 = vmatpush3.bf16.msra.mxu0 %v2436_v24 }
 0xf11   : >> { %4438 = vmatprep.subr.bf16.mxu0 %v4894_v5 }
 0xf1c   : >> { %2383 = vrot.lane.b32.xlu0 %v5327_v27, %s4902_s29 }
 0xf93   : >> { %v2221_v60 = vpop.xlane.xlu0 %2220 }
 0xf94   : >> { %4706 = vrcp.f32 %v2221_v60 }
 0xf97   : >> { %v2384_v9 = vpop.permute.xlu0 %2383 }
 0xf9e   : >> { %v4707_v61 = vpop.eup %4706 }
 0xfda   : >> { %v2264_v62 = vpop.f32.mrb[52].mxu0 }
 0xfdb   : >> { %v2270_v63 = vmul.f32 %v4707_v61, %v2264_v62  ;;  %v4404_v4 = vpop.f32.mrb[53].mxu0  ;;  %v4014_v62 = vld [vmem:[%s5845_s14 + $0x1] ss:$0 sm:$0xff] }
 0xfdc   : >> { %v2267_v6 = vpop.f32.mrb[54].mxu0  ;;  %v4015_v4 = vld [vmem:[%s5846_s15 + $0x1] ss:$0 sm:$0xff] }
 0xfdd   : >> { %v2271_v7 = vpack.c.bf16 %v2270_v63, %v2270_v63  ;;  %v4405_v8 = vpop.f32.mrb[55].mxu0 }
 0xfde   : >> { %v4664_v8 = vld [vmem:[%s5904_s3 + $0x20] sm:$0xff]  }
 0xfdf   : >> { %4409 = vmatmul.mubr.msk.bf16.vlgmr.msra.gmra.mrb[48].mxu1 %vm843_vm2, %v2271_v7 }
 0xfe0   : >> { %4419 = vmatpush3.bf16.msra.mxu1 %v2384_v9  ;;  %4420 = vmatprep.mubr.msk.bf16.mxu1 %vm4895_vm0, %v4894_v5 }
 0xfe1   : >> { %4430 = vmatprep.subr.bf16.mxu1 %v4894_v5 }
 0xfe2   : >> { %v2364_v27 = vpop.f32.mrb[56].mxu0 }
 0xfe3   : >> { %v2370_v10 = vmul.f32 0.35355338, %v2364_v27  ;;  %v4416_v11 = vpop.f32.mrb[57].mxu0  ;;  %v4665_v27 = vld [vmem:[%s5904_s3 + $0x28] sm:$0xff]  }
 0xfe4   : >> { %v2367_v12 = vpop.f32.mrb[58].mxu0  ;;  %v4666_v11 = vld [vmem:[%s5902_s6 + $0x20] sm:$0xff]  }
 0xfe5   : >> { %v2371_v13 = vadd.f32 %v5077_v0, %v2370_v10  ;;  %v4417_v14 = vpop.f32.mrb[59].mxu0  ;;  %v2707_v10 = vpack.c.bf16 %v4880_v3, %v4880_v3  ;;  %v4667_v12 = vld [vmem:[%s5902_s6 + $0x28] sm:$0xff]  }
 0xfe6   : >> { %v4670_v14 = vld [vmem:[%s5843_s12 + $0x30] sm:$0xff]  }
 0xfe7   : >> { %v2372_v15 = vsel %vm898_vm3, %v2371_v13, -inf }
 0xfe8   : >> { %2373 = vmax.xlane.f32.xlu1 %v2372_v15  ;;  %v4671_v15 = vld [vmem:[%s5843_s12 + $0x38] sm:$0xff]  }
0x1075   : >> { %v2374_v16 = vpop.xlane.xlu1 %2373 }
0x1076   : >> { %v2375_v17 = vsub.f32 %v2371_v13, %v2374_v16  ;;  %v2708_v13 = vpack.c.bf16 %v4884_v2, %v4888_v1  ;;  %v4021_v1 = vld [vmem:[%s5842_s11 + $0x1] ss:$0 sm:$0xff] }
0x1078   : >> { %v2376_v18 = vmul.f32 1.442695, %v2375_v17 }
0x107a   : >> { %4708 = vpow2.f32 %v2376_v18 }
0x1084   : >> { %v4709_v19 = vpop.eup %4708 }
0x1085   : >> { %v2378_v20 = vsel %vm898_vm3, %v4709_v19, 0.0  ;;  %v2382_v21 = vpack.c.bf16 %v4709_v19, %v4709_v19 }
0x1086   : >> { %2379 = vadd.xlane.f32.xlu1 %v2378_v20 }
0x1087   : >> { %4421 = vmatmul.mubr.msk.bf16.vlgmr.msra.gmra.mrb[52].mxu1 %vm898_vm3, %v2382_v21 }
0x1088   : >> { %4434 = vmatprep.mubr.msk.bf16.mxu1 %vm4895_vm0, %v4894_v5  ;;  %4431 = vmatpush3.bf16.msra.mxu1 %v4662_v54 }
0x1089   : >> { %4432 = vmatprep.subr.bf16.mxu1 %v4894_v5 }
0x108c   : >> { %4433 = vmatpush3.bf16.msra.mxu1 %v4663_v56 }
0x108d   : >> { %4450 = vmatprep.subr.bf16.mxu1 %v4894_v5 }
0x10b2   : >> { %v2313_v25 = vpop.f32.mrb[48].mxu1 }
0x10b3   : >> { %v2319_v26 = vadd.f32 %v2313_v25, %v5391_v38  ;;  %v4410_v28 = vpop.f32.mrb[49].mxu1  ;;  %v4011_v38 = vld [vmem:[%s5840_s9 + $0x1] ss:$0 sm:$0xff] }
0x10b4   : >> { %v2316_v30 = vpop.f32.mrb[50].mxu1  ;;  %v4058_v28 = vld [vmem:[%s5905_s7 + $0x2] ss:$0 sm:$0xff] }
0x10b5   : >> { %v4411_v29 = vpop.f32.mrb[51].mxu1 }
0x1113   : >> { %v2380_v31 = vpop.xlane.xlu1 %2379 }
0x1114   : >> { %4710 = vrcp.f32 %v2380_v31  ;;  %v4049_v31 = vld [vmem:[%s5906_s5 + $0x2] ss:$0 sm:$0xff] }
0x111e   : >> { %v4711_v32 = vpop.eup %4710 }
0x115a   : >> { %v2423_v33 = vpop.f32.mrb[52].mxu1 }
0x115b   : >> { %v2429_v35 = vmul.f32 %v4711_v32, %v2423_v33  ;;  %v4422_v36 = vpop.f32.mrb[53].mxu1 }
0x115c   : >> { %v2426_v37 = vpop.f32.mrb[54].mxu1 }
0x115d   : >> { %v2430_v39 = vpack.c.bf16 %v2429_v35, %v2429_v35  ;;  %v4423_v40 = vpop.f32.mrb[55].mxu1 }
0x115f   : >> { %4427 = vmatmul.mubr.msk.bf16.vlgmr.msra.gmra.mrb[60].mxu0 %vm843_vm2, %v2430_v39 }
0x1160   : >> { %4446 = vmatprep.mubr.msk.bf16.mxu0 %vm4895_vm0, %v4894_v5  ;;  %4439 = vmatpush3.bf16.msra.mxu0 %v4668_v57 }
0x1161   : >> { %4440 = vmatprep.subr.bf16.mxu0 %v4894_v5 }
0x1164   : >> { %4441 = vmatpush3.bf16.msra.mxu0 %v4669_v58 }
0x1165   : >> { %4442 = vmatprep.subr.bf16.mxu0 %v4894_v5 }
0x1168   : >> { %4443 = vmatpush3.bf16.msra.mxu0 %v4670_v14  ;;  %v4064_v14 = vld [vmem:[%s5839_s8 + $0x20] sm:$0xf] }
0x1169   : >> { %4444 = vmatprep.subr.bf16.mxu0 %v4894_v5 }
0x116c   : >> { %4445 = vmatpush3.bf16.msra.mxu0 %v4671_v15 }
0x116d   : >> { %4466 = vmatprep.subr.bf16.mxu0 %v4894_v5 }
0x1232   : >> { %v2472_v41 = vpop.f32.mrb[60].mxu0 }
0x1233   : >> { %v2478_v42 = vadd.f32 %v2472_v41, %v2319_v26  ;;  %v4428_v43 = vpop.f32.mrb[61].mxu0 }
0x1234   : >> { %v2475_v44 = vpop.f32.mrb[62].mxu0 }
0x1235   : >> { %v2487_v45 = vadd.f32 %v4011_v38, %v2478_v42  ;;  %v4429_v46 = vpop.f32.mrb[63].mxu0 }
0x1237   : >> { %v2488_v47 = vadd.f32 %v4884_v2, %v2487_v45 }
0x1239   : >> { %v2493_v48 = vsel %vm730_vm1, %v2488_v47, 0.0 }
0x123a   : >> { %2494 = vadd.xlane.f32.xlu0 %v2493_v48 }
0x12c7   : >> { %v2495_v49 = vpop.xlane.xlu0 %2494 }
0x12c8   : >> { %v2496_v50 = vmul.f32 0.03125, %v2495_v49 }
0x12ca   : >> { %v2497_v51 = vsub.f32 %v2488_v47, %v2496_v50 }
0x12cc   : >> { %v2498_v52 = vmul.f32 %v2497_v51, %v2497_v51 }
0x12ce   : >> { %v2499_v53 = vsel %vm730_vm1, %v2498_v52, 0.0 }
0x12cf   : >> { %2500 = vadd.xlane.f32.xlu1 %v2499_v53 }
0x135c   : >> { %v2501_v59 = vpop.xlane.xlu1 %2500 }
0x135d   : >> { %v2502_v23 = vmul.f32 0.03125, %v2501_v59 }
0x135f   : >> { %v2503_v60 = vadd.f32 1e-05, %v2502_v23 }
0x1361   : >> { %4712 = vrsqrt.f32 %v2503_v60 }
0x136b   : >> { %v4713_v61 = vpop.eup %4712 }
0x136c   : >> { %v2505_v63 = vmul.f32 %v4713_v61, %v2497_v51 }
0x136e   : >> { %v2512_v6 = vmul.f32 %v4014_v62, %v2505_v63 }
0x1370   : >> { %v5460_v7 = vadd.f32 %v4015_v4, %v2512_v6 }
0x1372   : >> { %v2520_v9 = vpack.c.bf16 %v5460_v7, %v5460_v7 }
0x1374   : >> { %4435 = vmatmul.mubr.msk.bf16.vlgmr.msra.gmra.mrb[56].mxu1 %vm730_vm1, %v2520_v9 }
0x1375   : >> { %4451 = vmatpush3.bf16.msra.mxu1 %v4664_v8  ;;  %4454 = vmatprep.mubr.msk.bf16.mxu1 %vm4895_vm0, %v4894_v5 }
0x1376   : >> { %4452 = vmatprep.subr.bf16.mxu1 %v4894_v5 }
0x1379   : >> { %4453 = vmatpush3.bf16.msra.mxu1 %v4665_v27 }
0x137a   : >> { %4458 = vmatprep.subr.bf16.mxu1 %v4894_v5 }
0x137c   : >> { %4455 = vmatmul.mubr.msk.bf16.vlgmr.msra.gmra.mrb[60].mxu1 %vm730_vm1, %v2707_v10 }
0x137d   : >> { %4459 = vmatpush3.bf16.msra.mxu1 %v4666_v11  ;;  %4462 = vmatprep.mubr.msk.bf16.mxu1 %vm4895_vm0, %v4894_v5 }
0x137e   : >> { %4460 = vmatprep.subr.bf16.mxu1 %v4894_v5 }
0x1381   : >> { %4461 = vmatpush3.bf16.msra.mxu1 %v4667_v12 }
0x1382   : >> { %4472 = vmatprep.subr.bf16.mxu1 %v4894_v5 }
0x1384   : >> { %4463 = vmatmul.mubr.msk.bf16.vlgmr.msra.gmra.mrb[64].mxu1 %vm730_vm1, %v2708_v13 }
0x1385   : >> { %4474 = vmatprep.mubr.msk.bf16.mxu1 %vm4895_vm0, %v4894_v5 }
0x1447   : >> { %v2583_v2 = vpop.f32.mrb[56].mxu1 }
0x1448   : >> { %v2584_v16 = vadd.f32 %v4021_v1, %v2583_v2  ;;  %v4436_v17 = vpop.f32.mrb[57].mxu1 }
0x1449   : >> { %v2586_v18 = vpop.f32.mrb[58].mxu1  ;;  %v4067_v17 = vld [vmem:[%s5839_s8 + $0x24] sm:$0xf] }
0x144a   : >> { %v2589_v19 = vmax.f32 %v2584_v16, 0.0  ;;  %v4437_v20 = vpop.f32.mrb[59].mxu1  ;;  %v3121_v16 = vsel %vm1076_vm4, %v4064_v14, 0  ;;  %v3075_v18 = vsel %vm1076_vm4, %v4067_v17, 0 }
0x144c   : >> { %v2590_v21 = vpack.c.bf16 %v2589_v19, %v2589_v19 }
0x144e   : >> { %4447 = vmatmul.mubr.msk.bf16.vlgmr.msra.gmra.mrb[64].mxu0 %vm1631_vm5, %v2590_v21 }
0x144f   : >> { %v2771_v22 = vpop.f32.mrb[60].mxu1  ;;  %4468 = vmatprep.mubr.msk.bf16.mxu0 %vm4895_vm0, %v4894_v5 }
0x1450   : >> { %v4456_v24 = vpop.f32.mrb[61].mxu1  ;;  %v2772_v37 = vadd.f32 %v4049_v31, %v2771_v22 }
0x1451   : >> { %v2774_v25 = vpop.f32.mrb[62].mxu1 }
0x1452   : >> { %v4457_v26 = vpop.f32.mrb[63].mxu1  ;;  %v2846_v41 = vpack.c.bf16 %v2772_v37, %v2772_v37 }
0x1457   : >> { %v2839_v30 = vpop.f32.mrb[64].mxu1 }
0x1458   : >> { %v4464_v29 = vpop.f32.mrb[65].mxu1  ;;  %v2840_v33 = vadd.f32 %v4058_v28, %v2839_v30 }
0x1459   : >> { %v2842_v32 = vpop.f32.mrb[66].mxu1 }
0x145a   : >> { %v2843_v35 = vadd.f32 %v4058_v28, %v2842_v32  ;;  %v4465_v36 = vpop.f32.mrb[67].mxu1 }
0x145c   : >> { %v5513_v39 = vpack.c.bf16 %v2843_v35, %v2840_v33 }
0x145e   : >> { %2908 = vrot.lane.b32.xlu0 %v5513_v39, %s4897_s16  ;;  %2961 = vrot.lane.b32.xlu1 %v5513_v39, %s4896_s27  ;;  %v2852_v40 = vsel %vm843_vm2, %v5513_v39, 0 }
0x145f   : >> { %4467 = vmatpush3.bf16.xpose.msra.mxu0 %v2852_v40 }
0x1460   : >> { %4478 = vmatprep.subr.bf16.mxu0 %v4894_v5 }
0x1462   : >> { %2959 = vrot.lane.b32.xlu1 %v2846_v41, %s4896_s27 }
0x1466   : >> { %4469 = vmatmul.mubr.msk.bf16.vlgmr.msra.gmra.mrb[68].mxu0 %vm843_vm2, %v2846_v41 }
0x1467   : >> { %4480 = vmatprep.mubr.msk.bf16.mxu0 %vm4895_vm0, %v4894_v5 }
0x14d0   : >> { %v2909_v38 = vpop.permute.xlu0 %2908  ;;  %v2962_v42 = vpop.permute.xlu1 %2961 }
0x14d1   : >> { %v2967_v43 = vsel %vm843_vm2, %v2962_v42, 0  ;;  %4473 = vmatpush3.bf16.msra.mxu1 %v2909_v38 }
0x14d2   : >> { %4479 = vmatpush3.bf16.xpose.msra.mxu0 %v2967_v43  ;;  %4484 = vmatprep.subr.bf16.mxu1 %v4894_v5 }
0x14d3   : >> { %4490 = vmatprep.subr.bf16.mxu0 %v4894_v5 }
0x14d4   : >> { %v2960_v44 = vpop.permute.xlu1 %2959 }
0x14d9   : >> { %4481 = vmatmul.mubr.msk.bf16.vlgmr.msra.gmra.mrb[72].mxu0 %vm843_vm2, %v2960_v44 }
0x14da   : >> { %4492 = vmatprep.mubr.msk.bf16.mxu0 %vm4895_vm0, %v4894_v5  ;;  %4491 = vmatpush3.bf16.msra.mxu0 %v3075_v18 }
0x14db   : >> { %4502 = vmatprep.subr.bf16.mxu0 %v4894_v5 }
0x1521   : >> { %v5532_v45 = vpop.f32.mrb[64].mxu0 }
0x1522   : >> { %v4448_v46 = vpop.f32.mrb[65].mxu0 }
0x1523   : >> { %v2672_v47 = vpop.f32.mrb[66].mxu0 }
0x1524   : >> { %v4449_v48 = vpop.f32.mrb[67].mxu0 }
0x1539   : >> { %v2888_v49 = vpop.f32.mrb[68].mxu0 }
0x153a   : >> { %v2894_v50 = vmul.f32 0.35355338, %v2888_v49  ;;  %v4470_v51 = vpop.f32.mrb[69].mxu0 }
0x153b   : >> { %v2891_v52 = vpop.f32.mrb[70].mxu0 }
0x153c   : >> { %v2895_v53 = vadd.f32 %v5077_v0, %v2894_v50  ;;  %v4471_v54 = vpop.f32.mrb[71].mxu0 }
0x153e   : >> { %v2896_v56 = vsel %vm898_vm3, %v2895_v53, -inf }
0x153f   : >> { %2897 = vmax.xlane.f32.xlu1 %v2896_v56 }
0x1550   : >> { %3165 = vrot.lane.b32.xlu1 %v5513_v39, %s4899_s19 }
0x1554   : >> { %3163 = vrot.lane.b32.xlu1 %v2846_v41, %s4899_s19 }
0x15ac   : >> { %v3003_v57 = vpop.f32.mrb[72].mxu0 }
0x15ad   : >> { %v3009_v58 = vmul.f32 0.35355338, %v3003_v57  ;;  %v4482_v59 = vpop.f32.mrb[73].mxu0 }
0x15ae   : >> { %v3006_v23 = vpop.f32.mrb[74].mxu0 }
0x15af   : >> { %v3010_v60 = vadd.f32 %v5077_v0, %v3009_v58  ;;  %v4483_v61 = vpop.f32.mrb[75].mxu0 }
0x15b1   : >> { %v3011_v62 = vsel %vm898_vm3, %v3010_v60, -inf }
0x15b2   : >> { %3012 = vmax.xlane.f32.xlu0 %v3011_v62 }
0x15c8   : >> { %3022 = vrot.lane.b32.xlu0 %v5513_v39, %s4898_s17  ;;  %s5917_s17 = sld [smem:[#allocation28_spill]] (%p698_p11) }
0x15cc   : >> { %v2898_v63 = vpop.xlane.xlu1 %2897 }
0x15cd   : >> { %v2899_v4 = vsub.f32 %v2895_v53, %v2898_v63 }
0x15cf   : >> { %v2900_v6 = vmul.f32 1.442695, %v2899_v4 }
0x15d0   : >> { %v3166_v19 = vpop.permute.xlu1 %3165 }
0x15d1   : >> { %4714 = vpow2.f32 %v2900_v6  ;;  %v3171_v42 = vsel %vm843_vm2, %v3166_v19, 0 }
0x15d4   : >> { %v3164_v20 = vpop.permute.xlu1 %3163 }
0x15db   : >> { %v4715_v8 = vpop.eup %4714 }
0x15dc   : >> { %v2902_v9 = vsel %vm898_vm3, %v4715_v8, 0.0  ;;  %v2906_v27 = vpack.c.bf16 %v4715_v8, %v4715_v8 }
0x15dd   : >> { %2903 = vadd.xlane.f32.xlu1 %v2902_v9 }
0x15de   : >> { %4475 = vmatmul.mubr.msk.bf16.vlgmr.msra.gmra.mrb[68].mxu1 %vm898_vm3, %v2906_v27 }
0x15df   : >> { %4486 = vmatprep.mubr.msk.bf16.mxu1 %vm4895_vm0, %v4894_v5 }
0x15ee   : >> { %3322 = vrot.lane.b32.xlu1 %v2846_v41, %s4900_s20 }
0x163f   : >> { %v3013_v10 = vpop.xlane.xlu0 %3012 }
0x1640   : >> { %v3014_v11 = vsub.f32 %v3010_v60, %v3013_v10  ;;  %v4072_v10 = vld [vmem:[%s5839_s8 + $0x28] sm:$0xf] }
0x1642   : >> { %v3015_v12 = vmul.f32 1.442695, %v3014_v11  ;;  %v3279_v11 = vsel %vm1076_vm4, %v4072_v10, 0 }
0x1643   : >> { %v3023_v13 = vpop.permute.xlu0 %3022 }
0x1644   : >> { %4716 = vpow2.f32 %v3015_v12  ;;  %4485 = vmatpush3.bf16.msra.mxu1 %v3023_v13 }
0x1645   : >> { %4496 = vmatprep.subr.bf16.mxu1 %v4894_v5 }
0x164e   : >> { %v4717_v15 = vpop.eup %4716 }
0x164f   : >> { %v3017_v1 = vsel %vm898_vm3, %v4717_v15, 0.0  ;;  %v3021_v2 = vpack.c.bf16 %v4717_v15, %v4717_v15 }
0x1650   : >> { %3018 = vadd.xlane.f32.xlu0 %v3017_v1 }
0x1651   : >> { %4487 = vmatmul.mubr.msk.bf16.vlgmr.msra.gmra.mrb[72].mxu1 %vm898_vm3, %v3021_v2 }
0x1652   : >> { %4497 = vmatpush3.bf16.msra.mxu1 %v3121_v16  ;;  %4498 = vmatprep.mubr.msk.bf16.mxu1 %vm4895_vm0, %v4894_v5 }
0x1653   : >> { %4508 = vmatprep.subr.bf16.mxu1 %v4894_v5 }
0x1666   : >> { %3226 = vrot.lane.b32.xlu0 %v5513_v39, %s4901_s4 }
0x166a   : >> { %v2904_v21 = vpop.xlane.xlu1 %2903 }
0x166b   : >> { %4718 = vrcp.f32 %v2904_v21 }
0x166e   : >> { %v3323_v27 = vpop.permute.xlu1 %3322 }
0x1675   : >> { %v4719_v22 = vpop.eup %4718 }
0x16b1   : >> { %v2948_v24 = vpop.f32.mrb[68].mxu1 }
0x16b2   : >> { %v2954_v25 = vmul.f32 %v4719_v22, %v2948_v24  ;;  %v4476_v26 = vpop.f32.mrb[69].mxu1 }
0x16b3   : >> { %v2951_v28 = vpop.f32.mrb[70].mxu1 }
0x16b4   : >> { %v2955_v30 = vpack.c.bf16 %v2954_v25, %v2954_v25  ;;  %v4477_v29 = vpop.f32.mrb[71].mxu1 }
0x16b6   : >> { %4499 = vmatmul.mubr.msk.bf16.vlgmr.msra.gmra.mrb[76].mxu1 %vm843_vm2, %v2955_v30 }
0x16b7   : >> { %4510 = vmatprep.mubr.msk.bf16.mxu1 %vm4895_vm0, %v4894_v5 }
0x16dd   : >> { %v3019_v31 = vpop.xlane.xlu0 %3018 }
0x16de   : >> { %4720 = vrcp.f32 %v3019_v31 }
0x16e1   : >> { %v3227_v32 = vpop.permute.xlu0 %3226 }
0x16e2   : >> { %4509 = vmatpush3.bf16.msra.mxu1 %v3227_v32 }
0x16e3   : >> { %4520 = vmatprep.subr.bf16.mxu1 %v4894_v5 }
0x16e8   : >> { %v4721_v33 = vpop.eup %4720 }
0x1724   : >> { %v3062_v35 = vpop.f32.mrb[72].mxu1 }
0x1725   : >> { %v3068_v36 = vmul.f32 %v4721_v33, %v3062_v35  ;;  %v4488_v37 = vpop.f32.mrb[73].mxu1  ;;  %v4076_v33 = vld [vmem:[%s5839_s8 + $0x2c] sm:$0xf] }
0x1726   : >> { %v3065_v40 = vpop.f32.mrb[74].mxu1  ;;  %v3438_v35 = vsel %vm1076_vm4, %v4076_v33, 0 }
0x1727   : >> { %v3069_v41 = vpack.c.bf16 %v3068_v36, %v3068_v36  ;;  %v4489_v38 = vpop.f32.mrb[75].mxu1 }
0x1729   : >> { %4493 = vmatmul.mubr.msk.bf16.vlgmr.msra.gmra.mrb[76].mxu0 %vm843_vm2, %v3069_v41 }
0x172a   : >> { %4503 = vmatpush3.bf16.xpose.msra.mxu0 %v3171_v42  ;;  %4504 = vmatprep.mubr.msk.bf16.mxu0 %vm4895_vm0, %v4894_v5 }
0x172b   : >> { %4514 = vmatprep.subr.bf16.mxu0 %v4894_v5 }
0x1731   : >> { %4505 = vmatmul.mubr.msk.bf16.vlgmr.msra.gmra.mrb[80].mxu0 %vm843_vm2, %v3164_v20 }
0x1732   : >> { %4516 = vmatprep.mubr.msk.bf16.mxu0 %vm4895_vm0, %v4894_v5  ;;  %4515 = vmatpush3.bf16.msra.mxu0 %v3279_v11 }
0x1733   : >> { %4526 = vmatprep.subr.bf16.mxu0 %v4894_v5 }
0x1789   : >> { %v3157_v43 = vpop.f32.mrb[76].mxu1 }
0x178a   : >> { %v4500_v44 = vpop.f32.mrb[77].mxu1 }
0x178b   : >> { %v3160_v46 = vpop.f32.mrb[78].mxu1 }
0x178c   : >> { %v4501_v47 = vpop.f32.mrb[79].mxu1 }
0x17fc   : >> { %v3111_v48 = vpop.f32.mrb[76].mxu0 }
0x17fd   : >> { %v5577_v49 = vadd.f32 %v3157_v43, %v3111_v48  ;;  %v4494_v50 = vpop.f32.mrb[77].mxu0 }
0x17fe   : >> { %v3114_v51 = vpop.f32.mrb[78].mxu0 }
0x17ff   : >> { %v4495_v52 = vpop.f32.mrb[79].mxu0 }
0x1804   : >> { %v3207_v53 = vpop.f32.mrb[80].mxu0 }
0x1805   : >> { %v3213_v54 = vmul.f32 0.35355338, %v3207_v53  ;;  %v4506_v56 = vpop.f32.mrb[81].mxu0 }
0x1806   : >> { %v3210_v57 = vpop.f32.mrb[82].mxu0 }
0x1807   : >> { %v3214_v58 = vadd.f32 %v5077_v0, %v3213_v54  ;;  %v4507_v59 = vpop.f32.mrb[83].mxu0 }
0x1809   : >> { %v3215_v23 = vsel %vm898_vm3, %v3214_v58, -inf }
0x180a   : >> { %3216 = vmax.xlane.f32.xlu0 %v3215_v23 }
0x1820   : >> { %3324 = vrot.lane.b32.xlu0 %v5513_v39, %s4900_s20  ;;  %s5913_s20 = sld [smem:[#allocation13_spill]] (%p698_p11) }
0x1826   : > { %s3718_s23 = sand.u32 (%p698_p11), 1, %s5913_s20  }
0x1897   : >> { %v3217_v60 = vpop.xlane.xlu0 %3216 }
0x1898   : >> { %v3218_v61 = vsub.f32 %v3214_v58, %v3217_v60  ;;  %v3968_v60 = vld [vmem:[%s5844_s13] ss:$0 sm:$0xff] }
0x189a   : >> { %v3219_v62 = vmul.f32 1.442695, %v3218_v61 }
0x189b   : >> { %v3325_v4 = vpop.permute.xlu0 %3324 }
0x189c   : >> { %4722 = vpow2.f32 %v3219_v62  ;;  %v3330_v9 = vsel %vm843_vm2, %v3325_v4, 0 }
0x18a6   : >> { %v4723_v63 = vpop.eup %4722 }
0x18a7   : >> { %v3221_v6 = vsel %vm898_vm3, %v4723_v63, 0.0  ;;  %v3225_v8 = vpack.c.bf16 %v4723_v63, %v4723_v63  ;;  %v1670_v63 = vadd.f32 %v3968_v60, %v5346_v34 }
0x18a8   : >> { %3222 = vadd.xlane.f32.xlu0 %v3221_v6  ;;  %v4034_v6 = vld [vmem:[%s5844_s13 + $0x1] ss:$0 sm:$0xff] }
0x18a9   : >> { %4511 = vmatmul.mubr.msk.bf16.vlgmr.msra.gmra.mrb[80].mxu1 %vm898_vm3, %v3225_v8 }
0x18aa   : >> { %4521 = vmatpush3.bf16.xpose.msra.mxu1 %v3330_v9  ;;  %4522 = vmatprep.mubr.msk.bf16.mxu1 %vm4895_vm0, %v4894_v5  ;;  %v2670_v9 = vadd.f32 %v4034_v6, %v5532_v45  ;;  %v4673_v45 = vld [vmem:[%s5841_s10 + $0x28] sm:$0xff]  }
0x18ab   : >> { %4532 = vmatprep.subr.bf16.mxu1 %v4894_v5 }
0x18ac   : >> { %v2675_v11 = vadd.f32 %v2670_v9, %v5460_v7  ;;  %v4675_v7 = vld [vmem:[%s5843_s12 + $0x48] sm:$0xff]  }
0x18ae   : >> { %v2680_v34 = vsel %vm730_vm1, %v2675_v11, 0.0 }
0x18b1   : >> { %4523 = vmatmul.mubr.msk.bf16.vlgmr.msra.gmra.mrb[84].mxu1 %vm843_vm2, %v3323_v27  ;;  %v1675_v27 = vadd.f32 %v1670_v63, %v5274_v55  ;;  %v4674_v55 = vld [vmem:[%s5843_s12 + $0x40] sm:$0xff]  }
0x18b2   : >> { %4534 = vmatprep.mubr.msk.bf16.mxu1 %vm4895_vm0, %v4894_v5  ;;  %4533 = vmatpush3.bf16.msra.mxu1 %v3438_v35  ;;  %v4102_v35 = vld [vmem:[%s5844_s13 + $0x2] ss:$0 sm:$0xff] }
0x18b3   : >> { %4546 = vmatprep.subr.bf16.mxu1 %v4894_v5  ;;  %v1678_v10 = vsel %vm730_vm1, %v1675_v27, 0.0 }
0x18be   : >> { %3385 = vrot.lane.b32.xlu0 %v5513_v39, %s4902_s29  ;;  %s5907_s29 = sld [smem:[#allocation26_spill]] }
0x1935   : >> { %v3223_v12 = vpop.xlane.xlu0 %3222 }
0x1936   : >> { %4724 = vrcp.f32 %v3223_v12  ;;  %v4672_v12 = vld [vmem:[%s5841_s10 + $0x20] sm:$0xff]  }
0x1939   : >> { %v3386_v18 = vpop.permute.xlu0 %3385 }
0x1940   : >> { %v4725_v13 = vpop.eup %4724 }
0x197c   : >> { %v3266_v14 = vpop.f32.mrb[80].mxu1 }
0x197d   : >> { %v3272_v15 = vmul.f32 %v4725_v13, %v3266_v14  ;;  %v4512_v1 = vpop.f32.mrb[81].mxu1 }
0x197e   : >> { %v3269_v2 = vpop.f32.mrb[82].mxu1 }
0x197f   : >> { %v3273_v16 = vpack.c.bf16 %v3272_v15, %v3272_v15  ;;  %v4513_v17 = vpop.f32.mrb[83].mxu1  ;;  %v4082_v2 = vld [vmem:[%s5845_s14 + $0x2] ss:$0 sm:$0xff] }
0x1980   : >> { %v4083_v17 = vld [vmem:[%s5846_s15 + $0x2] ss:$0 sm:$0xff] }
0x1981   : >> { %4517 = vmatmul.mubr.msk.bf16.vlgmr.msra.gmra.mrb[84].mxu0 %vm843_vm2, %v3273_v16 }
0x1982   : >> { %4527 = vmatpush3.bf16.msra.mxu0 %v3386_v18  ;;  %4528 = vmatprep.mubr.msk.bf16.mxu0 %vm4895_vm0, %v4894_v5 }
0x1983   : >> { %4538 = vmatprep.subr.bf16.mxu0 %v4894_v5 }
0x1984   : >> { %v3366_v39 = vpop.f32.mrb[84].mxu1 }
0x1985   : >> { %v3372_v19 = vmul.f32 0.35355338, %v3366_v39  ;;  %v4524_v20 = vpop.f32.mrb[85].mxu1 }
0x1986   : >> { %v3369_v21 = vpop.f32.mrb[86].mxu1  ;;  %v4676_v20 = vld [vmem:[%s5843_s12 + $0x50] sm:$0xff]  }
0x1987   : >> { %v3373_v22 = vadd.f32 %v5077_v0, %v3372_v19  ;;  %v4525_v24 = vpop.f32.mrb[87].mxu1  ;;  %v4677_v21 = vld [vmem:[%s5843_s12 + $0x58] sm:$0xff]  }
0x1989   : >> { %v3374_v25 = vsel %vm898_vm3, %v3373_v22, -inf }
0x198a   : >> { %3375 = vmax.xlane.f32.xlu1 %v3374_v25 }
0x1a17   : >> { %v3376_v26 = vpop.xlane.xlu1 %3375 }
0x1a18   : >> { %v3377_v28 = vsub.f32 %v3373_v22, %v3376_v26  ;;  %v4089_v22 = vld [vmem:[%s5842_s11 + $0x2] ss:$0 sm:$0xff] }
0x1a1a   : >> { %v3378_v30 = vmul.f32 1.442695, %v3377_v28 }
0x1a1c   : >> { %4726 = vpow2.f32 %v3378_v30 }
0x1a26   : >> { %v4727_v29 = vpop.eup %4726 }
0x1a27   : >> { %v3380_v31 = vsel %vm898_vm3, %v4727_v29, 0.0  ;;  %v3384_v32 = vpack.c.bf16 %v4727_v29, %v4727_v29 }
0x1a28   : >> { %3381 = vadd.xlane.f32.xlu1 %v3380_v31 }
0x1a29   : >> { %4529 = vmatmul.mubr.msk.bf16.vlgmr.msra.gmra.mrb[88].mxu0 %vm898_vm3, %v3384_v32 }
0x1a2a   : >> { %4542 = vmatprep.mubr.msk.bf16.mxu0 %vm4895_vm0, %v4894_v5  ;;  %4539 = vmatpush3.bf16.msra.mxu0 %v4672_v12 }
0x1a2b   : >> { %4540 = vmatprep.subr.bf16.mxu0 %v4894_v5 }
0x1a2e   : >> { %4541 = vmatpush3.bf16.msra.mxu0 %v4673_v45 }
0x1a54   : >> { %v3315_v36 = vpop.f32.mrb[84].mxu0 }
0x1a55   : >> { %v3321_v37 = vadd.f32 %v3315_v36, %v5577_v49  ;;  %v4518_v40 = vpop.f32.mrb[85].mxu0  ;;  %v4079_v49 = vld [vmem:[%s5840_s9 + $0x2] ss:$0 sm:$0xff] }
0x1a56   : >> { %v3318_v41 = vpop.f32.mrb[86].mxu0 }
0x1a57   : >> { %v4519_v38 = vpop.f32.mrb[87].mxu0 }
0x1ab5   : >> { %v3382_v42 = vpop.xlane.xlu1 %3381 }
0x1ab6   : >> { %4728 = vrcp.f32 %v3382_v42 }
0x1ac0   : >> { %v4729_v43 = vpop.eup %4728 }
0x1afc   : >> { %v3425_v44 = vpop.f32.mrb[88].mxu0 }
0x1afd   : >> { %v3431_v46 = vmul.f32 %v4729_v43, %v3425_v44  ;;  %v4530_v47 = vpop.f32.mrb[89].mxu0 }
0x1afe   : >> { %v3428_v48 = vpop.f32.mrb[90].mxu0 }
0x1aff   : >> { %v3432_v50 = vpack.c.bf16 %v3431_v46, %v3431_v46  ;;  %v4531_v51 = vpop.f32.mrb[91].mxu0 }
0x1b01   : >> { %4535 = vmatmul.mubr.msk.bf16.vlgmr.msra.gmra.mrb[88].mxu1 %vm843_vm2, %v3432_v50 }
0x1b02   : >> { %4554 = vmatprep.mubr.msk.bf16.mxu1 %vm4895_vm0, %v4894_v5  ;;  %4547 = vmatpush3.bf16.msra.mxu1 %v4674_v55 }
0x1b03   : >> { %4548 = vmatprep.subr.bf16.mxu1 %v4894_v5 }
0x1b06   : >> { %4549 = vmatpush3.bf16.msra.mxu1 %v4675_v7 }
0x1b07   : >> { %4550 = vmatprep.subr.bf16.mxu1 %v4894_v5 }
0x1b0a   : >> { %4551 = vmatpush3.bf16.msra.mxu1 %v4676_v20 }
0x1b0b   : >> { %4552 = vmatprep.subr.bf16.mxu1 %v4894_v5 }
0x1b0e   : >> { %4553 = vmatpush3.bf16.msra.mxu1 %v4677_v21 }
0x1bd4   : >> { %v3474_v52 = vpop.f32.mrb[88].mxu1 }
0x1bd5   : >> { %v3480_v53 = vadd.f32 %v3474_v52, %v3321_v37  ;;  %v4536_v54 = vpop.f32.mrb[89].mxu1 }
0x1bd6   : >> { %v3477_v56 = vpop.f32.mrb[90].mxu1 }
0x1bd7   : >> { %v3489_v57 = vadd.f32 %v4079_v49, %v3480_v53  ;;  %v4537_v58 = vpop.f32.mrb[91].mxu1 }
0x1bd9   : >> { %v3490_v59 = vadd.f32 %v4880_v3, %v3489_v57 }
0x1bdb   : >> { %v3495_v23 = vsel %vm730_vm1, %v3490_v59, 0.0 }
0x1bdc   : >> { %3496 = vadd.xlane.f32.xlu0 %v3495_v23 }
0x1c69   : >> { %v3497_v61 = vpop.xlane.xlu0 %3496 }
0x1c6a   : >> { %v3498_v62 = vmul.f32 0.03125, %v3497_v61 }
0x1c6c   : >> { %v3499_v4 = vsub.f32 %v3490_v59, %v3498_v62 }
0x1c6e   : >> { %v3500_v8 = vmul.f32 %v3499_v4, %v3499_v4 }
0x1c70   : >> { %v3501_v3 = vsel %vm730_vm1, %v3500_v8, 0.0  ;;  %v3975_v8 = vld [vmem:[%s5908_s24] ss:$0 sm:$0xff]  ;;  %s5714_s24 = sshll.u32 (%p698_p11), %s5913_s20, 7  ;;  %s5732_s20 = scalar_lea.sflag (%p698_p11), [#allocation5], %s3718_s23 }
0x1c71   : >> { %3502 = vadd.xlane.f32.xlu1 %v3501_v3  ;;  %s5720_s28 = scalar_lea.hbm (%p698_p11), %s5916_s26, %s5714_s24  ;;  %s5730_s19 = scalar_lea.hbm (%p698_p11), %s5917_s17, %s5714_s24 }
0x1c75   : >> { %1679 = vadd.xlane.f32.xlu1 %v1678_v10 }
0x1c79   : >> { %2681 = vadd.xlane.f32.xlu1 %v2680_v34  ;;  %v4043_v34 = vld [vmem:[%s5909_s30 + $0x1] ss:$0 sm:$0xff] }
0x1cfe   : >> { %v3503_v13 = vpop.xlane.xlu1 %3502 }
0x1cff   : >> { %v3504_v14 = vmul.f32 0.03125, %v3503_v13 }
0x1d01   : >> { %v3505_v15 = vadd.f32 1e-05, %v3504_v14 }
0x1d02   : >> { %v1680_v32 = vpop.xlane.xlu1 %1679 }
0x1d03   : >> { %4730 = vrsqrt.f32 %v3505_v15  ;;  %v1681_v5 = vmul.f32 0.03125, %v1680_v32  ;;  %v4110_v15 = vld [vmem:[%s5907_s29 + $0x2] ss:$0 sm:$0xff] }
0x1d05   : >> { %v1682_v37 = vsub.f32 %v1675_v27, %v1681_v5  ;;  %v4042_v27 = vld [vmem:[%s5907_s29 + $0x1] ss:$0 sm:$0xff] }
0x1d06   : >> { %v2682_v33 = vpop.xlane.xlu1 %2681 }
0x1d07   : >> { %v2683_v40 = vmul.f32 0.03125, %v2682_v33  ;;  %v1683_v48 = vmul.f32 %v1682_v37, %v1682_v37 }
0x1d09   : >> { %v2684_v46 = vsub.f32 %v2675_v11, %v2683_v40  ;;  %v1684_v50 = vsel %vm730_vm1, %v1683_v48, 0.0 }
0x1d0b   : >> { %v2685_v51 = vmul.f32 %v2684_v46, %v2684_v46 }
0x1d0d   : >> { %v4731_v1 = vpop.eup %4730  ;;  %v2686_v52 = vsel %vm730_vm1, %v2685_v51, 0.0 }
0x1d0e   : >> { %v3507_v16 = vmul.f32 %v4731_v1, %v3499_v4  ;;  %v3974_v4 = vld [vmem:[%s5907_s29] ss:$0 sm:$0xff] }
0x1d10   : >> { %v3514_v18 = vmul.f32 %v4082_v2, %v3507_v16  ;;  %v4111_v2 = vld [vmem:[%s5909_s30 + $0x2] ss:$0 sm:$0xff] }
0x1d12   : >> { %v3521_v39 = vadd.f32 %v4083_v17, %v3514_v18 }
0x1d14   : >> { %v3522_v19 = vpack.c.bf16 %v3521_v39, %v3521_v39 }
0x1d16   : >> { %4543 = vmatmul.mubr.msk.bf16.vlgmr.msra.gmra.mrb[92].mxu0 %vm730_vm1, %v3522_v19 }
0x1de9   : >> { %v3585_v24 = vpop.f32.mrb[92].mxu0 }
0x1dea   : >> { %v3586_v25 = vadd.f32 %v4089_v22, %v3585_v24  ;;  %v4544_v26 = vpop.f32.mrb[93].mxu0 }
0x1deb   : >> { %v3588_v28 = vpop.f32.mrb[94].mxu0 }
0x1dec   : >> { %v3591_v30 = vmax.f32 %v3586_v25, 0.0  ;;  %v4545_v29 = vpop.f32.mrb[95].mxu0 }
0x1dee   : >> { %v3592_v31 = vpack.c.bf16 %v3591_v30, %v3591_v30 }
0x1df0   : >> { %4555 = vmatmul.mubr.msk.bf16.vlgmr.msra.gmra.mrb[92].mxu1 %vm1631_vm5, %v3592_v31 }
0x1ec3   : >> { %v3671_v36 = vpop.f32.mrb[92].mxu1 }
0x1ec4   : >> { %v3672_v41 = vadd.f32 %v4102_v35, %v3671_v36  ;;  %v4556_v38 = vpop.f32.mrb[93].mxu1 }
0x1ec5   : >> { %v3674_v42 = vpop.f32.mrb[94].mxu1 }
0x1ec6   : >> { %v4557_v43 = vpop.f32.mrb[95].mxu1  ;;  %v3677_v44 = vadd.f32 %v3672_v41, %v3521_v39 }
0x1ec8   : >> { %v3682_v47 = vsel %vm730_vm1, %v3677_v44, 0.0 }
0x1ec9   : >> { %3683 = vadd.xlane.f32.xlu1 %v3682_v47 }
0x1ecd   : >> { %1685 = vadd.xlane.f32.xlu1 %v1684_v50 }
0x1ed1   : >> { %2687 = vadd.xlane.f32.xlu1 %v2686_v52 }
0x1f56   : >> { %v3684_v49 = vpop.xlane.xlu1 %3683 }
0x1f57   : >> { %v3685_v53 = vmul.f32 0.03125, %v3684_v49 }
0x1f59   : >> { %v3686_v54 = vsub.f32 %v3677_v44, %v3685_v53 }
0x1f5a   : >> { %v1686_v56 = vpop.xlane.xlu1 %1685 }
0x1f5b   : >> { %v1687_v57 = vmul.f32 0.03125, %v1686_v56  ;;  %v3687_v58 = vmul.f32 %v3686_v54, %v3686_v54 }
0x1f5d   : >> { %v1688_v59 = vadd.f32 1e-05, %v1687_v57  ;;  %v3688_v23 = vsel %vm730_vm1, %v3687_v58, 0.0 }
0x1f5e   : >> { %3689 = vadd.xlane.f32.xlu1 %v3688_v23  ;;  %v2688_v60 = vpop.xlane.xlu1 %2687 }
0x1f5f   : >> { %4732 = vrsqrt.f32 %v1688_v59  ;;  %v2689_v61 = vmul.f32 0.03125, %v2688_v60 }
0x1f61   : >> { %v2690_v62 = vadd.f32 1e-05, %v2689_v61 }
0x1f63   : >> { %4734 = vrsqrt.f32 %v2690_v62 }
0x1f69   : >> { %v4733_v63 = vpop.eup %4732 }
0x1f6a   : >> { %v1690_v6 = vmul.f32 %v4733_v63, %v1682_v37 }
0x1f6c   : >> { %v1697_v9 = vmul.f32 %v3974_v4, %v1690_v6 }
0x1f6d   : >> { %v4735_v3 = vpop.eup %4734 }
0x1f6e   : >> { %v1704_v10 = vadd.f32 %v3975_v8, %v1697_v9   ;;  %v2692_v11 = vmul.f32 %v4735_v3, %v2684_v46 }
0x1f70   : >> { %v2699_v12 = vmul.f32 %v4042_v27, %v2692_v11  ;;  %3710 = vst.msk [vmem:[%s5872_s2] sm:$0xff] (%p698_p11), %vm730_vm1, %v1704_v10 }
0x1f72   : >> { %v2706_v45 = vadd.f32 %v4043_v34, %v2699_v12  }
0x1f74   : > { %3711 = vst.msk [vmem:[%s668_s25] sm:$0xff] (%p698_p11), %vm730_vm1, %v2706_v45  ;;  %s4744_s25 = scalar_lea.vmem (%p698_p11), %s4743_s21, 256 }
0x1feb   : >> { %v3690_v55 = vpop.xlane.xlu1 %3689 }
0x1fec   : >> { %v3691_v7 = vmul.f32 0.03125, %v3690_v55 }
0x1fee   : >> { %v3692_v13 = vadd.f32 1e-05, %v3691_v7 }
0x1ff0   : >> { %4736 = vrsqrt.f32 %v3692_v13 }
0x1ffa   : >> { %v4737_v14 = vpop.eup %4736 }
0x1ffb   : >> { %v3694_v1 = vmul.f32 %v4737_v14, %v3686_v54  ;;  %700 = sbr.rel (!%p698_p11) target bundleno = 50 (0x32), region = 203 }
0x1ffd   : >> { %v3701_v16 = vmul.f32 %v4110_v15, %v3694_v1  ;;  %v5912_v1 = vmov %v1704_v10 }
0x1fff   : >> { %v3708_v17 = vadd.f32 %v4111_v2, %v3701_v16   ;;  %v5911_v2 = vmov %v2706_v45 }
0x2001   : >> { %v5910_v3 = vmov %v3708_v17  ;;  %3712 = vst.msk [vmem:[%s5915_s22] sm:$0xff] (%p698_p11), %vm730_vm1, %v3708_v17  ;;  %s4738_s22 = scalar_lea.vmem (%p698_p11), %s5724_s1, 128 }
0x2002   : > { %p4739_p12 = scmp.ne.s32.totalorder %s5724_s1, %s4738_s22  ;;  %p4746_p2 = scmp.lt.s32.totalorder %s4744_s25, %s4738_s22 }
0x2004   : > { %p4740_p13 = pnand %p4739_p12, %p5051_p5  ;;  %p4747_p3 = por %p4746_p2, %p4745_p1 }
0x2006   : > { %p4741_p0 = pneg %p4740_p13 }
0x2008   : > { %p4748_p4 = pnand %p4747_p3, %p4741_p0 }
0x200a   : > { %4751 = shalt.err (!%p4748_p4)
}
0x200b   : > { %s4752_s23 = scalar_lea.hbm %s5720_s28, 128  ;;  %s4756_s18 = scalar_lea.hbm %s5916_s26, 256 }
0x200c   : > { %p4753_p7 = scmp.ne.s32.totalorder %s5720_s28, %s4752_s23  ;;  %p4757_p10 = scmp.lt.u32.totalorder %s5720_s28, %s5916_s26 }
0x200d   : > { %p4758_p11 = scmp.lt.u32.totalorder %s4756_s18, %s4752_s23  ;;  %p4760_p13 = scmp.lt.u32.totalorder %s4752_s23, %s5720_s28 }
0x200e   : > { %p4754_p8 = pnand %p4753_p7, %p5051_p5 }
0x200f   : > { %p4759_p12 = por %p4758_p11, %p4757_p10 }
0x2010   : > { %p4755_p9 = pneg %p4754_p8 }
0x2011   : > { %p4761_p0 = por %p4760_p13, %p4759_p12 }
0x2013   : > { %p4762_p1 = pnand %p4761_p0, %p4755_p9 }
0x2015   : > { %4765 = shalt.err (!%p4762_p1)
}
0x2016   : > { %s5918_s22 = sld [smem:[#allocation10_spill]]  ;;  %s5919_s25 = scalar_lea.vmem [#allocation2], %s5065_s0 }
0x2017   : > { %4559 = dma.vmem_to_hbm [thread:$0]  (%p5051_p5), %s5724_s1, 128, %s5720_s28, %s5732_s20  }
0x2018   : > { %s3737_s2 = sshll.u32 %s5919_s25, 4  ;;  %s5920_s18 = sld [smem:[#allocation30_spill]]  ;;  %s5764_s2 = int_to_ptr.vmem [resolvable:$true] %s3737_s2 }
0x2019   : > { %s5921_s21 = scalar_lea.vmem [#allocation6], %s5065_s0  ;;  %s4766_s7 = scalar_lea.vmem %s5764_s2, 128 }
0x201a   : > { %s5768_s3 = sshll.u32 %s5921_s21, 4  ;;  %p4767_p2 = scmp.ne.s32.totalorder %s5764_s2, %s4766_s7  ;;  %s3764_s3 = int_to_ptr.vmem [resolvable:$true] %s5768_s3 }
0x201b   : > { %s4904_s28 = smov [#allocation2]  }
0x201c   : > { %s5922_s5 = sand.u32 1, %s5918_s22   ;;  %p4768_p3 = pnand %p4767_p2, %p5051_p5 }
0x201d   : > { %s3714_s6 = scalar_lea.sflag [#allocation3], %s5922_s5  ;;  %s4770_s1 = sshll.u32 %s4904_s28, 4  ;;  %s4771_s1 = int_to_ptr.vmem [resolvable:$false] %s4770_s1 }
0x201e   : > { %s5762_s23 = scalar_lea.hbm %s5920_s18, %s5714_s24  ;;  %p4769_p4 = pneg %p4768_p3 }
0x201f   : > { %s4772_s24 = scalar_lea.vmem %s4771_s1, 256  ;;  %p4773_p7 = scmp.lt.s32.totalorder %s5764_s2, %s4771_s1 }
0x2020   : > { %p4774_p8 = scmp.lt.s32.totalorder %s4772_s24, %s4766_s7 }
0x2022   : > { %p4775_p9 = por %p4774_p8, %p4773_p7 }
0x2024   : > { %p4776_p10 = pnand %p4775_p9, %p4769_p4 }
0x2026   : > { %4779 = shalt.err (!%p4776_p10)
}
0x2027   : > { %s4780_s5 = scalar_lea.hbm %s5730_s19, 128  ;;  %s4784_s25 = scalar_lea.hbm %s5917_s17, 256 }
0x2028   : > { %p4781_p11 = scmp.ne.s32.totalorder %s5730_s19, %s4780_s5  ;;  %p4785_p0 = scmp.lt.u32.totalorder %s5730_s19, %s5917_s17 }
0x2029   : > { %p4786_p1 = scmp.lt.u32.totalorder %s4784_s25, %s4780_s5  ;;  %p4788_p3 = scmp.lt.u32.totalorder %s4780_s5, %s5730_s19 }
0x202a   : > { %p4782_p12 = pnand %p4781_p11, %p5051_p5 }
0x202b   : > { %p4787_p2 = por %p4786_p1, %p4785_p0 }
0x202c   : > { %p4783_p13 = pneg %p4782_p12 }
0x202d   : > { %p4789_p4 = por %p4788_p3, %p4787_p2 }
0x202f   : > { %p4790_p7 = pnand %p4789_p4, %p4783_p13 }
0x2031   : > { %4793 = shalt.err (!%p4790_p7)
}
0x2032   : > { %4558 = dma.vmem_to_hbm [thread:$0]  (%p5051_p5), %s5764_s2, 128, %s5730_s19, %s3714_s6  }
0x2033   : > { %s4794_s7 = scalar_lea.vmem %s3764_s3, 128  ;;  %s4905_s21 = smov [#allocation6]  }
0x2034   : > { %p4795_p8 = scmp.ne.s32.totalorder %s3764_s3, %s4794_s7  ;;  %s4798_s28 = sshll.u32 %s4905_s21, 4  ;;  %s4799_s28 = int_to_ptr.vmem [resolvable:$false] %s4798_s28 }
0x2035   : > { %s4800_s1 = scalar_lea.vmem %s4799_s28, 256  ;;  %p4801_p11 = scmp.lt.s32.totalorder %s3764_s3, %s4799_s28 }
0x2036   : > { %p4796_p9 = pnand %p4795_p8, %p5051_p5  ;;  %p4802_p12 = scmp.lt.s32.totalorder %s4800_s1, %s4794_s7 }
0x2038   : > { %p4797_p10 = pneg %p4796_p9  ;;  %p4803_p13 = por %p4802_p12, %p4801_p11 }
0x203a   : > { %p4804_p0 = pnand %p4803_p13, %p4797_p10 }
0x203c   : > { %4807 = shalt.err (!%p4804_p0)
}
0x203d   : > { %s4808_s6 = scalar_lea.hbm %s5762_s23, 128  ;;  %s4812_s24 = scalar_lea.hbm %s5920_s18, 256 }
0x203e   : > { %p4809_p1 = scmp.ne.s32.totalorder %s5762_s23, %s4808_s6  ;;  %p4813_p4 = scmp.lt.u32.totalorder %s5762_s23, %s5920_s18 }
0x203f   : > { %p4814_p7 = scmp.lt.u32.totalorder %s4812_s24, %s4808_s6  ;;  %p4816_p9 = scmp.lt.u32.totalorder %s4808_s6, %s5762_s23 }
0x2040   : > { %p4810_p2 = pnand %p4809_p1, %p5051_p5 }
0x2041   : > { %p4815_p8 = por %p4814_p7, %p4813_p4 }
0x2042   : > { %p4811_p3 = pneg %p4810_p2 }
0x2043   : > { %p4817_p10 = por %p4816_p9, %p4815_p8 }
0x2045   : > { %p4818_p11 = pnand %p4817_p10, %p4811_p3 }
0x2047   : > { %4821 = shalt.err (!%p4818_p11)
}
0x2048   : > { %4560 = dma.vmem_to_hbm [thread:$0]  (%p5051_p5), %s3764_s3, 128, %s5762_s23, %s5732_s20  }
0x2049 PF: > { %s5923_s22 = sld [smem:[#allocation12_spill]]  ;;  %s5924_s25 = sld [smem:[#allocation9_spill]] }
0x204f   : > { %p4574_p12 = scmp.ge.s32.totalorder %s5923_s22, 2  ;;  %s3775_s16 = sand.u32 1, %s5924_s25  }
0x2050   : > { %s3776_s7 = scalar_lea.sflag [#allocation3], %s3775_s16 }
0x2051   : > { %p4565_p13 = pnand %p4574_p12, %p5055_p6 }
0x2053   : > { %4855 = dma.done.wait (!%p4565_p13), %s3776_s7, 128  }
0x2054   : > { %4857 = vsyncadd (!%p4565_p13), %s3776_s7, 4294967168  ;;  %s5926_s21 = sadd.s32 4294967294, %s5923_s22  }
0x2055   : > { %s3784_s28 = sand.u32 1, %s5926_s21  }
0x2056   : > { %s3785_s1 = scalar_lea.sflag [#allocation5], %s3784_s28 }
0x2057   : > { %4859 = dma.done.wait (!%p4565_p13), %s3785_s1, 256  }
0x2058   : > { %4861 = vsyncadd (!%p4565_p13), %s3785_s1, 4294967040  ;;  %s5927_s24 = sld [smem:[#allocation14_spill]]  ;;  %s5928_s1 = sld [smem:[#allocation10_spill]] }
0x2059   : > { %s5929_s22 = sld [smem:[#allocation11_spill]]  ;;  %s5930_s23 = sld [smem:[#allocation15_spill]] }
0x205e   : > { %p34_p5 = scmp.ge.s32.totalorder %s5927_s24, 4  }
0x2060   :  { %36 = sbr.rel (!%p34_p5) target bundleno = 19 (0x13), region = 214 }
0x2067   :  { %3799 = vsyncpa [#allocation3], 1 }
0x2068   :  { %3801 = vsyncpa [#allocation3 + $0x1], 1 }
0x2069   :  { %3802 = vsyncpa [#allocation5], 1 }
0x206a   :  { %3804 = vsyncpa [#allocation5 + $0x1], 1 }

</bundles_post_ra>
